<compile_context>
chip_gen: v7x
topology: tpu7x:2x2x1
jax: 0.10.0
libtpu: 0.0.40
codegen_flags: <defaults>
</compile_context>

<pallas_src>
import functools

import jax
import jax.numpy as jnp
from jax.experimental import pallas as pl
from jax.experimental.pallas import tpu as pltpu

EPS = 1e-5


def _resblock_kernel(x_ref, w1_ref, s1_ref, t1_ref, w2_ref, s2_ref, t2_ref,
                     out_ref,
                     xpad_ref, hpad_ref, cat_ref, acc_ref,
                     *, H, W, C, K):
    """One batch element per grid step.

    x_ref   : (H, W, C)       f32   input block (N dim squeezed)
    w*_ref  : (K, K*C, C)     bf16  conv weights, taps flattened as (kw, ci)
    s*,t*   : (1, C)          f32   folded BN scale / shift
    out_ref : (H, W, C)       f32
    xpad_ref, hpad_ref : (H+K-1, W+K-1, C) bf16 VMEM  (halo-padded x / h1)
    cat_ref : ((H+K-1)*W, K*C) bf16 VMEM  (kw-concatenated patch matrix)
    acc_ref : (H*W, C)        f32  VMEM   (conv accumulator)
    """
    P = K // 2                                     # halo width (=1 for 3x3)

    # Zero the padded scratches every step (cheap vs. the matmuls) so the halo
    # is correct even when the batch axis is sharded across TensorCores
    # (program_id==0 init would be wrong under "parallel" megacore sharding).
    xpad_ref[...] = jnp.zeros_like(xpad_ref)
    hpad_ref[...] = jnp.zeros_like(hpad_ref)
    xpad_ref[P:P + H, P:P + W, :] = x_ref[...].astype(xpad_ref.dtype)

    def conv3x3(src_pad_ref, w_ref):
        # Build the kw-concatenated patch matrix once:
        #   cat[h*W + w, kw*C + c] = src_pad[h, w + kw, c]
        cat = jnp.concatenate(
            [src_pad_ref[:, kw:kw + W, :] for kw in range(K)], axis=-1)
        cat_ref[...] = cat.reshape((H + K - 1) * W, K * C)
        # K matmuls with a K*C-deep contraction, accumulated in f32 in VMEM.
        acc_ref[...] = jnp.dot(cat_ref[0:H * W, :], w_ref[0],
                               preferred_element_type=jnp.float32)
        for kh in range(1, K):
            acc_ref[...] += jnp.dot(cat_ref[kh * W:kh * W + H * W, :],
                                    w_ref[kh],
                                    preferred_element_type=jnp.float32)

    # ---- conv1 + bn1 (folded affine) + relu ----
    conv3x3(xpad_ref, w1_ref)
    h1 = jnp.maximum(acc_ref[...] * s1_ref[...] + t1_ref[...], 0.0)
    hpad_ref[P:P + H, P:P + W, :] = h1.reshape(H, W, C).astype(hpad_ref.dtype)

    # ---- conv2 + bn2 (folded affine) + residual add ----
    conv3x3(hpad_ref, w2_ref)
    y = acc_ref[...] * s2_ref[...] + t2_ref[...]
    out_ref[...] = (y.reshape(H, W, C) + x_ref[...]).astype(out_ref.dtype)


def _fold_bn(gamma, beta, running_mean, running_var, conv_bias):
    """Fold Conv bias + eval-mode BatchNorm into one per-channel affine."""
    scale = gamma * jax.lax.rsqrt(running_var + EPS)
    shift = beta + (conv_bias - running_mean) * scale
    return (scale.reshape(1, -1).astype(jnp.float32),
            shift.reshape(1, -1).astype(jnp.float32))


def residual_block_forward(x_nchw, params):
    """Full ResidualBlock forward. Input/output layout: NCHW (PyTorch)."""
    N, C, H, W = x_nchw.shape
    K = params["w1"].shape[0]
    assert params["w1"].shape == (K, K, C, C), "ResidualBlock needs C_in == C_out"
    # TODO(synk): sublane-aligned rows assumed; generic W would need padding.
    assert W % 8 == 0, "kernel assumes W is a multiple of 8"

    x = jnp.transpose(x_nchw, (0, 2, 3, 1)).astype(jnp.float32)      # NHWC

    # Conv weights (K, K, C_in, C_out) -> (K, K*C_in, C_out) bf16 (MXU operand).
    w1 = params["w1"].reshape(K, K * C, C).astype(jnp.bfloat16)
    w2 = params["w2"].reshape(K, K * C, C).astype(jnp.bfloat16)
    s1, t1 = _fold_bn(params["g1"], params["beta1"], params["rm1"],
                      params["rv1"], params["b1"])
    s2, t2 = _fold_bn(params["g2"], params["beta2"], params["rm2"],
                      params["rv2"], params["b2"])

    Hp, Wp = H + K - 1, W + K - 1
    # Explicit VMEM budget: double-buffered x/out blocks + weights + scratch.
    block_bytes = 2 * 2 * (H * W * C * 4)
    weight_bytes = 2 * 2 * (K * (K * C) * C * 2)
    scratch_bytes = (2 * Hp * Wp * C * 2 + Hp * W * K * C * 2 + H * W * C * 4)
    vmem_limit = min(max(int(1.5 * (block_bytes + weight_bytes + scratch_bytes))
                         + (2 << 20), 32 << 20), 56 << 20)

    kernel = functools.partial(_resblock_kernel, H=H, W=W, C=C, K=K)
    out = pl.pallas_call(
        kernel,
        out_shape=jax.ShapeDtypeStruct((N, H, W, C), jnp.float32),
        grid=(N,),
        in_specs=[
            pl.BlockSpec((None, H, W, C), lambda n: (n, 0, 0, 0)),   # x
            pl.BlockSpec((K, K * C, C), lambda n: (0, 0, 0)),        # w1
            pl.BlockSpec((1, C), lambda n: (0, 0)),                  # scale1
            pl.BlockSpec((1, C), lambda n: (0, 0)),                  # shift1
            pl.BlockSpec((K, K * C, C), lambda n: (0, 0, 0)),        # w2
            pl.BlockSpec((1, C), lambda n: (0, 0)),                  # scale2
            pl.BlockSpec((1, C), lambda n: (0, 0)),                  # shift2
        ],
        out_specs=pl.BlockSpec((None, H, W, C), lambda n: (n, 0, 0, 0)),
        scratch_shapes=[
            pltpu.VMEM((Hp, Wp, C), jnp.bfloat16),       # padded x
            pltpu.VMEM((Hp, Wp, C), jnp.bfloat16),       # padded h1
            pltpu.VMEM((Hp * W, K * C), jnp.bfloat16),   # kw-concat patches
            pltpu.VMEM((H * W, C), jnp.float32),         # conv accumulator
        ],
        compiler_params=pltpu.CompilerParams(
            dimension_semantics=("parallel",),
            vmem_limit_bytes=vmem_limit),
    )(x, w1, s1, t1, w2, s2, t2)

    return jnp.transpose(out, (0, 3, 1, 2))                          # back to NCHW


def _reference_forward(x_nchw, params):
    """Pure-JAX reference (uses bf16-rounded weights like the kernel's MXU)."""
    x = jnp.transpose(x_nchw, (0, 2, 3, 1)).astype(jnp.float32)
    w1 = params["w1"].astype(jnp.bfloat16).astype(jnp.float32)
    w2 = params["w2"].astype(jnp.bfloat16).astype(jnp.float32)
    s1, t1 = _fold_bn(params["g1"], params["beta1"], params["rm1"],
                      params["rv1"], params["b1"])
    s2, t2 = _fold_bn(params["g2"], params["beta2"], params["rm2"],
                      params["rv2"], params["b2"])
    dn = ("NHWC", "HWIO", "NHWC")
    h = jax.lax.conv_general_dilated(x, w1, (1, 1), "SAME", dimension_numbers=dn)
    h = jnp.maximum(h * s1 + t1, 0.0)
    y = jax.lax.conv_general_dilated(h, w2, (1, 1), "SAME", dimension_numbers=dn)
    y = y * s2 + t2 + x
    return jnp.transpose(y, (0, 3, 1, 2))


def init_params(key, c, k=3):
    """Deterministic synthetic parameters (Conv2d + eval-mode BatchNorm2d)."""
    ks = jax.random.split(key, 12)
    scale = 1.0 / float(jnp.sqrt(c * k * k))
    u = lambda kk, shape: jax.random.uniform(kk, shape, jnp.float32, -scale, scale)
    return {
        "w1": u(ks[0], (k, k, c, c)),
        "b1": u(ks[1], (c,)),
        "g1": 1.0 + 0.1 * jax.random.normal(ks[2], (c,), jnp.float32),
        "beta1": 0.1 * jax.random.normal(ks[3], (c,), jnp.float32),
        "rm1": 0.1 * jax.random.normal(ks[4], (c,), jnp.float32),
        "rv1": jax.random.uniform(ks[5], (c,), jnp.float32, 0.2, 1.0),
        "w2": u(ks[6], (k, k, c, c)),
        "b2": u(ks[7], (c,)),
        "g2": 1.0 + 0.1 * jax.random.normal(ks[8], (c,), jnp.float32),
        "beta2": 0.1 * jax.random.normal(ks[9], (c,), jnp.float32),
        "rm2": 0.1 * jax.random.normal(ks[10], (c,), jnp.float32),
        "rv2": jax.random.uniform(ks[11], (c,), jnp.float32, 0.2, 1.0),
    }


if __name__ == "__main__":
    # GRconvNet's residual blocks run at C = 32*4 = 128 channels (lane-dense);
    # keep the spatial/batch dims small for the demo.
    N, C, H, W = 2, 128, 16, 16
    key = jax.random.PRNGKey(0)
    kx, kp = jax.random.split(key)
    x = jax.random.normal(kx, (N, C, H, W), jnp.float32)
    params = init_params(kp, C, k=3)

    out = jax.jit(residual_block_forward)(x, params)
    out = jax.block_until_ready(out)
    assert out.shape == (N, C, H, W) and out.dtype == jnp.float32

    ref = _reference_forward(x, params)
    err = float(jnp.max(jnp.abs(out - ref)))
    assert err < 1e-1, f"max abs error too large: {err}"
    print("KERNEL_OK")
</pallas_src>

<mosaic_0001>
module attributes {stable_mosaic.version = 11 : i64} {
  func.func @_resblock_kernel(%arg0: i32, %arg1: memref<1x16x16x128xf32, #tpu.memory_space<vmem>>, %arg2: memref<3x384x128xbf16, #tpu.memory_space<vmem>>, %arg3: memref<1x128xf32, #tpu.memory_space<vmem>>, %arg4: memref<1x128xf32, #tpu.memory_space<vmem>>, %arg5: memref<3x384x128xbf16, #tpu.memory_space<vmem>>, %arg6: memref<1x128xf32, #tpu.memory_space<vmem>>, %arg7: memref<1x128xf32, #tpu.memory_space<vmem>>, %arg8: memref<1x16x16x128xf32, #tpu.memory_space<vmem>>, %arg9: memref<18x18x128xbf16, #tpu.memory_space<vmem>>, %arg10: memref<18x18x128xbf16, #tpu.memory_space<vmem>>, %arg11: memref<288x384xbf16, #tpu.memory_space<vmem>>, %arg12: memref<256x128xf32, #tpu.memory_space<vmem>>) attributes {dimension_semantics = [#tpu.dimension_semantics<parallel>], iteration_bounds = array<i64: 2>, scalar_prefetch = 0 : i64, scratch_operands = 4 : i64, tpu.core_type = #tpu.core_type<tc>, window_params = [{transform_indices = @transform_0, window_bounds = array<i64: 1, 16, 16, 128>}, {pipeline_mode = #tpu.pipeline_mode<synchronous>, transform_indices = @transform_1, window_bounds = array<i64: 3, 384, 128>}, {pipeline_mode = #tpu.pipeline_mode<synchronous>, transform_indices = @transform_2, window_bounds = array<i64: 1, 128>}, {pipeline_mode = #tpu.pipeline_mode<synchronous>, transform_indices = @transform_3, window_bounds = array<i64: 1, 128>}, {pipeline_mode = #tpu.pipeline_mode<synchronous>, transform_indices = @transform_4, window_bounds = array<i64: 3, 384, 128>}, {pipeline_mode = #tpu.pipeline_mode<synchronous>, transform_indices = @transform_5, window_bounds = array<i64: 1, 128>}, {pipeline_mode = #tpu.pipeline_mode<synchronous>, transform_indices = @transform_6, window_bounds = array<i64: 1, 128>}, {transform_indices = @transform_7, window_bounds = array<i64: 1, 16, 16, 128>}]} {
    %cst = arith.constant 0.000000e+00 : bf16
    %0 = vector.broadcast %cst : bf16 to vector<18x18x128xbf16>
    %c0 = arith.constant 0 : index
    %c0_0 = arith.constant 0 : index
    %c0_1 = arith.constant 0 : index
    %1 = vector.load %arg9[%c0, %c0_0, %c0_1] : memref<18x18x128xbf16, #tpu.memory_space<vmem>>, vector<18x18x128xbf16>
    tpu.vector_store %arg9[%c0, %c0_0, %c0_1], %0 {strides = array<i32>} : memref<18x18x128xbf16, #tpu.memory_space<vmem>>, vector<18x18x128xbf16>,
    %cst_2 = arith.constant 0.000000e+00 : bf16
    %2 = vector.broadcast %cst_2 : bf16 to vector<18x18x128xbf16>
    %c0_3 = arith.constant 0 : index
    %c0_4 = arith.constant 0 : index
    %c0_5 = arith.constant 0 : index
    %3 = vector.load %arg10[%c0_3, %c0_4, %c0_5] : memref<18x18x128xbf16, #tpu.memory_space<vmem>>, vector<18x18x128xbf16>
    tpu.vector_store %arg10[%c0_3, %c0_4, %c0_5], %2 {strides = array<i32>} : memref<18x18x128xbf16, #tpu.memory_space<vmem>>, vector<18x18x128xbf16>,
    %c0_6 = arith.constant 0 : index
    %c0_7 = arith.constant 0 : index
    %c0_8 = arith.constant 0 : index
    %c0_9 = arith.constant 0 : index
    %4 = vector.load %arg1[%c0_6, %c0_7, %c0_8, %c0_9] : memref<1x16x16x128xf32, #tpu.memory_space<vmem>>, vector<1x16x16x128xf32>
    %5 = vector.shape_cast %4 : vector<1x16x16x128xf32> to vector<16x16x128xf32>
    %6 = arith.truncf %5 : vector<16x16x128xf32> to vector<16x16x128xbf16>
    %c1 = arith.constant 1 : index
    %c1_10 = arith.constant 1 : index
    %c0_11 = arith.constant 0 : index
    %7 = vector.load %arg9[%c1, %c1_10, %c0_11] : memref<18x18x128xbf16, #tpu.memory_space<vmem>>, vector<16x16x128xbf16>
    tpu.vector_store %arg9[%c1, %c1_10, %c0_11], %6 {strides = array<i32>} : memref<18x18x128xbf16, #tpu.memory_space<vmem>>, vector<16x16x128xbf16>,
    %c0_12 = arith.constant 0 : index
    %c0_13 = arith.constant 0 : index
    %c0_14 = arith.constant 0 : index
    %8 = vector.load %arg9[%c0_12, %c0_13, %c0_14] : memref<18x18x128xbf16, #tpu.memory_space<vmem>>, vector<18x16x128xbf16>
    %c0_15 = arith.constant 0 : index
    %c1_16 = arith.constant 1 : index
    %c0_17 = arith.constant 0 : index
    %9 = vector.load %arg9[%c0_15, %c1_16, %c0_17] : memref<18x18x128xbf16, #tpu.memory_space<vmem>>, vector<18x16x128xbf16>
    %c0_18 = arith.constant 0 : index
    %c2 = arith.constant 2 : index
    %c0_19 = arith.constant 0 : index
    %10 = vector.load %arg9[%c0_18, %c2, %c0_19] : memref<18x18x128xbf16, #tpu.memory_space<vmem>>, vector<18x16x128xbf16>
    %11 = tpu.concatenate %8, %9, %10 in 2 : vector<18x16x128xbf16>, vector<18x16x128xbf16>, vector<18x16x128xbf16> -> vector<18x16x384xbf16>
    %12 = vector.shape_cast %11 : vector<18x16x384xbf16> to vector<288x384xbf16>
    %c0_20 = arith.constant 0 : index
    %c0_21 = arith.constant 0 : index
    %13 = vector.load %arg11[%c0_20, %c0_21] : memref<288x384xbf16, #tpu.memory_space<vmem>>, vector<288x384xbf16>
    tpu.vector_store %arg11[%c0_20, %c0_21], %12 {strides = array<i32>} : memref<288x384xbf16, #tpu.memory_space<vmem>>, vector<288x384xbf16>,
    %c0_22 = arith.constant 0 : index
    %c0_23 = arith.constant 0 : index
    %14 = vector.load %arg11[%c0_22, %c0_23] : memref<288x384xbf16, #tpu.memory_space<vmem>>, vector<256x384xbf16>
    %c0_24 = arith.constant 0 : index
    %c0_25 = arith.constant 0 : index
    %c0_26 = arith.constant 0 : index
    %15 = vector.load %arg2[%c0_24, %c0_25, %c0_26] : memref<3x384x128xbf16, #tpu.memory_space<vmem>>, vector<1x384x128xbf16>
    %16 = vector.shape_cast %15 : vector<1x384x128xbf16> to vector<384x128xbf16>
    %cst_27 = arith.constant dense<0.000000e+00> : vector<256x128xf32>
    %17 = tpu.matmul %14, %16, %cst_27 {dimension_numbers = #tpu.dot_dimension_numbers<[1], [0], [0], [1], [0, 0, 1, 1], [], []>} : vector<256x384xbf16>, vector<384x128xbf16>, vector<256x128xf32> -> vector<256x128xf32>
    %c0_28 = arith.constant 0 : index
    %c0_29 = arith.constant 0 : index
    %18 = vector.load %arg12[%c0_28, %c0_29] : memref<256x128xf32, #tpu.memory_space<vmem>>, vector<256x128xf32>
    tpu.vector_store %arg12[%c0_28, %c0_29], %17 {strides = array<i32>} : memref<256x128xf32, #tpu.memory_space<vmem>>, vector<256x128xf32>,
    %c0_30 = arith.constant 0 : index
    %c0_31 = arith.constant 0 : index
    %19 = vector.load %arg12[%c0_30, %c0_31] : memref<256x128xf32, #tpu.memory_space<vmem>>, vector<256x128xf32>
    %c16 = arith.constant 16 : index
    %c0_32 = arith.constant 0 : index
    %20 = vector.load %arg11[%c16, %c0_32] : memref<288x384xbf16, #tpu.memory_space<vmem>>, vector<256x384xbf16>
    %c1_33 = arith.constant 1 : index
    %c0_34 = arith.constant 0 : index
    %c0_35 = arith.constant 0 : index
    %21 = vector.load %arg2[%c1_33, %c0_34, %c0_35] : memref<3x384x128xbf16, #tpu.memory_space<vmem>>, vector<1x384x128xbf16>
    %22 = vector.shape_cast %21 : vector<1x384x128xbf16> to vector<384x128xbf16>
    %cst_36 = arith.constant dense<0.000000e+00> : vector<256x128xf32>
    %23 = tpu.matmul %20, %22, %cst_36 {dimension_numbers = #tpu.dot_dimension_numbers<[1], [0], [0], [1], [0, 0, 1, 1], [], []>} : vector<256x384xbf16>, vector<384x128xbf16>, vector<256x128xf32> -> vector<256x128xf32>
    %24 = arith.addf %19, %23 : vector<256x128xf32>
    %c0_37 = arith.constant 0 : index
    %c0_38 = arith.constant 0 : index
    %25 = vector.load %arg12[%c0_37, %c0_38] : memref<256x128xf32, #tpu.memory_space<vmem>>, vector<256x128xf32>
    tpu.vector_store %arg12[%c0_37, %c0_38], %24 {strides = array<i32>} : memref<256x128xf32, #tpu.memory_space<vmem>>, vector<256x128xf32>,
    %c0_39 = arith.constant 0 : index
    %c0_40 = arith.constant 0 : index
    %26 = vector.load %arg12[%c0_39, %c0_40] : memref<256x128xf32, #tpu.memory_space<vmem>>, vector<256x128xf32>
    %c32 = arith.constant 32 : index
    %c0_41 = arith.constant 0 : index
    %27 = vector.load %arg11[%c32, %c0_41] : memref<288x384xbf16, #tpu.memory_space<vmem>>, vector<256x384xbf16>
    %c2_42 = arith.constant 2 : index
    %c0_43 = arith.constant 0 : index
    %c0_44 = arith.constant 0 : index
    %28 = vector.load %arg2[%c2_42, %c0_43, %c0_44] : memref<3x384x128xbf16, #tpu.memory_space<vmem>>, vector<1x384x128xbf16>
    %29 = vector.shape_cast %28 : vector<1x384x128xbf16> to vector<384x128xbf16>
    %cst_45 = arith.constant dense<0.000000e+00> : vector<256x128xf32>
    %30 = tpu.matmul %27, %29, %cst_45 {dimension_numbers = #tpu.dot_dimension_numbers<[1], [0], [0], [1], [0, 0, 1, 1], [], []>} : vector<256x384xbf16>, vector<384x128xbf16>, vector<256x128xf32> -> vector<256x128xf32>
    %31 = arith.addf %26, %30 : vector<256x128xf32>
    %c0_46 = arith.constant 0 : index
    %c0_47 = arith.constant 0 : index
    %32 = vector.load %arg12[%c0_46, %c0_47] : memref<256x128xf32, #tpu.memory_space<vmem>>, vector<256x128xf32>
    tpu.vector_store %arg12[%c0_46, %c0_47], %31 {strides = array<i32>} : memref<256x128xf32, #tpu.memory_space<vmem>>, vector<256x128xf32>,
    %c0_48 = arith.constant 0 : index
    %c0_49 = arith.constant 0 : index
    %33 = vector.load %arg12[%c0_48, %c0_49] : memref<256x128xf32, #tpu.memory_space<vmem>>, vector<256x128xf32>
    %c0_50 = arith.constant 0 : index
    %c0_51 = arith.constant 0 : index
    %34 = vector.load %arg3[%c0_50, %c0_51] : memref<1x128xf32, #tpu.memory_space<vmem>>, vector<1x128xf32>
    %35 = vector.broadcast %34 : vector<1x128xf32> to vector<256x128xf32>
    %36 = arith.mulf %33, %35 : vector<256x128xf32>
    %c0_52 = arith.constant 0 : index
    %c0_53 = arith.constant 0 : index
    %37 = vector.load %arg4[%c0_52, %c0_53] : memref<1x128xf32, #tpu.memory_space<vmem>>, vector<1x128xf32>
    %38 = vector.broadcast %37 : vector<1x128xf32> to vector<256x128xf32>
    %39 = arith.addf %36, %38 : vector<256x128xf32>
    %cst_54 = arith.constant 0.000000e+00 : f32
    %40 = vector.broadcast %cst_54 : f32 to vector<256x128xf32>
    %41 = arith.maximumf %39, %40 : vector<256x128xf32>
    %42 = vector.shape_cast %41 : vector<256x128xf32> to vector<16x16x128xf32>
    %43 = arith.truncf %42 : vector<16x16x128xf32> to vector<16x16x128xbf16>
    %c1_55 = arith.constant 1 : index
    %c1_56 = arith.constant 1 : index
    %c0_57 = arith.constant 0 : index
    %44 = vector.load %arg10[%c1_55, %c1_56, %c0_57] : memref<18x18x128xbf16, #tpu.memory_space<vmem>>, vector<16x16x128xbf16>
    tpu.vector_store %arg10[%c1_55, %c1_56, %c0_57], %43 {strides = array<i32>} : memref<18x18x128xbf16, #tpu.memory_space<vmem>>, vector<16x16x128xbf16>,
    %c0_58 = arith.constant 0 : index
    %c0_59 = arith.constant 0 : index
    %c0_60 = arith.constant 0 : index
    %45 = vector.load %arg10[%c0_58, %c0_59, %c0_60] : memref<18x18x128xbf16, #tpu.memory_space<vmem>>, vector<18x16x128xbf16>
    %c0_61 = arith.constant 0 : index
    %c1_62 = arith.constant 1 : index
    %c0_63 = arith.constant 0 : index
    %46 = vector.load %arg10[%c0_61, %c1_62, %c0_63] : memref<18x18x128xbf16, #tpu.memory_space<vmem>>, vector<18x16x128xbf16>
    %c0_64 = arith.constant 0 : index
    %c2_65 = arith.constant 2 : index
    %c0_66 = arith.constant 0 : index
    %47 = vector.load %arg10[%c0_64, %c2_65, %c0_66] : memref<18x18x128xbf16, #tpu.memory_space<vmem>>, vector<18x16x128xbf16>
    %48 = tpu.concatenate %45, %46, %47 in 2 : vector<18x16x128xbf16>, vector<18x16x128xbf16>, vector<18x16x128xbf16> -> vector<18x16x384xbf16>
    %49 = vector.shape_cast %48 : vector<18x16x384xbf16> to vector<288x384xbf16>
    %c0_67 = arith.constant 0 : index
    %c0_68 = arith.constant 0 : index
    %50 = vector.load %arg11[%c0_67, %c0_68] : memref<288x384xbf16, #tpu.memory_space<vmem>>, vector<288x384xbf16>
    tpu.vector_store %arg11[%c0_67, %c0_68], %49 {strides = array<i32>} : memref<288x384xbf16, #tpu.memory_space<vmem>>, vector<288x384xbf16>,
    %c0_69 = arith.constant 0 : index
    %c0_70 = arith.constant 0 : index
    %51 = vector.load %arg11[%c0_69, %c0_70] : memref<288x384xbf16, #tpu.memory_space<vmem>>, vector<256x384xbf16>
    %c0_71 = arith.constant 0 : index
    %c0_72 = arith.constant 0 : index
    %c0_73 = arith.constant 0 : index
    %52 = vector.load %arg5[%c0_71, %c0_72, %c0_73] : memref<3x384x128xbf16, #tpu.memory_space<vmem>>, vector<1x384x128xbf16>
    %53 = vector.shape_cast %52 : vector<1x384x128xbf16> to vector<384x128xbf16>
    %cst_74 = arith.constant dense<0.000000e+00> : vector<256x128xf32>
    %54 = tpu.matmul %51, %53, %cst_74 {dimension_numbers = #tpu.dot_dimension_numbers<[1], [0], [0], [1], [0, 0, 1, 1], [], []>} : vector<256x384xbf16>, vector<384x128xbf16>, vector<256x128xf32> -> vector<256x128xf32>
    %c0_75 = arith.constant 0 : index
    %c0_76 = arith.constant 0 : index
    %55 = vector.load %arg12[%c0_75, %c0_76] : memref<256x128xf32, #tpu.memory_space<vmem>>, vector<256x128xf32>
    tpu.vector_store %arg12[%c0_75, %c0_76], %54 {strides = array<i32>} : memref<256x128xf32, #tpu.memory_space<vmem>>, vector<256x128xf32>,
    %c0_77 = arith.constant 0 : index
    %c0_78 = arith.constant 0 : index
    %56 = vector.load %arg12[%c0_77, %c0_78] : memref<256x128xf32, #tpu.memory_space<vmem>>, vector<256x128xf32>
    %c16_79 = arith.constant 16 : index
    %c0_80 = arith.constant 0 : index
    %57 = vector.load %arg11[%c16_79, %c0_80] : memref<288x384xbf16, #tpu.memory_space<vmem>>, vector<256x384xbf16>
    %c1_81 = arith.constant 1 : index
    %c0_82 = arith.constant 0 : index
    %c0_83 = arith.constant 0 : index
    %58 = vector.load %arg5[%c1_81, %c0_82, %c0_83] : memref<3x384x128xbf16, #tpu.memory_space<vmem>>, vector<1x384x128xbf16>
    %59 = vector.shape_cast %58 : vector<1x384x128xbf16> to vector<384x128xbf16>
    %cst_84 = arith.constant dense<0.000000e+00> : vector<256x128xf32>
    %60 = tpu.matmul %57, %59, %cst_84 {dimension_numbers = #tpu.dot_dimension_numbers<[1], [0], [0], [1], [0, 0, 1, 1], [], []>} : vector<256x384xbf16>, vector<384x128xbf16>, vector<256x128xf32> -> vector<256x128xf32>
    %61 = arith.addf %56, %60 : vector<256x128xf32>
    %c0_85 = arith.constant 0 : index
    %c0_86 = arith.constant 0 : index
    %62 = vector.load %arg12[%c0_85, %c0_86] : memref<256x128xf32, #tpu.memory_space<vmem>>, vector<256x128xf32>
    tpu.vector_store %arg12[%c0_85, %c0_86], %61 {strides = array<i32>} : memref<256x128xf32, #tpu.memory_space<vmem>>, vector<256x128xf32>,
    %c0_87 = arith.constant 0 : index
    %c0_88 = arith.constant 0 : index
    %63 = vector.load %arg12[%c0_87, %c0_88] : memref<256x128xf32, #tpu.memory_space<vmem>>, vector<256x128xf32>
    %c32_89 = arith.constant 32 : index
    %c0_90 = arith.constant 0 : index
    %64 = vector.load %arg11[%c32_89, %c0_90] : memref<288x384xbf16, #tpu.memory_space<vmem>>, vector<256x384xbf16>
    %c2_91 = arith.constant 2 : index
    %c0_92 = arith.constant 0 : index
    %c0_93 = arith.constant 0 : index
    %65 = vector.load %arg5[%c2_91, %c0_92, %c0_93] : memref<3x384x128xbf16, #tpu.memory_space<vmem>>, vector<1x384x128xbf16>
    %66 = vector.shape_cast %65 : vector<1x384x128xbf16> to vector<384x128xbf16>
    %cst_94 = arith.constant dense<0.000000e+00> : vector<256x128xf32>
    %67 = tpu.matmul %64, %66, %cst_94 {dimension_numbers = #tpu.dot_dimension_numbers<[1], [0], [0], [1], [0, 0, 1, 1], [], []>} : vector<256x384xbf16>, vector<384x128xbf16>, vector<256x128xf32> -> vector<256x128xf32>
    %68 = arith.addf %63, %67 : vector<256x128xf32>
    %c0_95 = arith.constant 0 : index
    %c0_96 = arith.constant 0 : index
    %69 = vector.load %arg12[%c0_95, %c0_96] : memref<256x128xf32, #tpu.memory_space<vmem>>, vector<256x128xf32>
    tpu.vector_store %arg12[%c0_95, %c0_96], %68 {strides = array<i32>} : memref<256x128xf32, #tpu.memory_space<vmem>>, vector<256x128xf32>,
    %c0_97 = arith.constant 0 : index
    %c0_98 = arith.constant 0 : index
    %70 = vector.load %arg12[%c0_97, %c0_98] : memref<256x128xf32, #tpu.memory_space<vmem>>, vector<256x128xf32>
    %c0_99 = arith.constant 0 : index
    %c0_100 = arith.constant 0 : index
    %71 = vector.load %arg6[%c0_99, %c0_100] : memref<1x128xf32, #tpu.memory_space<vmem>>, vector<1x128xf32>
    %72 = vector.broadcast %71 : vector<1x128xf32> to vector<256x128xf32>
    %73 = arith.mulf %70, %72 : vector<256x128xf32>
    %c0_101 = arith.constant 0 : index
    %c0_102 = arith.constant 0 : index
    %74 = vector.load %arg7[%c0_101, %c0_102] : memref<1x128xf32, #tpu.memory_space<vmem>>, vector<1x128xf32>
    %75 = vector.broadcast %74 : vector<1x128xf32> to vector<256x128xf32>
    %76 = arith.addf %73, %75 : vector<256x128xf32>
    %77 = vector.shape_cast %76 : vector<256x128xf32> to vector<16x16x128xf32>
    %c0_103 = arith.constant 0 : index
    %c0_104 = arith.constant 0 : index
    %c0_105 = arith.constant 0 : index
    %c0_106 = arith.constant 0 : index
    %78 = vector.load %arg1[%c0_103, %c0_104, %c0_105, %c0_106] : memref<1x16x16x128xf32, #tpu.memory_space<vmem>>, vector<1x16x16x128xf32>
    %79 = vector.shape_cast %78 : vector<1x16x16x128xf32> to vector<16x16x128xf32>
    %80 = arith.addf %77, %79 : vector<16x16x128xf32>
    %c0_107 = arith.constant 0 : index
    %c0_108 = arith.constant 0 : index
    %c0_109 = arith.constant 0 : index
    %c0_110 = arith.constant 0 : index
    %81 = vector.load %arg8[%c0_107, %c0_108, %c0_109, %c0_110] : memref<1x16x16x128xf32, #tpu.memory_space<vmem>>, vector<1x16x16x128xf32>
    %82 = vector.shape_cast %81 : vector<1x16x16x128xf32> to vector<16x16x128xf32>
    %83 = vector.shape_cast %80 : vector<16x16x128xf32> to vector<1x16x16x128xf32>
    tpu.vector_store %arg8[%c0_107, %c0_108, %c0_109, %c0_110], %83 {strides = array<i32>} : memref<1x16x16x128xf32, #tpu.memory_space<vmem>>, vector<1x16x16x128xf32>,
    return
  }
  func.func @transform_0(%arg0: i32) -> (i32, i32, i32, i32) {
    %c0_i32 = arith.constant 0 : i32
    %c0_i32_0 = arith.constant 0 : i32
    %c0_i32_1 = arith.constant 0 : i32
    %c0_i32_2 = arith.constant 0 : i32
    return %arg0, %c0_i32, %c0_i32_0, %c0_i32_1 : i32, i32, i32, i32
  }
  func.func @transform_1(%arg0: i32) -> (i32, i32, i32) {
    %c0_i32 = arith.constant 0 : i32
    %c0_i32_0 = arith.constant 0 : i32
    %c0_i32_1 = arith.constant 0 : i32
    %c0_i32_2 = arith.constant 0 : i32
    return %c0_i32, %c0_i32_0, %c0_i32_1 : i32, i32, i32
  }
  func.func @transform_2(%arg0: i32) -> (i32, i32) {
    %c0_i32 = arith.constant 0 : i32
    %c0_i32_0 = arith.constant 0 : i32
    %c0_i32_1 = arith.constant 0 : i32
    return %c0_i32, %c0_i32_0 : i32, i32
  }
  func.func @transform_3(%arg0: i32) -> (i32, i32) {
    %c0_i32 = arith.constant 0 : i32
    %c0_i32_0 = arith.constant 0 : i32
    %c0_i32_1 = arith.constant 0 : i32
    return %c0_i32, %c0_i32_0 : i32, i32
  }
  func.func @transform_4(%arg0: i32) -> (i32, i32, i32) {
    %c0_i32 = arith.constant 0 : i32
    %c0_i32_0 = arith.constant 0 : i32
    %c0_i32_1 = arith.constant 0 : i32
    %c0_i32_2 = arith.constant 0 : i32
    return %c0_i32, %c0_i32_0, %c0_i32_1 : i32, i32, i32
  }
  func.func @transform_5(%arg0: i32) -> (i32, i32) {
    %c0_i32 = arith.constant 0 : i32
    %c0_i32_0 = arith.constant 0 : i32
    %c0_i32_1 = arith.constant 0 : i32
    return %c0_i32, %c0_i32_0 : i32, i32
  }
  func.func @transform_6(%arg0: i32) -> (i32, i32) {
    %c0_i32 = arith.constant 0 : i32
    %c0_i32_0 = arith.constant 0 : i32
    %c0_i32_1 = arith.constant 0 : i32
    return %c0_i32, %c0_i32_0 : i32, i32
  }
  func.func @transform_7(%arg0: i32) -> (i32, i32, i32, i32) {
    %c0_i32 = arith.constant 0 : i32
    %c0_i32_0 = arith.constant 0 : i32
    %c0_i32_1 = arith.constant 0 : i32
    %c0_i32_2 = arith.constant 0 : i32
    return %arg0, %c0_i32, %c0_i32_0, %c0_i32_1 : i32, i32, i32, i32
  }
}

</mosaic_0001>

<bundles_post_ra>
// kernel: residual_block_forward.1
= control target key start
LH: loop header
LB: loop body
LE: loop exit
PB: predicated region body
PF: predicated region fallthrough
CT: control target
= control target key end

     0   :  { %12 = vsyncpa [#allocation7], 0  ;;  %s12133_s0 = inlined_call_operand.vmem [shape: f32[2,16,16,128], index: 0, kind: input, shape index: {}]   ;;  %s12134_s1 = inlined_call_operand.vmem [shape: bf16[3,384,128], index: 1, kind: input, shape index: {}]   ;;  %s12135_s2 = inlined_call_operand.vmem [shape: f32[1,128], index: 2, kind: input, shape index: {}]   ;;  %s12136_s3 = inlined_call_operand.vmem [shape: f32[1,128], index: 3, kind: input, shape index: {}]   ;;  %s12137_s4 = inlined_call_operand.vmem [shape: bf16[3,384,128], index: 4, kind: input, shape index: {}]   ;;  %s12138_s5 = inlined_call_operand.vmem [shape: f32[1,128], index: 5, kind: input, shape index: {}]   ;;  %s12139_s6 = inlined_call_operand.vmem [shape: f32[1,128], index: 6, kind: input, shape index: {}]   ;;  %s12140_s7 = inlined_call_operand.hbm [shape: f32[2,16,16,128], index: 7, kind: output, shape index: {}]  }
   0x1   :  { %14 = vsyncpa [#allocation7 + $0x1], 0  ;;  %s9456_s24 = smov 0   ;;  %s9458_s25 = smov 0  }
   0x2   :  { %s9460_s26 = smov 0   ;;  %s9462_s27 = smov 0  }
   0x3 LB: > { %s9477_s28 = sadd.s32 4294967295, %s9410_s27   ;;  %s7030_s29 = sadd.s32 4294967294, %s9410_s27   ;;  %s9410_s27 = sphi %s9462_s27, %s12253_s27   ;;  %s9406_s26 = sphi %s9460_s26, %s12252_s26   ;;  %s9402_s25 = sphi %s9458_s25, %s12251_s25   ;;  %s9398_s24 = sphi %s9456_s24, %s12250_s24  }
   0x4   : > { %s9481_s30 = sadd.s32 1, %s9410_s27   ;;  %s179_s8 = sadd.s32 1, %s9406_s26 }
   0x5   : > { %s176_s9 = ssub.s32 %s9410_s27, %s9481_s30  ;;  %p189_p0 = scmp.ne.s32.totalorder %s9406_s26, %s9402_s25 }
   0x6   : > { %p177_p1 = scmp.eq.s32.totalorder %s176_s9, 0  ;;  %p190_p2 = scmp.eq.s32.totalorder %s9477_s28, 1 }
   0x7   : > { %p195_p3 = scmp.ne.s32.totalorder %s9402_s25, %s9398_s24  ;;  %p196_p4 = scmp.eq.s32.totalorder %s7030_s29, 1 }
   0x8   : > { %s9492_s10 = scalar_select %p177_p1, %s9406_s26, %s179_s8  }
   0x9   : > { %p9494_p5 = por %p190_p2, %p189_p0  ;;  %p9498_p6 = por %p196_p4, %p195_p3 }
   0xa   : > { %p7033_p7 = scmp.ge.s32.totalorder %s9410_s27, 1  ;;  %p240_p8 = scmp.lt.s32.totalorder %s9410_s27, 3 }
   0xc   : > { %p241_p9 = pnand %p7033_p7, %p240_p8 }
   0xe   : > { %244 = sbr.rel (%p241_p9) target bundleno = 1158 (0x486), region = 48 }
  0x15   : > { %v9507_v0 = vld [vmem:[%s12134_s1 + $0x40] sm:$0xff]   ;;  %v9412_v2 = vmov 0   ;;  %v9090_v5 = vld [vmem:[%s12134_s1 + $0x48] sm:$0xff]   ;;  %v9094_v9 = vld [vmem:[%s12134_s1 + $0x50] sm:$0xff]   ;;  %p272_p10 = scmp.lt.s32.totalorder %s9477_s28, 1  ;;  %vm838_vm0 = vcmask 1043456  }
  0x16   : > { %v9512_v1 = vld [vmem:[%s12134_s1 + $0x100] sm:$0xff]   ;;  %278 = vst [vmem:[#allocation2] sm:$0xf] %v9412_v2  ;;  %279 = vst [vmem:[#allocation2 + $0x4] sm:$0xf] %v9412_v2  ;;  %7620 = vmatprep.subr.bf16.mxu0 %v9507_v0  ;;  %v9091_v6 = vld [vmem:[%s12134_s1 + $0x108] sm:$0xff]  }
  0x17   : > { %280 = vst [vmem:[#allocation2 + $0x8] sm:$0x1] %v9412_v2  ;;  %281 = vst [vmem:[#allocation2 + $0xc] sm:$0xf] %v9412_v2  ;;  %v9088_v3 = vld [vmem:[%s12134_s1] sm:$0xff]   ;;  %7756 = vmatprep.subr.bf16.mxu1 %v9512_v1  ;;  %v9092_v7 = vld [vmem:[%s12134_s1 + $0x8] sm:$0xff]  }
  0x18   : > { %282 = vst [vmem:[#allocation2 + $0x10] sm:$0xf] %v9412_v2  ;;  %283 = vst [vmem:[#allocation2 + $0x14] sm:$0x1] %v9412_v2  ;;  %v9089_v4 = vld [vmem:[%s12134_s1 + $0xc0] sm:$0xff]   ;;  %7621 = vmatpush3.bf16.msra.mxu0 %v9088_v3  ;;  %v9093_v8 = vld [vmem:[%s12134_s1 + $0xc8] sm:$0xff]  }
  0x19   : > { %284 = vst [vmem:[#allocation2 + $0x18] sm:$0xf] %v9412_v2  ;;  %285 = vst [vmem:[#allocation2 + $0x1c] sm:$0xf] %v9412_v2  ;;  %7757 = vmatpush3.bf16.msra.mxu1 %v9089_v4  ;;  %7622 = vmatprep.subr.bf16.mxu0 %v9090_v5  ;;  %v9095_v10 = vld [vmem:[%s12134_s1 + $0x110] sm:$0xff]   ;;  %v9098_v13 = vld [vmem:[%s12134_s1 + $0x58] sm:$0xff]  }
  0x1a   : > { %286 = vst [vmem:[#allocation2 + $0x20] sm:$0x1] %v9412_v2  ;;  %287 = vst [vmem:[#allocation2 + $0x24] sm:$0xf] %v9412_v2  ;;  %7758 = vmatprep.subr.bf16.mxu1 %v9091_v6  ;;  %v9096_v11 = vld [vmem:[%s12134_s1 + $0x10] sm:$0xff]   ;;  %v9099_v14 = vld [vmem:[%s12134_s1 + $0x118] sm:$0xff]  }
  0x1b   : > { %288 = vst [vmem:[#allocation2 + $0x28] sm:$0xf] %v9412_v2  ;;  %289 = vst [vmem:[#allocation2 + $0x2c] sm:$0x1] %v9412_v2  ;;  %v9097_v12 = vld [vmem:[%s12134_s1 + $0xd0] sm:$0xff]   ;;  %v9100_v15 = vld [vmem:[%s12134_s1 + $0x18] sm:$0xff]  }
  0x1c   : > { %290 = vst [vmem:[#allocation2 + $0x30] sm:$0xf] %v9412_v2  ;;  %291 = vst [vmem:[#allocation2 + $0x34] sm:$0xf] %v9412_v2  ;;  %7623 = vmatpush3.bf16.msra.mxu0 %v9092_v7  ;;  %v9101_v16 = vld [vmem:[%s12134_s1 + $0xd8] sm:$0xff]   ;;  %v9102_v17 = vld [vmem:[%s12134_s1 + $0x60] sm:$0xff]  }
  0x1d   : > { %292 = vst [vmem:[#allocation2 + $0x38] sm:$0x1] %v9412_v2  ;;  %293 = vst [vmem:[#allocation2 + $0x3c] sm:$0xf] %v9412_v2  ;;  %7759 = vmatpush3.bf16.msra.mxu1 %v9093_v8  ;;  %7624 = vmatprep.subr.bf16.mxu0 %v9094_v9  ;;  %v9103_v18 = vld [vmem:[%s12134_s1 + $0x120] sm:$0xff]   ;;  %v9106_v21 = vld [vmem:[%s12134_s1 + $0x68] sm:$0xff]  }
  0x1e   : > { %294 = vst [vmem:[#allocation2 + $0x40] sm:$0xf] %v9412_v2  ;;  %295 = vst [vmem:[#allocation2 + $0x44] sm:$0x1] %v9412_v2  ;;  %7760 = vmatprep.subr.bf16.mxu1 %v9095_v10  ;;  %v9104_v19 = vld [vmem:[%s12134_s1 + $0x20] sm:$0xff]   ;;  %v9107_v22 = vld [vmem:[%s12134_s1 + $0x128] sm:$0xff]  }
  0x1f   : > { %296 = vst [vmem:[#allocation2 + $0x48] sm:$0xf] %v9412_v2  ;;  %297 = vst [vmem:[#allocation2 + $0x4c] sm:$0xf] %v9412_v2  ;;  %v9105_v20 = vld [vmem:[%s12134_s1 + $0xe0] sm:$0xff]   ;;  %v9108_v23 = vld [vmem:[%s12134_s1 + $0x28] sm:$0xff]  }
  0x20   : > { %298 = vst [vmem:[#allocation2 + $0x50] sm:$0x1] %v9412_v2  ;;  %299 = vst [vmem:[#allocation2 + $0x54] sm:$0xf] %v9412_v2  ;;  %7625 = vmatpush3.bf16.msra.mxu0 %v9096_v11  ;;  %v9109_v24 = vld [vmem:[%s12134_s1 + $0xe8] sm:$0xff]   ;;  %s273_s19 = scalar_select %p272_p10, %s9477_s28, 1 }
  0x21   : > { %300 = vst [vmem:[#allocation2 + $0x58] sm:$0xf] %v9412_v2  ;;  %301 = vst [vmem:[#allocation2 + $0x5c] sm:$0x1] %v9412_v2  ;;  %7761 = vmatpush3.bf16.msra.mxu1 %v9097_v12  ;;  %7626 = vmatprep.subr.bf16.mxu0 %v9098_v13  ;;  %v9110_v25 = vld [vmem:[%s12134_s1 + $0x70] sm:$0xff]   ;;  %v9114_v29 = vld [vmem:[%s12134_s1 + $0x78] sm:$0xff]  }
  0x22   : > { %302 = vst [vmem:[#allocation2 + $0x60] sm:$0xf] %v9412_v2  ;;  %303 = vst [vmem:[#allocation2 + $0x64] sm:$0xf] %v9412_v2  ;;  %7762 = vmatprep.subr.bf16.mxu1 %v9099_v14  ;;  %v9111_v26 = vld [vmem:[%s12134_s1 + $0x130] sm:$0xff]   ;;  %s7554_s14 = sshll.u32 %s273_s19, 8 }
  0x23   : > { %304 = vst [vmem:[#allocation2 + $0x68] sm:$0x1] %v9412_v2  ;;  %305 = vst [vmem:[#allocation2 + $0x6c] sm:$0xf] %v9412_v2  ;;  %v9112_v27 = vld [vmem:[%s12134_s1 + $0x30] sm:$0xff]   ;;  %v9115_v30 = vld [vmem:[%s12134_s1 + $0x138] sm:$0xff]   ;;  %s9716_s29 = scalar_lea.vmem %s12133_s0, %s7554_s14 }
  0x24   : > { %306 = vst [vmem:[#allocation2 + $0x70] sm:$0xf] %v9412_v2  ;;  %307 = vst [vmem:[#allocation2 + $0x74] sm:$0x1] %v9412_v2  ;;  %7627 = vmatpush3.bf16.msra.mxu0 %v9100_v15  ;;  %v9113_v28 = vld [vmem:[%s12134_s1 + $0xf0] sm:$0xff]   ;;  %v9116_v31 = vld [vmem:[%s12134_s1 + $0x38] sm:$0xff]  }
  0x25   : > { %308 = vst [vmem:[#allocation2 + $0x78] sm:$0xf] %v9412_v2  ;;  %309 = vst [vmem:[#allocation2 + $0x7c] sm:$0xf] %v9412_v2  ;;  %7763 = vmatpush3.bf16.msra.mxu1 %v9101_v16  ;;  %7628 = vmatprep.subr.bf16.mxu0 %v9102_v17  ;;  %v9117_v32 = vld [vmem:[%s12134_s1 + $0xf8] sm:$0xff]   ;;  %vm845_vm1 = vcmask 1040384  }
  0x26   : > { %310 = vst [vmem:[#allocation2 + $0x80] sm:$0x1] %v9412_v2  ;;  %311 = vst [vmem:[#allocation2 + $0x84] sm:$0xf] %v9412_v2  ;;  %7764 = vmatprep.subr.bf16.mxu1 %v9103_v18  ;;  %v955_v33 = vld [vmem:[#allocation2] sm:$0xf] }
  0x27   : > { %312 = vst [vmem:[#allocation2 + $0x88] sm:$0xf] %v9412_v2  ;;  %313 = vst [vmem:[#allocation2 + $0x8c] sm:$0x1] %v9412_v2  ;;  %v956_v34 = vld [vmem:[#allocation2 + $0x4] sm:$0xf] }
  0x28   : > { %314 = vst [vmem:[#allocation2 + $0x90] sm:$0xf] %v9412_v2  ;;  %315 = vst [vmem:[#allocation2 + $0x94] sm:$0xf] %v9412_v2  ;;  %7629 = vmatpush3.bf16.msra.mxu0 %v9104_v19  ;;  %v7069_v35 = vcombine.low %v955_v33, %v956_v34  ;;  %vm1189_vm2 = vsmask.f32 7424 }
  0x29   : > { %316 = vst [vmem:[#allocation2 + $0x98] sm:$0x1] %v9412_v2  ;;  %317 = vst [vmem:[#allocation2 + $0x9c] sm:$0xf] %v9412_v2  ;;  %7765 = vmatpush3.bf16.msra.mxu1 %v9105_v20  ;;  %7630 = vmatprep.subr.bf16.mxu0 %v9106_v21  ;;  %v386_v37 = vld [vmem:[%s9716_s29] sm:$0xff]  ;;  %v387_v38 = vld [vmem:[%s9716_s29 + $0x8] sm:$0xff] }
  0x2a   : > { %318 = vst [vmem:[#allocation2 + $0xa0] sm:$0xf] %v9412_v2  ;;  %319 = vst [vmem:[#allocation2 + $0xa4] sm:$0x1] %v9412_v2  ;;  %7766 = vmatprep.subr.bf16.mxu1 %v9107_v22  ;;  %v7555_v39 = vpack.c.bf16 %v386_v37, %v386_v37  ;;  %vm514_vm3 = vsmask.f32 256  ;;  %v7556_v44 = vpack.c.bf16 %v387_v38, %v387_v38 }
  0x2b   : > { %320 = vst [vmem:[#allocation2 + $0xa8] sm:$0xf] %v9412_v2  ;;  %321 = vst [vmem:[#allocation2 + $0xac] sm:$0xf] %v9412_v2  ;;  %vm515_vm4 = vsmask.f32 4368 }
  0x2c   : > { %322 = vst [vmem:[#allocation2 + $0xb0] sm:$0x1] %v9412_v2  ;;  %323 = vst [vmem:[#allocation2 + $0xb4] sm:$0xf] %v9412_v2  ;;  %7631 = vmatpush3.bf16.msra.mxu0 %v9108_v23  ;;  %v9122_v40 = vld [vmem:[%s12134_s1 + $0x80] sm:$0xff]   ;;  %v1191_v41 = vshrl.u32 %v7069_v35, 16 }
  0x2d   : > { %324 = vst [vmem:[#allocation2 + $0xb8] sm:$0xf] %v9412_v2  ;;  %325 = vst [vmem:[#allocation2 + $0xbc] sm:$0x1] %v9412_v2  ;;  %7767 = vmatpush3.bf16.msra.mxu1 %v9109_v24  ;;  %7632 = vmatprep.subr.bf16.mxu0 %v9110_v25  ;;  %v1193_v42 = vshll.u32 %v7069_v35, 16  ;;  %v388_v45 = vld [vmem:[%s9716_s29 + $0x10] sm:$0xff] }
  0x2e   : > { %326 = vst [vmem:[#allocation2 + $0xc0] sm:$0xf] %v9412_v2  ;;  %327 = vst [vmem:[#allocation2 + $0xc4] sm:$0xf] %v9412_v2  ;;  %7768 = vmatprep.subr.bf16.mxu1 %v9111_v26  ;;  %v518_v46 = vshrl.u32 %v7555_v39, 16  ;;  %v521_v47 = vshll.u32 %v7555_v39, 16  ;;  %v7557_v48 = vpack.c.bf16 %v388_v45, %v388_v45 }
  0x2f   : > { %328 = vst [vmem:[#allocation2 + $0xc8] sm:$0x1] %v9412_v2  ;;  %329 = vst [vmem:[#allocation2 + $0xcc] sm:$0xf] %v9412_v2  ;;  %vm839_vm5 = vsmask.f32 7938 }
  0x30   : > { %330 = vst [vmem:[#allocation2 + $0xd0] sm:$0xf] %v9412_v2  ;;  %331 = vst [vmem:[#allocation2 + $0xd4] sm:$0x1] %v9412_v2  ;;  %7633 = vmatpush3.bf16.msra.mxu0 %v9112_v27  ;;  %v1195_v49 = vrot.slane %v1193_v42, 1  ;;  %v526_v51 = vshrl.u32 %v7556_v44, 16 }
  0x31   : > { %332 = vst [vmem:[#allocation3] sm:$0xf] %v9412_v2  ;;  %333 = vst [vmem:[#allocation3 + $0x4] sm:$0xf] %v9412_v2  ;;  %7769 = vmatpush3.bf16.msra.mxu1 %v9113_v28  ;;  %7634 = vmatprep.subr.bf16.mxu0 %v9114_v29  ;;  %v529_v52 = vshll.u32 %v7556_v44, 16  ;;  %v12165_v54 = vmov 0 }
  0x32   : > { %334 = vst [vmem:[#allocation3 + $0x8] sm:$0x1] %v9412_v2  ;;  %335 = vst [vmem:[#allocation3 + $0xc] sm:$0xf] %v9412_v2  ;;  %7770 = vmatprep.subr.bf16.mxu1 %v9115_v30  ;;  %v841_v53 = vld [vmem:[#allocation2 + $0xc] sm:$0xf]  ;;  %v1196_v59 = vor.u32 %v1195_v49, %v1191_v41 }
  0x33   : > { %336 = vst [vmem:[#allocation3 + $0x10] sm:$0xf] %v9412_v2  ;;  %337 = vst [vmem:[#allocation3 + $0x14] sm:$0x1] %v9412_v2  ;;  %v520_v55 = vrot.slane %v518_v46, 7  ;;  %v389_v56 = vld [vmem:[%s9716_s29 + $0x18] sm:$0xff] }
  0x34   : > { %338 = vst [vmem:[#allocation3 + $0x18] sm:$0xf] %v9412_v2  ;;  %339 = vst [vmem:[#allocation3 + $0x1c] sm:$0xf] %v9412_v2  ;;  %7635 = vmatpush3.bf16.msra.mxu0 %v9116_v31  ;;  %v535_v57 = vshrl.u32 %v7557_v48, 16  ;;  %v538_v58 = vshll.u32 %v7557_v48, 16  ;;  %v7558_v63 = vpack.c.bf16 %v389_v56, %v389_v56 }
  0x35   : > { %340 = vst [vmem:[#allocation3 + $0x20] sm:$0x1] %v9412_v2  ;;  %341 = vst [vmem:[#allocation3 + $0x24] sm:$0xf] %v9412_v2  ;;  %7771 = vmatpush3.bf16.msra.mxu1 %v9117_v32  ;;  %8436 = vmatprep.subr.bf16.mxu0 %v9122_v40  ;;  %v528_v60 = vrot.slane %v526_v51, 7  ;;  %v12168_v61 = vmov 0  ;;  %v523_v1 = vor.u32 %v521_v47, %v520_v55 }
  0x36   : > { %342 = vst [vmem:[#allocation3 + $0x28] sm:$0xf] %v9412_v2  ;;  %343 = vst [vmem:[#allocation3 + $0x2c] sm:$0x1] %v9412_v2  ;;  %v847_v62 = vld [vmem:[#allocation2 + $0x14] sm:$0x1] }
  0x37   : > { %344 = vst [vmem:[#allocation3 + $0x30] sm:$0xf] %v9412_v2  ;;  %345 = vst [vmem:[#allocation3 + $0x34] sm:$0xf] %v9412_v2  ;;  %v390_v0 = vld [vmem:[%s9716_s29 + $0x20] sm:$0xff]  ;;  %v12171_v3 = vmov 0  ;;  %v531_v9 = vor.u32 %v529_v52, %v528_v60 }
  0x38   : > { %346 = vst [vmem:[#allocation3 + $0x38] sm:$0x1] %v9412_v2  ;;  %347 = vst [vmem:[#allocation3 + $0x3c] sm:$0xf] %v9412_v2  ;;  %v537_v4 = vrot.slane %v535_v57, 7  ;;  %v391_v6 = vld [vmem:[%s9716_s29 + $0x28] sm:$0xff]  ;;  %v7559_v7 = vpack.c.bf16 %v390_v0, %v390_v0 }
  0x39   : > { %348 = vst [vmem:[#allocation3 + $0x40] sm:$0xf] %v9412_v2  ;;  %349 = vst [vmem:[#allocation3 + $0x44] sm:$0x1] %v9412_v2  ;;  %v850_v5 = vld [vmem:[#allocation2 + $0x18] sm:$0xf]  ;;  %v7560_v21 = vpack.c.bf16 %v391_v6, %v391_v6 }
  0x3a   : > { %350 = vst [vmem:[#allocation3 + $0x48] sm:$0xf] %v9412_v2  ;;  %351 = vst [vmem:[#allocation3 + $0x4c] sm:$0xf] %v9412_v2  ;;  %v533_v10 = vrot.slane %v528_v60, 4  ;;  %v543_v11 = vshrl.u32 %v7558_v63, 16  ;;  %v540_v14 = vor.u32 %v538_v58, %v537_v4 }
  0x3b   : > { %352 = vst [vmem:[#allocation3 + $0x50] sm:$0x1] %v9412_v2  ;;  %353 = vst [vmem:[#allocation3 + $0x54] sm:$0xf] %v9412_v2  ;;  %v9127_v12 = vld [vmem:[%s12134_s1 + $0x88] sm:$0xff]   ;;  %v541_v15 = vrot.slane %v537_v4, 4 }
  0x3c   : > { %354 = vst [vmem:[#allocation3 + $0x58] sm:$0xf] %v9412_v2  ;;  %355 = vst [vmem:[#allocation3 + $0x5c] sm:$0x1] %v9412_v2  ;;  %v546_v16 = vshll.u32 %v7558_v63, 16  ;;  %v392_v17 = vld [vmem:[%s9716_s29 + $0x30] sm:$0xff] }
  0x3d   : > { %356 = vst [vmem:[#allocation3 + $0x60] sm:$0xf] %v9412_v2  ;;  %357 = vst [vmem:[#allocation3 + $0x64] sm:$0xf] %v9412_v2  ;;  %v545_v20 = vrot.slane %v543_v11, 7  ;;  %v393_v22 = vld [vmem:[%s9716_s29 + $0x38] sm:$0xff]  ;;  %v7561_v27 = vpack.c.bf16 %v392_v17, %v392_v17 }
  0x3e   : > { %358 = vst [vmem:[#allocation3 + $0x68] sm:$0x1] %v9412_v2  ;;  %359 = vst [vmem:[#allocation3 + $0x6c] sm:$0xf] %v9412_v2  ;;  %v854_v24 = vld [vmem:[#allocation2 + $0x20] sm:$0x1] }
  0x3f   : > { %360 = vst [vmem:[#allocation3 + $0x70] sm:$0xf] %v9412_v2  ;;  %361 = vst [vmem:[#allocation3 + $0x74] sm:$0x1] %v9412_v2  ;;  %v552_v25 = vshrl.u32 %v7559_v7, 16  ;;  %v555_v26 = vshll.u32 %v7559_v7, 16  ;;  %v548_v29 = vor.u32 %v546_v16, %v545_v20 }
  0x40   : > { %362 = vst [vmem:[#allocation3 + $0x78] sm:$0xf] %v9412_v2  ;;  %363 = vst [vmem:[#allocation3 + $0x7c] sm:$0xf] %v9412_v2  ;;  %v394_v28 = vld [vmem:[%s9716_s29 + $0x40] sm:$0xff]  ;;  %v550_v30 = vrot.slane %v545_v20, 4 }
  0x41   : > { %364 = vst [vmem:[#allocation3 + $0x80] sm:$0x1] %v9412_v2  ;;  %365 = vst [vmem:[#allocation3 + $0x84] sm:$0xf] %v9412_v2  ;;  %v560_v31 = vshrl.u32 %v7560_v21, 16  ;;  %v563_v32 = vshll.u32 %v7560_v21, 16 }
  0x42   : > { %366 = vst [vmem:[#allocation3 + $0x88] sm:$0xf] %v9412_v2  ;;  %367 = vst [vmem:[#allocation3 + $0x8c] sm:$0x1] %v9412_v2  ;;  %v9132_v33 = vld [vmem:[%s12134_s1 + $0x90] sm:$0xff]   ;;  %v554_v34 = vrot.slane %v552_v25, 7 }
  0x43   : > { %368 = vst [vmem:[#allocation3 + $0x90] sm:$0xf] %v9412_v2  ;;  %369 = vst [vmem:[#allocation3 + $0x94] sm:$0xf] %v9412_v2  ;;  %v572_v37 = vshll.u32 %v7561_v27, 16  ;;  %v395_v38 = vld [vmem:[%s9716_s29 + $0x48] sm:$0xff] }
  0x44   : > { %370 = vst [vmem:[#allocation3 + $0x98] sm:$0x1] %v9412_v2  ;;  %371 = vst [vmem:[#allocation3 + $0x9c] sm:$0xf] %v9412_v2  ;;  %v562_v41 = vrot.slane %v560_v31, 7  ;;  %v557_v44 = vor.u32 %v555_v26, %v554_v34  ;;  %v558_v45 = vrot.slane %v554_v34, 4 }
  0x45   : > { %372 = vst [vmem:[#allocation3 + $0xa0] sm:$0xf] %v9412_v2  ;;  %373 = vst [vmem:[#allocation3 + $0xa4] sm:$0x1] %v9412_v2  ;;  %v857_v42 = vld [vmem:[#allocation2 + $0x24] sm:$0xf] }
  0x46   : > { %374 = vst [vmem:[#allocation3 + $0xa8] sm:$0xf] %v9412_v2  ;;  %375 = vst [vmem:[#allocation3 + $0xac] sm:$0xf] %v9412_v2  ;;  %v861_v46 = vld [vmem:[#allocation2 + $0x2c] sm:$0x1]  ;;  %v565_v49 = vor.u32 %v563_v32, %v562_v41 }
  0x47   : > { %376 = vst [vmem:[#allocation3 + $0xb0] sm:$0x1] %v9412_v2  ;;  %377 = vst [vmem:[#allocation3 + $0xb4] sm:$0xf] %v9412_v2  ;;  %v864_v52 = vld [vmem:[#allocation2 + $0x30] sm:$0xf] }
  0x48   : > { %378 = vst [vmem:[#allocation3 + $0xb8] sm:$0xf] %v9412_v2  ;;  %379 = vst [vmem:[#allocation3 + $0xbc] sm:$0x1] %v9412_v2  ;;  %v9137_v17 = vld [vmem:[%s12134_s1 + $0x98] sm:$0xff]   ;;  %vm1478_vm9 = vcmask 1046528  }
  0x49   : > { %380 = vst [vmem:[#allocation3 + $0xc0] sm:$0xf] %v9412_v2  ;;  %381 = vst [vmem:[#allocation3 + $0xc4] sm:$0xf] %v9412_v2  ;;  %s269_s19 = sand.u32 1, %s9402_s25   ;;  %s7619_s17 = sshll.u32 %s9477_s28, 12 }
  0x4a   : > { %382 = vst [vmem:[#allocation3 + $0xc8] sm:$0x1] %v9412_v2  ;;  %383 = vst [vmem:[#allocation3 + $0xcc] sm:$0xf] %v9412_v2  ;;  %s7034_s15 = sshll.u32 %s269_s19, 8  ;;  %s12083_s22 = scalar_lea.hbm %s12140_s7, %s7619_s17 }
  0x4b   : > { %384 = vst [vmem:[#allocation3 + $0xd0] sm:$0xf] %v9412_v2  ;;  %385 = vst [vmem:[#allocation3 + $0xd4] sm:$0x1] %v9412_v2  ;;  %v524_v2 = vrot.slane %v520_v55, 4  ;;  %v396_v55 = vld [vmem:[%s9716_s29 + $0x50] sm:$0xff] }
  0x4c   : > { %v9119_v36 = vld [vmem:[#allocation2 + $0x8] ss:$0 sps:$4 sm:$0x11]   ;;  %vm9729_vm6 = vmor %vm514_vm3, %vm515_vm4  ;;  %v7565_v16 = vpack.c.bf16 %v396_v55, %v396_v55  ;;  %s11935_s16 = scalar_lea.vmem [#allocation6], %s7034_s15  ;;  %s12092_s28 = scalar_lea.sflag [#allocation7], %s269_s19 }
  0x4d   : > { %v1198_v43 = vshll.u32 %v9119_v36, 16  ;;  %v12166_v54 = vsel %vm9729_vm6, 4294967295, %v12165_v54  ;;  %vm9736_vm7 = vmand %vm838_vm0, %vm839_vm5  ;;  %v532_v18 = vsel %vm9729_vm6, %v524_v2, %v531_v9  ;;  %v569_v36 = vshrl.u32 %v7561_v27, 16  ;;  %s6968_s18 = sshll.u32 %s11935_s16, 4  ;;  %s9413_s23 = smov [#allocation6]   ;;  %s12085_s18 = int_to_ptr.vmem [resolvable:$true] %s6968_s18 }
  0x4e   : > { %12167 = vst [vmem:[#allocation9_spill] sm:$0xff] %v12166_v54  ;;  %v12169_v61 = vsel %vm9736_vm7, 4294967295, %v12168_v61  ;;  %vm9743_vm8 = vmand %vm845_vm1, %vm514_vm3  ;;  %v842_v13 = vsel %vm9736_vm7, %v523_v1, %v841_v53  ;;  %v851_v23 = vsel %vm9736_vm7, %v540_v14, %v850_v5  ;;  %v549_v39 = vsel %vm9729_vm6, %v541_v15, %v548_v29  ;;  %v397_v5 = vld [vmem:[%s9716_s29 + $0x58] sm:$0xff]  ;;  %s9352_s8 = sshll.u32 %s9413_s23, 4  ;;  %s9353_s8 = int_to_ptr.vmem [resolvable:$false] %s9352_s8 }
  0x4f   : > { %v1200_v50 = vrot.slane %v1198_v43, 1  ;;  %12170 = vst [vmem:[#allocation10_spill] sm:$0xff] %v12169_v61  ;;  %v12172_v3 = vsel %vm9743_vm8, 4294967295, %v12171_v3  ;;  %843 = vst [vmem:[#allocation2 + $0xc] sm:$0xf] %v842_v13  ;;  %v848_v19 = vsel %vm9743_vm8, %v533_v10, %v847_v62  ;;  %v7563_v43 = vpack.c.bf16 %v394_v28, %v394_v28  ;;  %s9354_s9 = scalar_lea.vmem %s9353_s8, 8192  ;;  %p9355_p0 = scmp.lt.s32.totalorder %s12085_s18, %s9353_s8 }
  0x50   : > { %12173 = vst [vmem:[#allocation11_spill] sm:$0xff] %v12172_v3  ;;  %844 = vst [vmem:[#allocation2 + $0x10] sm:$0xf] %v532_v18  ;;  %v571_v47 = vrot.slane %v569_v36, 7  ;;  %v7564_v53 = vpack.c.bf16 %v395_v38, %v395_v38  ;;  %v858_v57 = vsel %vm9736_vm7, %v557_v44, %v857_v42  ;;  %v868_v62 = vld [vmem:[#allocation2 + $0x38] sm:$0x1]  ;;  %v566_v0 = vsel %vm9729_vm6, %v558_v45, %v565_v49 }
  0x51   : > { %v1201_v8 = vsel %vm1189_vm2, %v1196_v59, %v1200_v50  ;;  %849 = vst [vmem:[#allocation2 + $0x14] sm:$0x1] %v848_v19  ;;  %852 = vst [vmem:[#allocation2 + $0x18] sm:$0xf] %v851_v23  ;;  %v567_v50 = vrot.slane %v562_v41, 4  ;;  %v586_v2 = vshrl.u32 %v7563_v43, 16 }
  0x52   : > { %1877 = vmatprep.mubr.bf16.mxu0 %v1201_v8  ;;  %853 = vst [vmem:[#allocation2 + $0x1c] sm:$0xf] %v549_v39  ;;  %v574_v58 = vor.u32 %v572_v37, %v571_v47  ;;  %v575_v59 = vrot.slane %v571_v47, 4  ;;  %859 = vst [vmem:[#allocation2 + $0x24] sm:$0xf] %v858_v57  ;;  %v589_v4 = vshll.u32 %v7563_v43, 16 }
  0x53   : > { %1878 = vmatmul.mubr.bf16.vlgmr.msra.gmra.mrb[0].mxu0 %v7069_v35  ;;  %v7562_v35 = vpack.c.bf16 %v393_v22, %v393_v22  ;;  %v862_v1 = vsel %vm9743_vm8, %v567_v50, %v861_v46  ;;  %860 = vst [vmem:[#allocation2 + $0x28] sm:$0xf] %v566_v0  ;;  %v588_v13 = vrot.slane %v586_v2, 7  ;;  %v594_v14 = vshrl.u32 %v7564_v53, 16  ;;  %v875_v22 = vld [vmem:[#allocation2 + $0x44] sm:$0x1] }
  0x54   : > { %8437 = vmatpush3.bf16.msra.mxu0 %v9122_v40  ;;  %v855_v40 = vsel %vm9743_vm8, %v550_v30, %v854_v24  ;;  %863 = vst [vmem:[#allocation2 + $0x2c] sm:$0x1] %v862_v1  ;;  %v865_v11 = vsel %vm9736_vm7, %v574_v58, %v864_v52  ;;  %v597_v15 = vshll.u32 %v7564_v53, 16  ;;  %v9793_v23 = vld [vmem:[%s12134_s1 + $0x140] sm:$0xff]   ;;  %v603_v37 = vshrl.u32 %v7565_v16, 16 }
  0x55   : > { %8438 = vmatprep.subr.bf16.mxu0 %v9127_v12  ;;  %856 = vst [vmem:[#allocation2 + $0x20] sm:$0x1] %v855_v40  ;;  %v577_v48 = vshrl.u32 %v7562_v35, 16  ;;  %v580_v51 = vshll.u32 %v7562_v35, 16  ;;  %866 = vst [vmem:[#allocation2 + $0x30] sm:$0xf] %v865_v11  ;;  %v591_v26 = vor.u32 %v589_v4, %v588_v13  ;;  %8484 = vmatprep.subr.bf16.mxu1 %v9793_v23 }
  0x56   : > { %v957_v56 = vld [vmem:[#allocation2 + $0xc] sm:$0xf]  ;;  %v592_v27 = vrot.slane %v588_v13, 4  ;;  %v596_v28 = vrot.slane %v594_v14, 7  ;;  %v878_v43 = vld [vmem:[#allocation2 + $0x48] sm:$0xf] }
  0x57   : > { %v579_v60 = vrot.slane %v577_v48, 7  ;;  %v958_v63 = vld [vmem:[#allocation2 + $0x10] sm:$0xf]  ;;  %v398_v44 = vld [vmem:[%s9716_s29 + $0x60] sm:$0xff]  ;;  %v605_v48 = vrot.slane %v603_v37, 7  ;;  %v606_v49 = vshll.u32 %v7565_v16, 16 }
  0x58   : > { %8439 = vmatpush3.bf16.msra.mxu0 %v9127_v12  ;;  %v9779_v6 = vcombine.low %v957_v56, %v958_v63  ;;  %v9121_v7 = vld [vmem:[#allocation2 + $0x14] ss:$0 sps:$4 sm:$0x11]   ;;  %v959_v8 = vld [vmem:[#allocation2 + $0x18] sm:$0xf]  ;;  %v599_v34 = vor.u32 %v597_v15, %v596_v28  ;;  %v601_v35 = vrot.slane %v596_v28, 4  ;;  %v7567_v13 = vpack.c.bf16 %v398_v44, %v398_v44 }
  0x59   : > { %8440 = vmatprep.subr.bf16.mxu0 %v9132_v33  ;;  %v582_v9 = vor.u32 %v580_v51, %v579_v60  ;;  %v584_v10 = vrot.slane %v579_v60, 4  ;;  %v871_v12 = vld [vmem:[#allocation2 + $0x3c] sm:$0xf]  ;;  %v1210_v20 = vshll.u32 %v9121_v7, 16  ;;  %v961_v42 = vld [vmem:[#allocation2 + $0x24] sm:$0xf]  ;;  %v608_v58 = vor.u32 %v606_v49, %v605_v48 }
  0x5a   : > { %v1203_v18 = vshrl.u32 %v9779_v6, 16  ;;  %v1205_v19 = vshll.u32 %v9779_v6, 16  ;;  %v960_v24 = vld [vmem:[#allocation2 + $0x1c] sm:$0xf]  ;;  %v872_v36 = vsel %vm9736_vm7, %v591_v26, %v871_v12  ;;  %v962_v45 = vld [vmem:[#allocation2 + $0x28] sm:$0xf]  ;;  %v600_v46 = vsel %vm9729_vm6, %v592_v27, %v599_v34 }
  0x5b   : > { %v583_v21 = vsel %vm9729_vm6, %v575_v59, %v582_v9  ;;  %v869_v25 = vsel %vm9743_vm8, %v584_v10, %v868_v62  ;;  %v1212_v30 = vrot.slane %v1210_v20, 1  ;;  %v9797_v31 = vcombine.low %v959_v8, %v960_v24  ;;  %873 = vst [vmem:[#allocation2 + $0x3c] sm:$0xf] %v872_v36  ;;  %v9126_v55 = vld [vmem:[#allocation2 + $0x2c] ss:$0 sps:$4 sm:$0x11]  }
  0x5c   : > { %8441 = vmatpush3.bf16.msra.mxu0 %v9132_v33  ;;  %867 = vst [vmem:[#allocation2 + $0x34] sm:$0xf] %v583_v21  ;;  %v1207_v29 = vrot.slane %v1205_v19, 1  ;;  %v9124_v32 = vld [vmem:[#allocation2 + $0x20] ss:$0 sps:$4 sm:$0x11]   ;;  %v9799_v33 = vpack.c.bf16 %v397_v5, %v397_v5  ;;  %v876_v47 = vsel %vm9743_vm8, %v601_v35, %v875_v22  ;;  %v9812_v53 = vcombine.low %v961_v42, %v962_v45 }
  0x5d   : > { %8442 = vmatprep.subr.bf16.mxu0 %v9137_v17  ;;  %870 = vst [vmem:[#allocation2 + $0x38] sm:$0x1] %v869_v25  ;;  %v1215_v39 = vshrl.u32 %v9797_v31, 16  ;;  %v1217_v40 = vshll.u32 %v9797_v31, 16  ;;  %v1222_v41 = vshll.u32 %v9124_v32, 16  ;;  %v9143_v56 = vld [vmem:[%s12134_s1 + $0xa0] sm:$0xff]   ;;  %v879_v11 = vsel %vm9736_vm7, %v608_v58, %v878_v43 }
  0x5e   : > { %v1208_v38 = vor.u32 %v1207_v29, %v1203_v18  ;;  %874 = vst [vmem:[#allocation2 + $0x40] sm:$0xf] %v600_v46  ;;  %877 = vst [vmem:[#allocation2 + $0x44] sm:$0x1] %v876_v47  ;;  %v963_v57 = vld [vmem:[#allocation2 + $0x30] sm:$0xf] }
  0x5f   : > { %v1219_v51 = vrot.slane %v1217_v40, 1  ;;  %v1224_v52 = vrot.slane %v1222_v41, 1  ;;  %v609_v59 = vrot.slane %v605_v48, 4  ;;  %v611_v60 = vshrl.u32 %v9799_v33, 16  ;;  %v399_v63 = vld [vmem:[%s9716_s29 + $0x68] sm:$0xff]  ;;  %v400_v7 = vld [vmem:[%s9716_s29 + $0x70] sm:$0xff] }
  0x60   : > { %8443 = vmatpush3.bf16.msra.mxu0 %v9137_v17  ;;  %v1213_v50 = vsel %vm1189_vm2, %v1208_v38, %v1212_v30  ;;  %v614_v62 = vshll.u32 %v9799_v33, 16  ;;  %v1227_v1 = vshrl.u32 %v9812_v53, 16  ;;  %v1229_v2 = vshll.u32 %v9812_v53, 16  ;;  %v882_v12 = vld [vmem:[#allocation2 + $0x50] sm:$0x1]  ;;  %v9146_v22 = vld [vmem:[%s12134_s1 + $0x148] sm:$0xff]  }
  0x61   : > { %2504 = vmatprep.mubr.bf16.mxu1 %v1213_v50  ;;  %1885 = vmatprep.mubr.bf16.mxu0 %v1213_v50  ;;  %v1220_v0 = vor.u32 %v1219_v51, %v1215_v39  ;;  %v1234_v4 = vshll.u32 %v9126_v55, 16  ;;  %v613_v10 = vrot.slane %v611_v60, 7  ;;  %880 = vst [vmem:[#allocation2 + $0x48] sm:$0xf] %v879_v11  ;;  %v7568_v16 = vpack.c.bf16 %v399_v63, %v399_v63  ;;  %v401_v27 = vld [vmem:[%s9716_s29 + $0x78] sm:$0xff]  ;;  %v403_v55 = vld [vmem:[%s9716_s29 + $0x88] sm:$0xff] }
  0x62   : > { %2505 = vmatmul.mubr.bf16.vlgmr.msra.gmra.mrb[0].mxu1 %v9779_v6  ;;  %1886 = vmatmul.mubr.bf16.gmra.mrb[4].mxu0 %v9779_v6  ;;  %v1231_v14 = vrot.slane %v1229_v2, 1  ;;  %v965_v20 = vld [vmem:[#allocation2 + $0x3c] sm:$0xf]  ;;  %v620_v25 = vshrl.u32 %v7567_v13, 16  ;;  %v623_v26 = vshll.u32 %v7567_v13, 16  ;;  %v7569_v33 = vpack.c.bf16 %v400_v7, %v400_v7  ;;  %v9152_v13 = vld [vmem:[%s12134_s1 + $0x150] sm:$0xff]  }
  0x63   : > { %v9824_v5 = vld [vmem:[#allocation2 + $0x34] sm:$0xf]  ;;  %8485 = vmatpush3.bf16.msra.mxu1 %v9793_v23  ;;  %8444 = vmatprep.subr.bf16.mxu0 %v9143_v56  ;;  %v9836_v6 = vsel %vm1189_vm2, %v1220_v0, %v1224_v52  ;;  %v1236_v15 = vrot.slane %v1234_v4, 1  ;;  %v616_v21 = vor.u32 %v614_v62, %v613_v10  ;;  %v618_v24 = vrot.slane %v613_v10, 4  ;;  %v889_v47 = vld [vmem:[#allocation2 + $0x5c] sm:$0x1] }
  0x64   : > { %v9828_v8 = vcombine.low %v963_v57, %v9824_v5  ;;  %v9830_v9 = vld [vmem:[#allocation2 + $0x38] ss:$0 sps:$4 sm:$0x11]   ;;  %8445 = vmatpush3.bf16.msra.mxu0 %v9143_v56  ;;  %2512 = vmatprep.mubr.bf16.mxu1 %v9836_v6  ;;  %v1232_v23 = vor.u32 %v1231_v14, %v1227_v1  ;;  %v622_v38 = vrot.slane %v620_v25, 7  ;;  %v885_v39 = vld [vmem:[#allocation2 + $0x54] sm:$0xf]  ;;  %v7570_v42 = vpack.c.bf16 %v401_v27, %v401_v27 }
  0x65   : > { %1893 = vmatprep.mubr.bf16.mxu0 %v9836_v6  ;;  %v1246_v19 = vshll.u32 %v9830_v9, 16  ;;  %v9847_v30 = vld [vmem:[#allocation2 + $0x40] sm:$0xf]  ;;  %v617_v32 = vsel %vm9729_vm6, %v609_v59, %v616_v21  ;;  %8486 = vmatprep.subr.bf16.mxu1 %v9146_v22  ;;  %v9857_v36 = vld [vmem:[#allocation2 + $0x44] ss:$0 sps:$4 sm:$0x11]   ;;  %v883_v37 = vsel %vm9743_vm8, %v618_v24, %v882_v12  ;;  %v7572_v12 = vpack.c.bf16 %v403_v55, %v403_v55 }
  0x66   : > { %v1239_v17 = vshrl.u32 %v9828_v8, 16  ;;  %v1241_v18 = vshll.u32 %v9828_v8, 16  ;;  %v9852_v34 = vsel %vm1189_vm2, %v1232_v23, %v1236_v15  ;;  %v9855_v35 = vcombine.low %v965_v20, %v9847_v30  ;;  %881 = vst [vmem:[#allocation2 + $0x4c] sm:$0xf] %v617_v32  ;;  %884 = vst [vmem:[#allocation2 + $0x50] sm:$0x1] %v883_v37 }
  0x67   : > { %v1248_v29 = vrot.slane %v1246_v19, 1  ;;  %8487 = vmatpush3.bf16.msra.mxu1 %v9146_v22  ;;  %v628_v40 = vshrl.u32 %v7568_v16, 16  ;;  %v631_v41 = vshll.u32 %v7568_v16, 16  ;;  %v1258_v45 = vshll.u32 %v9857_v36, 16  ;;  %v402_v52 = vld [vmem:[%s9716_s29 + $0x80] sm:$0xff]  ;;  %v9149_v56 = vld [vmem:[%s12134_s1 + $0xa8] sm:$0xff]  }
  0x68   : > { %v1243_v28 = vrot.slane %v1241_v18, 1  ;;  %v1251_v43 = vshrl.u32 %v9855_v35, 16  ;;  %v1253_v44 = vshll.u32 %v9855_v35, 16  ;;  %v625_v46 = vor.u32 %v623_v26, %v622_v38  ;;  %v967_v59 = vld [vmem:[#allocation2 + $0x48] sm:$0xf]  ;;  %8446 = vmatprep.subr.bf16.mxu0 %v9149_v56  ;;  %v404_v18 = vld [vmem:[%s9716_s29 + $0x90] sm:$0xff]  ;;  %8488 = vmatprep.subr.bf16.mxu1 %v9152_v13 }
  0x69   : > { %v626_v49 = vrot.slane %v622_v38, 4  ;;  %v630_v50 = vrot.slane %v628_v40, 7  ;;  %v637_v51 = vshrl.u32 %v7569_v33, 16  ;;  %v1260_v58 = vrot.slane %v1258_v45, 1  ;;  %v892_v10 = vld [vmem:[#allocation2 + $0x60] sm:$0xf]  ;;  %8447 = vmatpush3.bf16.msra.mxu0 %v9149_v56 }
  0x6a   : > { %2513 = vmatmul.mubr.bf16.gmra.mrb[4].mxu1 %v9797_v31  ;;  %1894 = vmatmul.mubr.bf16.gmra.mrb[8].mxu0 %v9797_v31  ;;  %v1244_v48 = vor.u32 %v1243_v28, %v1239_v17  ;;  %v1255_v57 = vrot.slane %v1253_v44, 1  ;;  %v886_v60 = vsel %vm9736_vm7, %v625_v46, %v885_v39  ;;  %v640_v62 = vshll.u32 %v7569_v33, 16  ;;  %v896_v23 = vld [vmem:[#allocation2 + $0x68] sm:$0x1]  ;;  %v405_v28 = vld [vmem:[%s9716_s29 + $0x98] sm:$0xff]  ;;  %v9155_v38 = vld [vmem:[%s12134_s1 + $0xb0] sm:$0xff]  }
  0x6b   : > { %2520 = vmatprep.mubr.bf16.mxu1 %v9852_v34  ;;  %1901 = vmatprep.mubr.bf16.mxu0 %v9852_v34  ;;  %v633_v63 = vor.u32 %v631_v41, %v630_v50  ;;  %v635_v0 = vrot.slane %v630_v50, 4  ;;  %887 = vst [vmem:[#allocation2 + $0x54] sm:$0xf] %v886_v60  ;;  %v639_v1 = vrot.slane %v637_v51, 7  ;;  %v645_v2 = vshrl.u32 %v7570_v42, 16  ;;  %v406_v60 = vld [vmem:[%s9716_s29 + $0xa0] sm:$0xff] }
  0x6c   : > { %v1256_v4 = vor.u32 %v1255_v57, %v1251_v43  ;;  %v648_v7 = vshll.u32 %v7570_v42, 16  ;;  %v7571_v11 = vpack.c.bf16 %v402_v52, %v402_v52  ;;  %v9886_v19 = vsel %vm1189_vm2, %v1244_v48, %v1248_v29  ;;  %8489 = vmatpush3.bf16.msra.mxu1 %v9152_v13  ;;  %v899_v43 = vld [vmem:[#allocation2 + $0x6c] sm:$0xf]  ;;  %v903_v48 = vld [vmem:[#allocation2 + $0x74] sm:$0x1]  ;;  %8448 = vmatprep.subr.bf16.mxu0 %v9155_v38 }
  0x6d   : > { %v9878_v14 = vld [vmem:[#allocation2 + $0x4c] sm:$0xf]  ;;  %v634_v15 = vsel %vm9729_vm6, %v626_v49, %v633_v63  ;;  %v890_v16 = vsel %vm9743_vm8, %v635_v0, %v889_v47  ;;  %v642_v17 = vor.u32 %v640_v62, %v639_v1  ;;  %v643_v21 = vrot.slane %v639_v1, 4  ;;  %v9899_v32 = vld [vmem:[#allocation2 + $0x50] ss:$0 sps:$4 sm:$0x11]   ;;  %8449 = vmatpush3.bf16.msra.mxu0 %v9155_v38 }
  0x6e   : > { %v9889_v20 = vcombine.low %v967_v59, %v9878_v14  ;;  %888 = vst [vmem:[#allocation2 + $0x58] sm:$0xf] %v634_v15  ;;  %891 = vst [vmem:[#allocation2 + $0x5c] sm:$0x1] %v890_v16  ;;  %v647_v22 = vrot.slane %v645_v2, 7  ;;  %v654_v25 = vshrl.u32 %v7571_v11, 16  ;;  %v9897_v29 = vsel %vm1189_vm2, %v1256_v4, %v1260_v58 }
  0x6f   : > { %v893_v24 = vsel %vm9736_vm7, %v642_v17, %v892_v10  ;;  %v657_v26 = vshll.u32 %v7571_v11, 16  ;;  %v662_v27 = vshrl.u32 %v7572_v12, 16  ;;  %v7573_v37 = vpack.c.bf16 %v404_v18, %v404_v18  ;;  %v407_v62 = vld [vmem:[%s9716_s29 + $0xa8] sm:$0xff]  ;;  %v906_v13 = vld [vmem:[#allocation2 + $0x78] sm:$0xf] }
  0x70   : > { %v650_v33 = vor.u32 %v648_v7, %v647_v22  ;;  %894 = vst [vmem:[#allocation2 + $0x60] sm:$0xf] %v893_v24  ;;  %v652_v39 = vrot.slane %v647_v22, 4  ;;  %v656_v40 = vrot.slane %v654_v25, 7  ;;  %v665_v42 = vshll.u32 %v7572_v12, 16  ;;  %v9158_v18 = vld [vmem:[%s12134_s1 + $0x158] sm:$0xff]  }
  0x71   : > { %v664_v41 = vrot.slane %v662_v27, 7  ;;  %v1263_v44 = vshrl.u32 %v9889_v20, 16  ;;  %v1265_v45 = vshll.u32 %v9889_v20, 16  ;;  %v7574_v49 = vpack.c.bf16 %v405_v28, %v405_v28  ;;  %v910_v16 = vld [vmem:[#allocation2 + $0x80] sm:$0x1]  ;;  %v408_v25 = vld [vmem:[%s9716_s29 + $0xb0] sm:$0xff]  ;;  %8490 = vmatprep.subr.bf16.mxu1 %v9158_v18 }
  0x72   : > { %2521 = vmatmul.mubr.bf16.gmra.mrb[8].mxu1 %v9812_v53  ;;  %1902 = vmatmul.mubr.bf16.gmra.mrb[12].mxu0 %v9812_v53  ;;  %v969_v46 = vld [vmem:[#allocation2 + $0x54] sm:$0xf]  ;;  %v651_v47 = vsel %vm9729_vm6, %v643_v21, %v650_v33  ;;  %v897_v50 = vsel %vm9743_vm8, %v652_v39, %v896_v23  ;;  %v659_v51 = vor.u32 %v657_v26, %v656_v40  ;;  %v660_v52 = vrot.slane %v656_v40, 4 }
  0x73   : > { %2528 = vmatprep.mubr.bf16.mxu1 %v9886_v19  ;;  %1909 = vmatprep.mubr.bf16.mxu0 %v9886_v19  ;;  %895 = vst [vmem:[#allocation2 + $0x64] sm:$0xf] %v651_v47  ;;  %v667_v55 = vor.u32 %v665_v42, %v664_v41  ;;  %v1270_v56 = vshll.u32 %v9899_v32, 16  ;;  %898 = vst [vmem:[#allocation2 + $0x68] sm:$0x1] %v897_v50  ;;  %v669_v57 = vrot.slane %v664_v41, 4 }
  0x74   : > { %v671_v58 = vshrl.u32 %v7573_v37, 16  ;;  %v674_v59 = vshll.u32 %v7573_v37, 16  ;;  %v900_v1 = vsel %vm9736_vm7, %v659_v51, %v899_v43  ;;  %v679_v2 = vshrl.u32 %v7574_v49, 16  ;;  %v9161_v43 = vld [vmem:[%s12134_s1 + $0xb8] sm:$0xff]   ;;  %8491 = vmatpush3.bf16.msra.mxu1 %v9158_v18 }
  0x75   : > { %v9915_v63 = vld [vmem:[#allocation2 + $0x58] sm:$0xf]  ;;  %v668_v0 = vsel %vm9729_vm6, %v660_v52, %v667_v55  ;;  %v682_v4 = vshll.u32 %v7574_v49, 16  ;;  %v1267_v7 = vrot.slane %v1265_v45, 1  ;;  %901 = vst [vmem:[#allocation2 + $0x6c] sm:$0xf] %v900_v1  ;;  %v904_v11 = vsel %vm9743_vm8, %v669_v57, %v903_v48  ;;  %8450 = vmatprep.subr.bf16.mxu0 %v9161_v43 }
  0x76   : > { %v9922_v10 = vcombine.low %v969_v46, %v9915_v63  ;;  %902 = vst [vmem:[#allocation2 + $0x70] sm:$0xf] %v668_v0  ;;  %v673_v12 = vrot.slane %v671_v58, 7  ;;  %905 = vst [vmem:[#allocation2 + $0x74] sm:$0x1] %v904_v11  ;;  %v681_v15 = vrot.slane %v679_v2, 7  ;;  %v7575_v17 = vpack.c.bf16 %v406_v60, %v406_v60  ;;  %8451 = vmatpush3.bf16.msra.mxu0 %v9161_v43 }
  0x77   : > { %v971_v22 = vld [vmem:[#allocation2 + $0x60] sm:$0xf]  ;;  %v7576_v24 = vpack.c.bf16 %v407_v62, %v407_v62  ;;  %v9935_v26 = vld [vmem:[#allocation2 + $0x5c] ss:$0 sps:$4 sm:$0x11]   ;;  %v1268_v38 = vor.u32 %v1267_v7, %v1263_v44  ;;  %v1272_v39 = vrot.slane %v1270_v56, 1  ;;  %v7577_v55 = vpack.c.bf16 %v408_v25, %v408_v25 }
  0x78   : > { %v1277_v21 = vshll.u32 %v9922_v10, 16  ;;  %v676_v23 = vor.u32 %v674_v59, %v673_v12  ;;  %v677_v27 = vrot.slane %v673_v12, 4  ;;  %v684_v28 = vor.u32 %v682_v4, %v681_v15  ;;  %v913_v48 = vld [vmem:[#allocation2 + $0x84] sm:$0xf]  ;;  %v409_v49 = vld [vmem:[%s9716_s29 + $0xb8] sm:$0xff]  ;;  %v411_v25 = vld [vmem:[%s9716_s29 + $0xc8] sm:$0xff] }
  0x79   : > { %v686_v33 = vrot.slane %v681_v15, 4  ;;  %v688_v37 = vshrl.u32 %v7575_v17, 16  ;;  %v691_v42 = vshll.u32 %v7575_v17, 16  ;;  %v1275_v50 = vshrl.u32 %v9922_v10, 16  ;;  %v917_v60 = vld [vmem:[#allocation2 + $0x8c] sm:$0x1] }
  0x7a   : > { %2529 = vmatmul.mubr.bf16.gmra.mrb[12].mxu1 %v9828_v8  ;;  %1910 = vmatmul.mubr.bf16.gmra.mrb[16].mxu0 %v9828_v8  ;;  %v9937_v40 = vld [vmem:[#allocation2 + $0x64] sm:$0xf]  ;;  %v907_v41 = vsel %vm9736_vm7, %v676_v23, %v906_v13  ;;  %v685_v46 = vsel %vm9729_vm6, %v677_v27, %v684_v28  ;;  %v696_v51 = vshrl.u32 %v7576_v24, 16  ;;  %v699_v52 = vshll.u32 %v7576_v24, 16  ;;  %v920_v43 = vld [vmem:[#allocation2 + $0x90] sm:$0xf] }
  0x7b   : > { %2536 = vmatprep.mubr.bf16.mxu1 %v9897_v29  ;;  %1917 = vmatprep.mubr.bf16.mxu0 %v9897_v29  ;;  %v9945_v45 = vcombine.low %v971_v22, %v9937_v40  ;;  %908 = vst [vmem:[#allocation2 + $0x78] sm:$0xf] %v907_v41  ;;  %v911_v44 = vsel %vm9743_vm8, %v686_v33, %v910_v16  ;;  %v690_v47 = vrot.slane %v688_v37, 7  ;;  %909 = vst [vmem:[#allocation2 + $0x7c] sm:$0xf] %v685_v46  ;;  %v9162_v62 = vld [vmem:[%s12134_s1 + $0x160] sm:$0xff]  }
  0x7c   : > { %912 = vst [vmem:[#allocation2 + $0x80] sm:$0x1] %v911_v44  ;;  %v1279_v56 = vrot.slane %v1277_v21, 1  ;;  %v1282_v57 = vshll.u32 %v9935_v26, 16  ;;  %v9960_v0 = vsel %vm1189_vm2, %v1268_v38, %v1272_v39  ;;  %v698_v2 = vrot.slane %v696_v51, 7  ;;  %v410_v7 = vld [vmem:[%s9716_s29 + $0xc0] sm:$0xff]  ;;  %8492 = vmatprep.subr.bf16.mxu1 %v9162_v62 }
  0x7d   : > { %12174 = vst [vmem:[#allocation12_spill] sm:$0xff] %v9945_v45  ;;  %v9954_v58 = vld [vmem:[#allocation2 + $0x68] ss:$0 sps:$4 sm:$0x11]   ;;  %v693_v59 = vor.u32 %v691_v42, %v690_v47  ;;  %v694_v1 = vrot.slane %v690_v47, 4  ;;  %v7578_v4 = vpack.c.bf16 %v409_v49, %v409_v49  ;;  %v1289_v11 = vshll.u32 %v9945_v45, 16  ;;  %8493 = vmatpush3.bf16.msra.mxu1 %v9162_v62 }
  0x7e   : > { %v973_v12 = vld [vmem:[#allocation2 + $0x6c] sm:$0xf]  ;;  %v9964_v13 = vld [vmem:[#allocation2 + $0x70] sm:$0xf]  ;;  %v701_v17 = vor.u32 %v699_v52, %v698_v2  ;;  %v703_v18 = vrot.slane %v698_v2, 4  ;;  %v705_v21 = vshrl.u32 %v7577_v55, 16  ;;  %v1280_v23 = vor.u32 %v1279_v56, %v1275_v50 }
  0x7f   : > { %v914_v15 = vsel %vm9736_vm7, %v693_v59, %v913_v48  ;;  %v9163_v16 = vld [vmem:[%s12134_s1 + $0x168] sm:$0xff]   ;;  %v708_v22 = vshll.u32 %v7577_v55, 16  ;;  %v1284_v24 = vrot.slane %v1282_v57, 1  ;;  %v7579_v27 = vpack.c.bf16 %v410_v7, %v410_v7  ;;  %v924_v48 = vld [vmem:[#allocation2 + $0x98] sm:$0x1]  ;;  %v9166_v50 = vld [vmem:[%s12134_s1 + $0x170] sm:$0xff]  }
  0x80   : > { %915 = vst [vmem:[#allocation2 + $0x84] sm:$0xf] %v914_v15  ;;  %v702_v28 = vsel %vm9729_vm6, %v694_v1, %v701_v17  ;;  %v918_v33 = vsel %vm9743_vm8, %v703_v18, %v917_v60  ;;  %v707_v37 = vrot.slane %v705_v21, 7  ;;  %v713_v38 = vshrl.u32 %v7578_v4, 16  ;;  %8494 = vmatprep.subr.bf16.mxu1 %v9163_v16  ;;  %v412_v57 = vld [vmem:[%s9716_s29 + $0xd0] sm:$0xff]  ;;  %v413_v59 = vld [vmem:[%s9716_s29 + $0xd8] sm:$0xff] }
  0x81   : > { %v1287_v39 = vshrl.u32 %v9945_v45, 16  ;;  %v1294_v41 = vshll.u32 %v9954_v58, 16  ;;  %v9983_v42 = vcombine.low %v973_v12, %v9964_v13  ;;  %916 = vst [vmem:[#allocation2 + $0x88] sm:$0xf] %v702_v28  ;;  %919 = vst [vmem:[#allocation2 + $0x8c] sm:$0x1] %v918_v33  ;;  %v7580_v49 = vpack.c.bf16 %v411_v25, %v411_v25  ;;  %8495 = vmatpush3.bf16.msra.mxu1 %v9163_v16 }
  0x82   : > { %2537 = vmatmul.mubr.bf16.gmra.mrb[16].mxu1 %v9855_v35  ;;  %1918 = vmatmul.mubr.bf16.gmra.mrb[20].mxu0 %v9855_v35  ;;  %v1291_v46 = vrot.slane %v1289_v11, 1  ;;  %v710_v44 = vor.u32 %v708_v22, %v707_v37  ;;  %v715_v47 = vrot.slane %v713_v38, 7  ;;  %v711_v51 = vrot.slane %v707_v37, 4  ;;  %v9993_v62 = vld [vmem:[#allocation2 + $0x74] ss:$0 sps:$4 sm:$0x11]  }
  0x83   : > { %2544 = vmatprep.mubr.bf16.mxu1 %v9960_v0  ;;  %1925 = vmatprep.mubr.bf16.mxu0 %v9960_v0  ;;  %v716_v52 = vshll.u32 %v7578_v4, 16  ;;  %v722_v55 = vshrl.u32 %v7579_v27, 16  ;;  %v725_v56 = vshll.u32 %v7579_v27, 16  ;;  %v9991_v60 = vsel %vm1189_vm2, %v1280_v23, %v1284_v24  ;;  %v927_v2 = vld [vmem:[#allocation2 + $0x9c] sm:$0xf]  ;;  %v414_v7 = vld [vmem:[%s9716_s29 + $0xe0] sm:$0xff] }
  0x84   : > { %v720_v1 = vrot.slane %v715_v47, 4  ;;  %v1301_v11 = vshll.u32 %v9983_v42, 16  ;;  %v975_v12 = vld [vmem:[#allocation2 + $0x78] sm:$0xf]  ;;  %v921_v4 = vsel %vm9736_vm7, %v710_v44, %v920_v43  ;;  %8496 = vmatprep.subr.bf16.mxu1 %v9166_v50  ;;  %v9171_v21 = vld [vmem:[%s12134_s1 + $0x1c0] sm:$0xff]   ;;  %v1292_v16 = vor.u32 %v1291_v46, %v1287_v39  ;;  %v415_v46 = vld [vmem:[%s9716_s29 + $0xe8] sm:$0xff] }
  0x85   : > { %v718_v15 = vor.u32 %v716_v52, %v715_v47  ;;  %v724_v17 = vrot.slane %v722_v55, 7  ;;  %v9167_v18 = vld [vmem:[%s12134_s1 + $0x178] sm:$0xff]   ;;  %v1296_v22 = vrot.slane %v1294_v41, 1  ;;  %922 = vst [vmem:[#allocation2 + $0x90] sm:$0xf] %v921_v4  ;;  %v730_v25 = vshrl.u32 %v7580_v49, 16  ;;  %8497 = vmatpush3.bf16.msra.mxu1 %v9166_v50  ;;  %7892 = vmatprep.subr.bf16.mxu0 %v9171_v21 }
  0x86   : > { %v10007_v23 = vld [vmem:[#allocation2 + $0x7c] sm:$0xf]  ;;  %v925_v24 = vsel %vm9743_vm8, %v720_v1, %v924_v48  ;;  %v1299_v27 = vshrl.u32 %v9983_v42, 16  ;;  %v733_v37 = vshll.u32 %v7580_v49, 16  ;;  %v7581_v41 = vpack.c.bf16 %v412_v57, %v412_v57  ;;  %v931_v52 = vld [vmem:[#allocation2 + $0xa4] sm:$0x1]  ;;  %8498 = vmatprep.subr.bf16.mxu1 %v9167_v18 }
  0x87   : > { %v719_v28 = vsel %vm9729_vm6, %v711_v51, %v718_v15  ;;  %926 = vst [vmem:[#allocation2 + $0x98] sm:$0x1] %v925_v24  ;;  %v727_v33 = vor.u32 %v725_v56, %v724_v17  ;;  %v728_v38 = vrot.slane %v724_v17, 4  ;;  %v732_v39 = vrot.slane %v730_v25, 7  ;;  %v934_v1 = vld [vmem:[#allocation2 + $0xa8] sm:$0xf] }
  0x88   : > { %923 = vst [vmem:[#allocation2 + $0x94] sm:$0xf] %v719_v28  ;;  %v7582_v43 = vpack.c.bf16 %v413_v59, %v413_v59  ;;  %v1303_v44 = vrot.slane %v1301_v11, 1  ;;  %v1306_v47 = vshll.u32 %v9993_v62, 16  ;;  %v7583_v51 = vpack.c.bf16 %v414_v7, %v414_v7  ;;  %v416_v15 = vld [vmem:[%s9716_s29 + $0xf0] sm:$0xff] }
  0x89   : > { %v928_v48 = vsel %vm9736_vm7, %v727_v33, %v927_v2  ;;  %v10021_v49 = vcombine.low %v975_v12, %v10007_v23  ;;  %v735_v55 = vor.u32 %v733_v37, %v732_v39  ;;  %v737_v56 = vrot.slane %v732_v39, 4  ;;  %8499 = vmatpush3.bf16.msra.mxu1 %v9167_v18  ;;  %v10031_v17 = vld [vmem:[#allocation2 + $0x80] ss:$0 sps:$4 sm:$0x11]   ;;  %v977_v33 = vld [vmem:[#allocation2 + $0x84] sm:$0xf] }
  0x8a   : > { %2545 = vmatmul.mubr.bf16.gmra.mrb[20].mxu1 %v9889_v20  ;;  %1926 = vmatmul.mubr.bf16.gmra.mrb[24].mxu0 %v9889_v20  ;;  %929 = vst [vmem:[#allocation2 + $0x9c] sm:$0xf] %v928_v48  ;;  %v739_v57 = vshrl.u32 %v7581_v41, 16  ;;  %v10024_v50 = vsel %vm1189_vm2, %v1292_v16, %v1296_v22  ;;  %v742_v59 = vshll.u32 %v7581_v41, 16  ;;  %v7584_v11 = vpack.c.bf16 %v415_v46, %v415_v46  ;;  %v417_v22 = vld [vmem:[%s9716_s29 + $0xf8] sm:$0xff] }
  0x8b   : > { %2552 = vmatprep.mubr.bf16.mxu1 %v9991_v60  ;;  %1933 = vmatprep.mubr.bf16.mxu0 %v9991_v60  ;;  %12175 = vst [vmem:[#allocation13_spill] sm:$0xff] %v10024_v50  ;;  %v736_v2 = vsel %vm9729_vm6, %v728_v38, %v735_v55  ;;  %v932_v7 = vsel %vm9743_vm8, %v737_v56, %v931_v52  ;;  %v747_v4 = vshrl.u32 %v7582_v43, 16  ;;  %v750_v21 = vshll.u32 %v7582_v43, 16  ;;  %v10039_v18 = vld [vmem:[#allocation2 + $0x88] sm:$0xf] }
  0x8c   : > { %v741_v12 = vrot.slane %v739_v57, 7  ;;  %930 = vst [vmem:[#allocation2 + $0xa0] sm:$0xf] %v736_v2  ;;  %933 = vst [vmem:[#allocation2 + $0xa4] sm:$0x1] %v932_v7  ;;  %v756_v16 = vshrl.u32 %v7583_v51, 16  ;;  %v1304_v24 = vor.u32 %v1303_v44, %v1299_v27  ;;  %v7585_v48 = vpack.c.bf16 %v416_v15, %v416_v15 }
  0x8d   : > { %v1308_v25 = vrot.slane %v1306_v47, 1  ;;  %v1313_v28 = vshll.u32 %v10021_v49, 16  ;;  %v749_v39 = vrot.slane %v747_v4, 7  ;;  %v759_v43 = vshll.u32 %v7583_v51, 16  ;;  %v938_v44 = vld [vmem:[#allocation2 + $0xb0] sm:$0x1] }
  0x8e   : > { %v744_v37 = vor.u32 %v742_v59, %v741_v12  ;;  %v745_v38 = vrot.slane %v741_v12, 4  ;;  %v758_v41 = vrot.slane %v756_v16, 7  ;;  %v1311_v46 = vshrl.u32 %v10021_v49, 16  ;;  %v941_v59 = vld [vmem:[#allocation2 + $0xb4] sm:$0xf] }
  0x8f   : > { %v764_v47 = vshrl.u32 %v7584_v11, 16  ;;  %v1318_v52 = vshll.u32 %v10031_v17, 16  ;;  %v752_v55 = vor.u32 %v750_v21, %v749_v39  ;;  %v754_v56 = vrot.slane %v749_v39, 4  ;;  %v10048_v51 = vld [vmem:[#allocation2 + $0x8c] ss:$0 sps:$4 sm:$0x11]  }
  0x90   : > { %v935_v27 = vsel %vm9736_vm7, %v744_v37, %v934_v1  ;;  %v761_v57 = vor.u32 %v759_v43, %v758_v41  ;;  %v1315_v2 = vrot.slane %v1313_v28, 1  ;;  %v10046_v7 = vcombine.low %v977_v33, %v10039_v18  ;;  %v979_v12 = vld [vmem:[#allocation2 + $0x90] sm:$0xf]  ;;  %v945_v39 = vld [vmem:[#allocation2 + $0xbc] sm:$0x1] }
  0x91   : > { %936 = vst [vmem:[#allocation2 + $0xa8] sm:$0xf] %v935_v27  ;;  %v762_v4 = vrot.slane %v758_v41, 4  ;;  %v7586_v16 = vpack.c.bf16 %v417_v22, %v417_v22  ;;  %v753_v1 = vsel %vm9729_vm6, %v745_v38, %v752_v55  ;;  %v939_v15 = vsel %vm9743_vm8, %v754_v56, %v938_v44  ;;  %v10057_v28 = vld [vmem:[#allocation2 + $0x94] sm:$0xf] }
  0x92   : > { %2553 = vmatmul.mubr.bf16.gmra.mrb[24].mxu1 %v9922_v10  ;;  %1934 = vmatmul.mubr.bf16.gmra.mrb[28].mxu0 %v9922_v10  ;;  %v766_v21 = vrot.slane %v764_v47, 7  ;;  %v767_v37 = vshll.u32 %v7584_v11, 16  ;;  %v10055_v43 = vsel %vm1189_vm2, %v1304_v24, %v1308_v25  ;;  %v10059_v33 = vld [vmem:[#allocation2 + $0x98] ss:$0 sps:$4 sm:$0x11]   ;;  %v942_v22 = vsel %vm9736_vm7, %v761_v57, %v941_v59 }
  0x93   : > { %2560 = vmatprep.mubr.bf16.mxu1 %v10024_v50  ;;  %1941 = vmatprep.mubr.bf16.mxu0 %v10024_v50  ;;  %12176 = vst [vmem:[#allocation14_spill] sm:$0xff] %v10055_v43  ;;  %937 = vst [vmem:[#allocation2 + $0xac] sm:$0xf] %v753_v1  ;;  %v773_v41 = vshrl.u32 %v7585_v48, 16  ;;  %v981_v38 = vld [vmem:[#allocation2 + $0x9c] sm:$0xf]  ;;  %v1316_v57 = vor.u32 %v1315_v2, %v1311_v46  ;;  %v10071_v59 = vcombine.low %v979_v12, %v10057_v28 }
  0x94   : > { %940 = vst [vmem:[#allocation2 + $0xb0] sm:$0x1] %v939_v15  ;;  %v10063_v27 = vld [vmem:[#allocation2 + $0xa0] sm:$0xf]  ;;  %v769_v44 = vor.u32 %v767_v37, %v766_v21  ;;  %v771_v47 = vrot.slane %v766_v21, 4  ;;  %v776_v11 = vshll.u32 %v7585_v48, 16 }
  0x95   : > { %943 = vst [vmem:[#allocation2 + $0xb4] sm:$0xf] %v942_v22  ;;  %v1320_v24 = vrot.slane %v1318_v52, 1  ;;  %v1325_v25 = vshll.u32 %v10046_v7, 16  ;;  %v775_v55 = vrot.slane %v773_v41, 7  ;;  %v781_v56 = vshrl.u32 %v7586_v16, 16 }
  0x96   : > { %v770_v48 = vsel %vm9729_vm6, %v762_v4, %v769_v44  ;;  %v784_v1 = vshll.u32 %v7586_v16, 16  ;;  %v948_v15 = vld [vmem:[#allocation2 + $0xc0] sm:$0xf]  ;;  %v1330_v21 = vshll.u32 %v10048_v51, 16  ;;  %v10077_v52 = vcombine.low %v981_v38, %v10063_v27  ;;  %v952_v2 = vld [vmem:[#allocation2 + $0xc8] sm:$0x1] }
  0x97   : > { %v10079_v37 = vld [vmem:[#allocation2 + $0xa4] ss:$0 sps:$4 sm:$0x11]   ;;  %944 = vst [vmem:[#allocation2 + $0xb8] sm:$0xf] %v770_v48  ;;  %v946_v22 = vsel %vm9743_vm8, %v771_v47, %v945_v39  ;;  %v778_v46 = vor.u32 %v776_v11, %v775_v55  ;;  %v1323_v4 = vshrl.u32 %v10046_v7, 16 }
  0x98   : > { %v10086_v12 = vld [vmem:[%s12134_s1 + $0x200] sm:$0xff]   ;;  %947 = vst [vmem:[#allocation2 + $0xbc] sm:$0x1] %v946_v22  ;;  %v779_v16 = vrot.slane %v775_v55, 4  ;;  %v783_v41 = vrot.slane %v781_v56, 7  ;;  %v1327_v38 = vrot.slane %v1325_v25, 1 }
  0x99   : > { %v1342_v44 = vshll.u32 %v10059_v33, 16  ;;  %v949_v48 = vsel %vm9736_vm7, %v778_v46, %v948_v15  ;;  %8532 = vmatprep.subr.bf16.mxu1 %v10086_v12  ;;  %v1337_v39 = vshll.u32 %v10071_v59, 16  ;;  %v1332_v22 = vrot.slane %v1330_v21, 1  ;;  %v1013_v25 = vld [vmem:[#allocation2 + $0x30] sm:$0xe] }
  0x9a   : > { %2561 = vmatmul.mubr.bf16.gmra.mrb[28].mxu1 %v9945_v45  ;;  %1942 = vmatmul.mubr.bf16.gmra.mrb[32].mxu0 %v9945_v45  ;;  %v786_v47 = vor.u32 %v784_v1, %v783_v41  ;;  %v788_v11 = vrot.slane %v783_v41, 4  ;;  %950 = vst [vmem:[#allocation2 + $0xc0] sm:$0xf] %v949_v48  ;;  %v10095_v45 = vsel %vm1189_vm2, %v1316_v57, %v1320_v24  ;;  %v1349_v55 = vshll.u32 %v10077_v52, 16  ;;  %v983_v56 = vld [vmem:[#allocation2 + $0xa8] sm:$0xf] }
  0x9b   : > { %2568 = vmatprep.mubr.bf16.mxu1 %v10055_v43  ;;  %1949 = vmatprep.mubr.bf16.mxu0 %v10055_v43  ;;  %v1009_v43 = vld [vmem:[#allocation2] sm:$0xe]  ;;  %v10098_v50 = vld [vmem:[#allocation2 + $0xac] sm:$0xf]  ;;  %v1335_v24 = vshrl.u32 %v10071_v59, 16  ;;  %v10107_v57 = vrot.slane %v1342_v44, 1 }
  0x9c   : > { %v787_v15 = vsel %vm9729_vm6, %v779_v16, %v786_v47  ;;  %v953_v46 = vsel %vm9743_vm8, %v788_v11, %v952_v2  ;;  %v1354_v1 = vshll.u32 %v10079_v37, 16  ;;  %v9338_v21 = vld [vmem:[#allocation2 + $0x4] sm:$0xf]  ;;  %v1014_v48 = vld [vmem:[#allocation2 + $0x3c] sm:$0xe]  ;;  %v1328_v2 = vor.u32 %v1327_v38, %v1323_v4 }
  0x9d   : > { %951 = vst [vmem:[#allocation2 + $0xc4] sm:$0xf] %v787_v15  ;;  %954 = vst [vmem:[#allocation2 + $0xc8] sm:$0x1] %v953_v46  ;;  %v7105_v41 = vcombine.low %v1009_v43, %v9338_v21  ;;  %v1339_v16 = vrot.slane %v1337_v39, 1  ;;  %v7109_v11 = vcombine.low %v1013_v25, %v9824_v5  ;;  %v10117_v3 = vcombine.low %v983_v56, %v10098_v50 }
  0x9e   : > { %v10112_v47 = vld [vmem:[#allocation2 + $0xb0] ss:$0 sps:$4 sm:$0x11]   ;;  %v985_v15 = vld [vmem:[#allocation2 + $0xb4] sm:$0xf]  ;;  %v1492_v46 = vrot.slane %v9830_v9, 1  ;;  %v7110_v4 = vcombine.low %v1014_v48, %v9847_v30  ;;  %v10131_v56 = vsel %vm1189_vm2, %v1328_v2, %v1332_v22 }
  0x9f   : > { %v10120_v43 = vrot.slane %v1349_v55, 1  ;;  %v10122_v21 = vld [vmem:[#allocation2 + $0xb8] sm:$0xf]  ;;  %v1491_v54 = vrot.slane %v7109_v11, 1  ;;  %v1015_v38 = vld [vmem:[#allocation2 + $0x48] sm:$0xe] }
  0xa0   : > { %v10125_v39 = vrot.slane %v1354_v1, 1  ;;  %v10127_v5 = vrot.slane %v7105_v41, 1  ;;  %v1495_v25 = vrot.slane %v9857_v36, 1  ;;  %12177 = vst [vmem:[#allocation15_spill] sm:$0xff] %v10131_v56  ;;  %v1494_v11 = vrot.slane %v7110_v4, 1 }
  0xa1   : > { %v10133_v44 = vld [vmem:[#allocation2 + $0x8] ss:$0 sps:$4 sm:$0x11]   ;;  %v10137_v55 = vsel %vm1478_vm9, %v1491_v54, %v1492_v46  ;;  %v1361_v30 = vshll.u32 %v10117_v3, 16  ;;  %v1366_v1 = vshll.u32 %v10112_v47, 16  ;;  %v10142_v41 = vcombine.low %v985_v15, %v10122_v21 }
  0xa2   : > { %2569 = vmatmul.mubr.bf16.gmra.mrb[32].mxu1 %v9983_v42  ;;  %1950 = vmatmul.mubr.bf16.gmra.mrb[36].mxu0 %v9983_v42  ;;  %v7111_v36 = vcombine.low %v1015_v38, %v9878_v14  ;;  %v1016_v48 = vld [vmem:[#allocation2 + $0x54] sm:$0xe]  ;;  %v10146_v22 = vsel %vm1478_vm9, %v1494_v11, %v1495_v25  ;;  %v1498_v2 = vrot.slane %v9899_v32, 1  ;;  %v1501_v54 = vrot.slane %v9935_v26, 1  ;;  %v1017_v4 = vld [vmem:[#allocation2 + $0x60] sm:$0xe] }
  0xa3   : > { %2576 = vmatprep.mubr.bf16.mxu1 %v10095_v45  ;;  %1957 = vmatprep.mubr.bf16.mxu0 %v10095_v45  ;;  %v7112_v9 = vcombine.low %v1016_v48, %v9915_v63  ;;  %v10153_v46 = vld [vmem:[#allocation2 + $0xbc] ss:$0 sps:$4 sm:$0x11]   ;;  %v1340_v14 = vor.u32 %v1339_v16, %v1335_v24  ;;  %v7113_v32 = vcombine.low %v1017_v4, %v9937_v40  ;;  %v1504_v63 = vrot.slane %v9954_v58, 1  ;;  %v1018_v16 = vld [vmem:[#allocation2 + $0x6c] sm:$0xe] }
  0xa4   : > { %v1497_v15 = vrot.slane %v7111_v36, 1  ;;  %v1363_v25 = vrot.slane %v1361_v30, 1  ;;  %v10160_v11 = vrot.slane %v1366_v1, 1  ;;  %v1373_v36 = vshll.u32 %v10142_v41, 16  ;;  %v1019_v30 = vld [vmem:[#allocation2 + $0x78] sm:$0xe] }
  0xa5   : > { %v1500_v38 = vrot.slane %v7112_v9, 1  ;;  %v1503_v24 = vrot.slane %v7113_v32, 1  ;;  %v1378_v40 = vshll.u32 %v10153_v46, 16  ;;  %v7114_v58 = vcombine.low %v1018_v16, %v9964_v13  ;;  %v987_v4 = vld [vmem:[#allocation2 + $0xc0] sm:$0xf] }
  0xa6   : > { %v10165_v61 = vsel %vm1478_vm9, %v1497_v15, %v1498_v2  ;;  %v1507_v9 = vrot.slane %v9993_v62, 1  ;;  %v1510_v1 = vrot.slane %v10031_v17, 1  ;;  %v988_v48 = vld [vmem:[#allocation2 + $0xc4] sm:$0xf]  ;;  %v7115_v2 = vcombine.low %v1019_v30, %v10007_v23  ;;  %v1022_v30 = vld [vmem:[#allocation2 + $0x9c] sm:$0xe] }
  0xa7   : > { %v10175_v26 = vsel %vm1478_vm9, %v1503_v24, %v1504_v63  ;;  %v1506_v15 = vrot.slane %v7114_v58, 1  ;;  %v1516_v62 = vrot.slane %v10059_v33, 1  ;;  %v1020_v32 = vld [vmem:[#allocation2 + $0x84] sm:$0xe]  ;;  %v1021_v63 = vld [vmem:[#allocation2 + $0x90] sm:$0xe]  ;;  %v10199_v16 = vcombine.low %v987_v4, %v988_v48 }
  0xa8   : > { %v1509_v13 = vrot.slane %v7115_v2, 1  ;;  %v9165_v23 = vld [vmem:[#allocation2 + $0xc8] ss:$0 sps:$4 sm:$0x11]   ;;  %v7117_v33 = vcombine.low %v1021_v63, %v10057_v28  ;;  %v1519_v2 = vrot.slane %v10079_v37, 1  ;;  %v7118_v28 = vcombine.low %v1022_v30, %v10063_v27 }
  0xa9   : > { %v10187_v17 = vsel %vm1478_vm9, %v1506_v15, %v1507_v9  ;;  %v1023_v15 = vld [vmem:[#allocation2 + $0xa8] sm:$0xe]  ;;  %v1385_v37 = vshll.u32 %v10199_v16, 16 }
  0xaa   : > { %2577 = vmatmul.mubr.bf16.gmra.mrb[36].mxu1 %v10021_v49  ;;  %1958 = vmatmul.mubr.bf16.gmra.mrb[40].mxu0 %v10021_v49  ;;  %v1515_v9 = vrot.slane %v7117_v33, 1  ;;  %v1518_v63 = vrot.slane %v7118_v28, 1 }
  0xab   : > { %2584 = vmatprep.mubr.bf16.mxu1 %v10131_v56  ;;  %1965 = vmatprep.mubr.bf16.mxu0 %v10131_v56  ;;  %v10168_v56 = vsel %vm1478_vm9, %v1500_v38, %v1501_v54  ;;  %v10180_v54 = vsel %vm1189_vm2, %v1340_v14, %v10107_v57  ;;  %v1513_v38 = vrot.slane %v10048_v51, 1  ;;  %v10192_v57 = vsel %vm1478_vm9, %v1509_v13, %v1510_v1 }
  0xac   : > { %12178 = vst [vmem:[#allocation16_spill] sm:$0xff] %v10180_v54  ;;  %v7116_v51 = vcombine.low %v1020_v32, %v10039_v18  ;;  %v12179_v14 = vshrl.u32 %v10077_v52, 16  ;;  %v10207_v18 = vsel %vm1478_vm9, %v1515_v9, %v1516_v62  ;;  %v1375_v13 = vrot.slane %v1373_v36, 1  ;;  %v1024_v62 = vld [vmem:[#allocation2 + $0xb4] sm:$0xe] }
  0xad   : > { %v1390_v32 = vshll.u32 %v9165_v23, 16  ;;  %v1025_v36 = vld [vmem:[#allocation2 + $0xc0] sm:$0xe]  ;;  %v1383_v9 = vshrl.u32 %v10199_v16, 16 }
  0xae   : > { %v1352_v24 = vor.u32 %v10120_v43, %v12179_v14  ;;  %v1512_v58 = vrot.slane %v7116_v51, 1  ;;  %v7119_v43 = vcombine.low %v1023_v15, %v10098_v50  ;;  %v10222_v50 = vsel %vm1478_vm9, %v1518_v63, %v1519_v2 }
  0xaf   : > { %v1528_v51 = vrot.slane %v9165_v23, 1  ;;  %v7121_v14 = vcombine.low %v1025_v36, %v988_v48  ;;  %v1387_v15 = vrot.slane %v1385_v37, 1  ;;  %v1392_v28 = vrot.slane %v1390_v32, 1  ;;  %v1011_v23 = vld [vmem:[#allocation2 + $0x18] sm:$0xe] }
  0xb0   : > { %v10204_v1 = vsel %vm1478_vm9, %v1512_v58, %v1513_v38  ;;  %v10213_v4 = vsel %vm1189_vm2, %v1352_v24, %v10125_v39  ;;  %v1525_v38 = vrot.slane %v10153_v46, 1  ;;  %v7120_v39 = vcombine.low %v1024_v62, %v10122_v21  ;;  %v1012_v37 = vld [vmem:[#allocation2 + $0x24] sm:$0xe]  ;;  %v9340_v32 = vld [vmem:[#allocation2 + $0x10] sm:$0xf] }
  0xb1   : > { %v12180_v46 = vshrl.u32 %v10117_v3, 16  ;;  %v1380_v24 = vrot.slane %v1378_v40, 1  ;;  %v1527_v30 = vrot.slane %v7121_v14, 1  ;;  %v9341_v62 = vld [vmem:[#allocation2 + $0x1c] sm:$0xf] }
  0xb2   : > { %2585 = vmatmul.mubr.bf16.gmra.mrb[40].mxu1 %v10046_v7  ;;  %1966 = vmatmul.mubr.bf16.gmra.mrb[44].mxu0 %v10046_v7  ;;  %v1524_v58 = vrot.slane %v7120_v39, 1  ;;  %v7107_v39 = vcombine.low %v1011_v23, %v9341_v62  ;;  %v9342_v36 = vld [vmem:[#allocation2 + $0x28] sm:$0xf]  ;;  %v9194_v62 = vld [vmem:[%s12134_s1 + $0x210] sm:$0xff]  }
  0xb3   : > { %2592 = vmatprep.mubr.bf16.mxu1 %v10180_v54  ;;  %1973 = vmatprep.mubr.bf16.mxu0 %v10180_v54  ;;  %v1522_v54 = vrot.slane %v10112_v47, 1  ;;  %v1521_v47 = vrot.slane %v7119_v43, 1  ;;  %v1364_v33 = vor.u32 %v1363_v25, %v12180_v46  ;;  %v10239_v21 = vsel %vm1478_vm9, %v1527_v30, %v1528_v51  ;;  %v9345_v30 = vld [vmem:[#allocation2 + $0x2c] ss:$0 sps:$4 sm:$0x11]  }
  0xb4   : > { %v10232_v2 = vsel %vm1478_vm9, %v1524_v58, %v1525_v38  ;;  %v12181_v25 = vshrl.u32 %v10142_v41, 16  ;;  %v1388_v43 = vor.u32 %v1387_v15, %v1383_v9  ;;  %v7108_v51 = vcombine.low %v1012_v37, %v9342_v36  ;;  %v9344_v58 = vld [vmem:[#allocation2 + $0x20] ss:$0 sps:$4 sm:$0x11]   ;;  %v9193_v36 = vld [vmem:[%s12134_s1 + $0x1e8] sm:$0xff]  }
  0xb5   : > { %v10225_v27 = vsel %vm1478_vm9, %v1521_v47, %v1522_v54  ;;  %v10236_v54 = vsel %vm1189_vm2, %v1364_v33, %v10160_v11  ;;  %v1010_v11 = vld [vmem:[#allocation2 + $0xc] sm:$0xe]  ;;  %v9343_v33 = vld [vmem:[#allocation2 + $0x14] ss:$0 sps:$4 sm:$0x11]   ;;  %v1489_v15 = vrot.slane %v9345_v30, 1 }
  0xb6   : > { %v1376_v48 = vor.u32 %v1375_v13, %v12181_v25  ;;  %v7106_v63 = vcombine.low %v1010_v11, %v9340_v32  ;;  %v10255_v47 = vsel %vm1189_vm2, %v1388_v43, %v1392_v28  ;;  %v12182_v13 = vrot.slane %v10133_v44, 1  ;;  %v9175_v28 = vld [vmem:[%s12134_s1 + $0x1c8] sm:$0xff]   ;;  %v9179_v11 = vld [vmem:[%s12134_s1 + $0x1d0] sm:$0xff]   ;;  %v9183_v32 = vld [vmem:[%s12134_s1 + $0x1d8] sm:$0xff]  }
  0xb7   : > { %v1483_v14 = vrot.slane %v9343_v33, 1  ;;  %v1486_v44 = vrot.slane %v9344_v58, 1  ;;  %v1488_v9 = vrot.slane %v7108_v51, 1  ;;  %v9180_v43 = vld [vmem:[%s12134_s1 + $0x190] sm:$0xff]   ;;  %v9196_v51 = vld [vmem:[%s12134_s1 + $0x218] sm:$0xff]   ;;  %v9200_v33 = vld [vmem:[%s12134_s1 + $0x220] sm:$0xff]  }
  0xb8   : > { %v10248_v40 = vsel %vm1189_vm2, %v1376_v48, %v1380_v24  ;;  %v1481_v38 = vsel %vm1478_vm9, %v10127_v5, %v12182_v13  ;;  %v1482_v46 = vrot.slane %v7106_v63, 1  ;;  %v1485_v24 = vrot.slane %v7107_v39, 1  ;;  %v9172_v5 = vld [vmem:[%s12134_s1 + $0x180] sm:$0xff]   ;;  %v9176_v48 = vld [vmem:[%s12134_s1 + $0x188] sm:$0xff]   ;;  %v9184_v13 = vld [vmem:[%s12134_s1 + $0x198] sm:$0xff]  }
  0xb9   : > { %v10286_v37 = vsel %vm1478_vm9, %v1488_v9, %v1489_v15  ;;  %v9190_v63 = vld [vmem:[%s12134_s1 + $0x208] sm:$0xff]   ;;  %v9189_v39 = vld [vmem:[%s12134_s1 + $0x1a0] sm:$0xff]   ;;  %v9205_v58 = vld [vmem:[%s12134_s1 + $0x1f8] sm:$0xff]  }
  0xba   : > { %2593 = vmatmul.mubr.bf16.gmra.mrb[44].mxu1 %v10071_v59  ;;  %1974 = vmatmul.mubr.bf16.gmra.mrb[48].mxu0 %v10071_v59  ;;  %v1484_v25 = vsel %vm1478_vm9, %v1482_v46, %v1483_v14  ;;  %v10279_v23 = vsel %vm1478_vm9, %v1485_v24, %v1486_v44  ;;  %v9199_v46 = vld [vmem:[%s12134_s1 + $0x1f0] sm:$0xff]   ;;  %v9202_v24 = vld [vmem:[%s12134_s1 + $0x228] sm:$0xff]   ;;  %v9207_v44 = vld [vmem:[%s12134_s1 + $0x1b8] sm:$0xff]  }
  0xbb   : > { %2600 = vmatprep.mubr.bf16.mxu1 %v10213_v4  ;;  %1981 = vmatprep.mubr.bf16.mxu0 %v10213_v4  ;;  %v9201_v14 = vld [vmem:[%s12134_s1 + $0x1b0] sm:$0xff]   ;;  %v9208_v9 = vld [vmem:[%s12134_s1 + $0x238] sm:$0xff]  }
  0xc2   : > { %2601 = vmatmul.mubr.bf16.gmra.mrb[48].mxu1 %v10077_v52  ;;  %1982 = vmatmul.mubr.bf16.gmra.mrb[52].mxu0 %v10077_v52 }
  0xc3   : > { %2608 = vmatprep.mubr.bf16.mxu1 %v10236_v54  ;;  %1989 = vmatprep.mubr.bf16.mxu0 %v10236_v54 }
  0xca   : > { %2609 = vmatmul.mubr.bf16.gmra.mrb[52].mxu1 %v10117_v3  ;;  %1990 = vmatmul.mubr.bf16.gmra.mrb[56].mxu0 %v10117_v3 }
  0xcb   : > { %2616 = vmatprep.mubr.bf16.mxu1 %v10248_v40  ;;  %1997 = vmatprep.mubr.bf16.mxu0 %v10248_v40 }
  0xd2   : > { %2617 = vmatmul.mubr.bf16.gmra.mrb[56].mxu1 %v10142_v41  ;;  %1998 = vmatmul.mubr.bf16.gmra.mrb[60].mxu0 %v10142_v41 }
  0xd3   : > { %2624 = vmatprep.mubr.bf16.mxu1 %v10255_v47  ;;  %8452 = vmatprep.mubr.bf16.mxu0 %v1481_v38  ;;  %v9187_v38 = vld [vmem:[%s12134_s1 + $0x1e0] sm:$0xff]  }
  0xda   : > { %2625 = vmatmul.mubr.bf16.gmra.mrb[60].mxu1 %v10199_v16  ;;  %8453 = vmatmul.mubr.bf16.vlgmr.msra.gmra.mrb[64].mxu0 %v1484_v25 }
  0xdb   : > { %8500 = vmatprep.mubr.bf16.mxu1 %v1484_v25  ;;  %7893 = vmatpush3.bf16.msra.mxu0 %v9172_v5  ;;  %v9206_v5 = vld [vmem:[%s12134_s1 + $0x230] sm:$0xff]  }
  0xdc   : > { %8456 = vmatprep.mubr.bf16.mxu0 %v10279_v23  ;;  %7894 = vmatprep.subr.bf16.mxu0 %v9175_v28 }
  0xdf   : > { %7895 = vmatpush3.bf16.msra.mxu0 %v9176_v48 }
  0xe0   : > { %7896 = vmatprep.subr.bf16.mxu0 %v9179_v11 }
  0xe2   : > { %8501 = vmatmul.mubr.bf16.vlgmr.msra.gmra.mrb[64].mxu1 %v10279_v23  ;;  %8457 = vmatmul.mubr.bf16.gmra.mrb[68].mxu0 %v10286_v37 }
  0xe3   : > { %8504 = vmatprep.mubr.bf16.mxu1 %v10286_v37  ;;  %8460 = vmatprep.mubr.bf16.mxu0 %v10137_v55 }
  0xe4   : > { %7897 = vmatpush3.bf16.msra.mxu0 %v9180_v43  ;;  %8533 = vmatpush3.bf16.msra.mxu1 %v10086_v12  ;;  %v9195_v12 = vld [vmem:[%s12134_s1 + $0x1a8] sm:$0xff]  }
  0xe5   : > { %7898 = vmatprep.subr.bf16.mxu0 %v9183_v32  ;;  %8534 = vmatprep.subr.bf16.mxu1 %v9190_v63 }
  0xe8   : > { %7899 = vmatpush3.bf16.msra.mxu0 %v9184_v13  ;;  %8535 = vmatpush3.bf16.msra.mxu1 %v9190_v63 }
  0xe9   : > { %7900 = vmatprep.subr.bf16.mxu0 %v9187_v38  ;;  %8536 = vmatprep.subr.bf16.mxu1 %v9194_v62 }
  0xea   : > { %8505 = vmatmul.mubr.bf16.gmra.mrb[68].mxu1 %v10137_v55  ;;  %8461 = vmatmul.mubr.bf16.gmra.mrb[72].mxu0 %v10146_v22 }
  0xeb   : > { %8508 = vmatprep.mubr.bf16.mxu1 %v10146_v22  ;;  %8464 = vmatprep.mubr.bf16.mxu0 %v10165_v61 }
  0xec   : > { %7901 = vmatpush3.bf16.msra.mxu0 %v9189_v39  ;;  %8537 = vmatpush3.bf16.msra.mxu1 %v9194_v62 }
  0xed   : > { %7902 = vmatprep.subr.bf16.mxu0 %v9193_v36  ;;  %8538 = vmatprep.subr.bf16.mxu1 %v9196_v51 }
  0xf0   : > { %7903 = vmatpush3.bf16.msra.mxu0 %v9195_v12  ;;  %8539 = vmatpush3.bf16.msra.mxu1 %v9196_v51 }
  0xf1   : > { %7904 = vmatprep.subr.bf16.mxu0 %v9199_v46  ;;  %8540 = vmatprep.subr.bf16.mxu1 %v9200_v33 }
  0xf2   : > { %8509 = vmatmul.mubr.bf16.gmra.mrb[72].mxu1 %v10165_v61  ;;  %8465 = vmatmul.mubr.bf16.gmra.mrb[76].mxu0 %v10168_v56 }
  0xf3   : > { %8512 = vmatprep.mubr.bf16.mxu1 %v10168_v56  ;;  %8468 = vmatprep.mubr.bf16.mxu0 %v10175_v26 }
  0xf4   : > { %7905 = vmatpush3.bf16.msra.mxu0 %v9201_v14  ;;  %8541 = vmatpush3.bf16.msra.mxu1 %v9200_v33 }
  0xf5   : > { %8542 = vmatprep.subr.bf16.mxu1 %v9202_v24  ;;  %7906 = vmatprep.subr.bf16.mxu0 %v9205_v58 }
  0xf8   : > { %8543 = vmatpush3.bf16.msra.mxu1 %v9202_v24  ;;  %7907 = vmatpush3.bf16.msra.mxu0 %v9207_v44 }
  0xf9   : > { %8544 = vmatprep.subr.bf16.mxu1 %v9206_v5 }
  0xfa   : > { %8513 = vmatmul.mubr.bf16.gmra.mrb[76].mxu1 %v10175_v26  ;;  %8469 = vmatmul.mubr.bf16.gmra.mrb[80].mxu0 %v10187_v17 }
  0xfb   : > { %8516 = vmatprep.mubr.bf16.mxu1 %v10187_v17  ;;  %8472 = vmatprep.mubr.bf16.mxu0 %v10192_v57 }
  0xfc   : > { %8545 = vmatpush3.bf16.msra.mxu1 %v9206_v5  ;;  %v10424_v5 = vld [vmem:[#allocation2 + $0xd0] sm:$0xf] }
  0xfd   : > { %8546 = vmatprep.subr.bf16.mxu1 %v9208_v9 }
 0x100   : > { %8547 = vmatpush3.bf16.msra.mxu1 %v9208_v9  ;;  %v1026_v9 = vld [vmem:[#allocation2 + $0xcc] sm:$0xe] }
 0x102   : > { %8517 = vmatmul.mubr.bf16.gmra.mrb[80].mxu1 %v10192_v57  ;;  %8473 = vmatmul.mubr.bf16.gmra.mrb[84].mxu0 %v10204_v1 }
 0x103   : > { %8520 = vmatprep.mubr.bf16.mxu1 %v10204_v1  ;;  %8476 = vmatprep.mubr.bf16.mxu0 %v10207_v18 }
 0x10a   : > { %8521 = vmatmul.mubr.bf16.gmra.mrb[84].mxu1 %v10207_v18  ;;  %8477 = vmatmul.mubr.bf16.gmra.mrb[88].mxu0 %v10222_v50 }
 0x10b   : > { %8524 = vmatprep.mubr.bf16.mxu1 %v10222_v50  ;;  %8480 = vmatprep.mubr.bf16.mxu0 %v10225_v27 }
 0x112   : > { %8525 = vmatmul.mubr.bf16.gmra.mrb[88].mxu1 %v10225_v27  ;;  %8481 = vmatmul.mubr.bf16.gmra.mrb[92].mxu0 %v10232_v2 }
 0x113   : > { %8528 = vmatprep.mubr.bf16.mxu1 %v10232_v2  ;;  %3163 = vmatprep.mubr.bf16.mxu0 %v9836_v6 }
 0x11a   : > { %8529 = vmatmul.mubr.bf16.gmra.mrb[92].mxu1 %v10239_v21  ;;  %3164 = vmatmul.mubr.bf16.vlgmr.msra.gmra.mrb[96].mxu0 %v9797_v31 }
 0x11b   : > { %8548 = vmatprep.mubr.bf16.mxu1 %v10279_v23  ;;  %3171 = vmatprep.mubr.bf16.mxu0 %v9852_v34 }
 0x122   : > { %8549 = vmatmul.mubr.bf16.vlgmr.msra.gmra.mrb[64].mxu1 %v10286_v37  ;;  %3172 = vmatmul.mubr.bf16.gmra.mrb[100].mxu0 %v9812_v53 }
 0x123   : > { %8552 = vmatprep.mubr.bf16.mxu1 %v10137_v55  ;;  %3179 = vmatprep.mubr.bf16.mxu0 %v9886_v19 }
 0x126   : > { %v7636_v30 = vpop.f32.mrb[0].mxu0 }
 0x127   : > { %v7637_v15 = vpop.f32.mrb[1].mxu0 }
 0x128   : > { %v7639_v28 = vpop.f32.mrb[2].mxu0  ;;  %v10376_v6 = vadd.f32 %v7637_v15, %v7636_v30 }
 0x129   : > { %v7640_v25 = vpop.f32.mrb[3].mxu0 }
 0x12a   : > { %v10378_v48 = vadd.f32 %v7640_v25, %v7639_v28  ;;  %8553 = vmatmul.mubr.bf16.gmra.mrb[68].mxu1 %v10146_v22  ;;  %3180 = vmatmul.mubr.bf16.gmra.mrb[104].mxu0 %v9828_v8 }
 0x12b   : > { %8556 = vmatprep.mubr.bf16.mxu1 %v10165_v61  ;;  %3187 = vmatprep.mubr.bf16.mxu0 %v9897_v29 }
 0x132   : > { %8557 = vmatmul.mubr.bf16.gmra.mrb[72].mxu1 %v10168_v56  ;;  %3188 = vmatmul.mubr.bf16.gmra.mrb[108].mxu0 %v9855_v35 }
 0x133   : > { %8560 = vmatprep.mubr.bf16.mxu1 %v10175_v26  ;;  %3195 = vmatprep.mubr.bf16.mxu0 %v9960_v0 }
 0x135   : > { %v7642_v31 = vpop.f32.mrb[4].mxu0  ;;  %v7772_v53 = vpop.f32.mrb[0].mxu1 }
 0x136   : > { %v7643_v34 = vpop.f32.mrb[5].mxu0  ;;  %v7773_v19 = vpop.f32.mrb[1].mxu1 }
 0x137   : > { %v7645_v55 = vpop.f32.mrb[6].mxu0  ;;  %v10388_v22 = vadd.f32 %v7773_v19, %v7772_v53  ;;  %v7775_v8 = vpop.f32.mrb[2].mxu1  ;;  %v10390_v11 = vadd.f32 %v7643_v34, %v7642_v31  ;;  %v10426_v53 = vld [vmem:[#allocation2 + $0xd4] ss:$0 sps:$4 sm:$0x11]   ;;  %v7122_v34 = vcombine.low %v1026_v9, %v10424_v5 }
 0x138   : > { %v7646_v61 = vpop.f32.mrb[7].mxu0  ;;  %v7776_v29 = vpop.f32.mrb[3].mxu1 }
 0x139   : > { %v10392_v23 = vadd.f32 %v7776_v29, %v7775_v8  ;;  %v10394_v56 = vadd.f32 %v7646_v61, %v7645_v55 }
 0x13a   : > { %8561 = vmatmul.mubr.bf16.gmra.mrb[76].mxu1 %v10187_v17  ;;  %3196 = vmatmul.mubr.bf16.gmra.mrb[112].mxu0 %v9889_v20  ;;  %v12183_v20 = vld [vmem:[#allocation13_spill] sm:$0xff] }
 0x13b   : > { %8564 = vmatprep.mubr.bf16.mxu1 %v10192_v57  ;;  %3203 = vmatprep.mubr.bf16.mxu0 %v9991_v60 }
 0x13d   : > { %v7648_v35 = vpop.f32.mrb[8].mxu0  ;;  %v7778_v0 = vpop.f32.mrb[4].mxu1 }
 0x13e   : > { %v7649_v26 = vpop.f32.mrb[9].mxu0  ;;  %v7779_v43 = vpop.f32.mrb[5].mxu1 }
 0x13f   : > { %v7651_v37 = vpop.f32.mrb[10].mxu0  ;;  %v10400_v32 = vadd.f32 %v7779_v43, %v7778_v0  ;;  %v7781_v63 = vpop.f32.mrb[6].mxu1  ;;  %v10402_v13 = vadd.f32 %v7649_v26, %v7648_v35  ;;  %v1530_v35 = vrot.slane %v7122_v34, 1  ;;  %v1531_v0 = vrot.slane %v10426_v53, 1 }
 0x140   : > { %v7652_v38 = vpop.f32.mrb[11].mxu0  ;;  %v7782_v62 = vpop.f32.mrb[7].mxu1 }
 0x141   : > { %v10404_v39 = vadd.f32 %v7782_v62, %v7781_v63  ;;  %v10406_v17 = vadd.f32 %v7652_v38, %v7651_v37  ;;  %v1532_v38 = vsel %vm1478_vm9, %v1530_v35, %v1531_v0 }
 0x142   : > { %8565 = vmatmul.mubr.bf16.gmra.mrb[80].mxu1 %v10204_v1  ;;  %3204 = vmatmul.mubr.bf16.gmra.mrb[116].mxu0 %v9922_v10  ;;  %v12184_v10 = vld [vmem:[#allocation12_spill] sm:$0xff] }
 0x143   : > { %8568 = vmatprep.mubr.bf16.mxu1 %v10207_v18  ;;  %3211 = vmatprep.mubr.bf16.mxu0 %v12183_v20  ;;  %v12185_v18 = vld [vmem:[#allocation14_spill] sm:$0xff] }
 0x145   : > { %v7654_v60 = vpop.f32.mrb[12].mxu0  ;;  %v7784_v57 = vpop.f32.mrb[8].mxu1 }
 0x146   : > { %v7655_v36 = vpop.f32.mrb[13].mxu0  ;;  %v7785_v51 = vpop.f32.mrb[9].mxu1 }
 0x147   : > { %v7657_v12 = vpop.f32.mrb[14].mxu0  ;;  %v10412_v46 = vadd.f32 %v7785_v51, %v7784_v57  ;;  %v7787_v33 = vpop.f32.mrb[10].mxu1  ;;  %v10414_v14 = vadd.f32 %v7655_v36, %v7654_v60 }
 0x148   : > { %v7658_v24 = vpop.f32.mrb[15].mxu0  ;;  %v7788_v58 = vpop.f32.mrb[11].mxu1 }
 0x149   : > { %v10416_v44 = vadd.f32 %v7788_v58, %v7787_v33  ;;  %v10418_v1 = vadd.f32 %v7658_v24, %v7657_v12 }
 0x14a   : > { %8569 = vmatmul.mubr.bf16.gmra.mrb[84].mxu1 %v10222_v50  ;;  %3212 = vmatmul.mubr.bf16.gmra.mrb[120].mxu0 %v12184_v10 }
 0x14b   : > { %8572 = vmatprep.mubr.bf16.mxu1 %v10225_v27  ;;  %3219 = vmatprep.mubr.bf16.mxu0 %v12185_v18 }
 0x14d   : > { %v7660_v30 = vpop.f32.mrb[16].mxu0  ;;  %v7790_v15 = vpop.f32.mrb[12].mxu1 }
 0x14e   : > { %v7661_v28 = vpop.f32.mrb[17].mxu0  ;;  %v7791_v25 = vpop.f32.mrb[13].mxu1 }
 0x14f   : > { %v7663_v31 = vpop.f32.mrb[18].mxu0  ;;  %v10429_v19 = vadd.f32 %v7791_v25, %v7790_v15  ;;  %v7793_v50 = vpop.f32.mrb[14].mxu1  ;;  %v10431_v55 = vadd.f32 %v7661_v28, %v7660_v30 }
 0x150   : > { %v7664_v27 = vpop.f32.mrb[19].mxu0  ;;  %v7794_v8 = vpop.f32.mrb[15].mxu1 }
 0x151   : > { %v10433_v61 = vadd.f32 %v7794_v8, %v7793_v50  ;;  %v10435_v29 = vadd.f32 %v7664_v27, %v7663_v31 }
 0x152   : > { %8573 = vmatmul.mubr.bf16.gmra.mrb[88].mxu1 %v10232_v2  ;;  %3220 = vmatmul.mubr.bf16.gmra.mrb[124].mxu0 %v9983_v42 }
 0x153   : > { %8576 = vmatprep.mubr.bf16.mxu1 %v10239_v21  ;;  %3227 = vmatprep.mubr.bf16.mxu0 %v10095_v45  ;;  %v12186_v45 = vld [vmem:[#allocation15_spill] sm:$0xff] }
 0x155   : > { %v7666_v26 = vpop.f32.mrb[20].mxu0  ;;  %v7796_v43 = vpop.f32.mrb[16].mxu1 }
 0x156   : > { %v7667_v37 = vpop.f32.mrb[21].mxu0  ;;  %v7797_v63 = vpop.f32.mrb[17].mxu1 }
 0x157   : > { %v7669_v62 = vpop.f32.mrb[22].mxu0  ;;  %v10443_v20 = vadd.f32 %v7797_v63, %v7796_v43  ;;  %v7799_v60 = vpop.f32.mrb[18].mxu1  ;;  %v10445_v2 = vadd.f32 %v7667_v37, %v7666_v26 }
 0x158   : > { %v7670_v42 = vpop.f32.mrb[23].mxu0  ;;  %v7800_v57 = vpop.f32.mrb[19].mxu1 }
 0x159   : > { %v10447_v21 = vadd.f32 %v7800_v57, %v7799_v60  ;;  %v10449_v36 = vadd.f32 %v7670_v42, %v7669_v62 }
 0x15a   : > { %8577 = vmatmul.mubr.bf16.gmra.mrb[92].mxu1 %v1532_v38  ;;  %3228 = vmatmul.mubr.bf16.gmra.mrb[128].mxu0 %v10021_v49  ;;  %v12187_v49 = vld [vmem:[#allocation16_spill] sm:$0xff] }
 0x15b   : > { %3235 = vmatprep.mubr.bf16.mxu0 %v12186_v45 }
 0x15d   : > { %v7672_v51 = vpop.f32.mrb[24].mxu0  ;;  %v7802_v12 = vpop.f32.mrb[20].mxu1 }
 0x15e   : > { %v7673_v33 = vpop.f32.mrb[25].mxu0  ;;  %v7803_v24 = vpop.f32.mrb[21].mxu1 }
 0x15f   : > { %v7675_v58 = vpop.f32.mrb[26].mxu0  ;;  %v10453_v10 = vadd.f32 %v7803_v24, %v7802_v12  ;;  %v7805_v18 = vpop.f32.mrb[22].mxu1  ;;  %v10455_v9 = vadd.f32 %v7673_v33, %v7672_v51 }
 0x160   : > { %v7676_v30 = vpop.f32.mrb[27].mxu0  ;;  %v7806_v15 = vpop.f32.mrb[23].mxu1 }
 0x161   : > { %v10457_v28 = vadd.f32 %v7806_v15, %v7805_v18  ;;  %v10459_v25 = vadd.f32 %v7676_v30, %v7675_v58 }
 0x162   : > { %3236 = vmatmul.mubr.bf16.gmra.mrb[132].mxu0 %v10046_v7 }
 0x163   : > { %3243 = vmatprep.mubr.bf16.mxu0 %v12187_v49 }
 0x165   : > { %v7678_v31 = vpop.f32.mrb[28].mxu0  ;;  %v7808_v34 = vpop.f32.mrb[24].mxu1 }
 0x166   : > { %v7679_v50 = vpop.f32.mrb[29].mxu0  ;;  %v7809_v27 = vpop.f32.mrb[25].mxu1 }
 0x167   : > { %v7681_v8 = vpop.f32.mrb[30].mxu0  ;;  %v10463_v35 = vadd.f32 %v7809_v27, %v7808_v34  ;;  %v7811_v0 = vpop.f32.mrb[26].mxu1  ;;  %v10465_v26 = vadd.f32 %v7679_v50, %v7678_v31  ;;  %v9212_v31 = vld [vmem:[%s12137_s4 + $0x40] sm:$0xff]  }
 0x168   : > { %v7682_v43 = vpop.f32.mrb[31].mxu0  ;;  %v7812_v37 = vpop.f32.mrb[27].mxu1  ;;  %8028 = vmatprep.subr.bf16.mxu0 %v9212_v31 }
 0x169   : > { %v10467_v63 = vadd.f32 %v7812_v37, %v7811_v0  ;;  %v10469_v38 = vadd.f32 %v7682_v43, %v7681_v8 }
 0x16a   : > { %3244 = vmatmul.mubr.bf16.gmra.mrb[136].mxu0 %v10071_v59  ;;  %v989_v59 = vld [vmem:[#allocation2 + $0xcc] sm:$0xf] }
 0x16b   : > { %3251 = vmatprep.mubr.bf16.mxu0 %v10213_v4 }
 0x16d   : > { %v7684_v7 = vpop.f32.mrb[32].mxu0  ;;  %v7814_v62 = vpop.f32.mrb[28].mxu1 }
 0x16e   : > { %v7685_v60 = vpop.f32.mrb[33].mxu0  ;;  %v7815_v42 = vpop.f32.mrb[29].mxu1 }
 0x16f   : > { %v10473_v57 = vadd.f32 %v7685_v60, %v7684_v7  ;;  %v7687_v45 = vpop.f32.mrb[34].mxu0  ;;  %v10475_v51 = vadd.f32 %v7815_v42, %v7814_v62  ;;  %v7817_v12 = vpop.f32.mrb[30].mxu1  ;;  %v9214_v62 = vld [vmem:[%s12137_s4 + $0x80] sm:$0xff]   ;;  %v9215_v60 = vld [vmem:[%s12137_s4 + $0x48] sm:$0xff]  }
 0x170   : > { %v7688_v33 = vpop.f32.mrb[35].mxu0  ;;  %v7818_v24 = vpop.f32.mrb[31].mxu1  ;;  %8580 = vmatprep.subr.bf16.mxu1 %v9214_v62 }
 0x171   : > { %v10477_v58 = vadd.f32 %v7688_v33, %v7687_v45  ;;  %v10479_v18 = vadd.f32 %v7818_v24, %v7817_v12  ;;  %8581 = vmatpush3.bf16.msra.mxu1 %v9214_v62 }
 0x172   : > { %3252 = vmatmul.mubr.bf16.gmra.mrb[140].mxu0 %v10077_v52  ;;  %v9213_v52 = vld [vmem:[%s12137_s4] sm:$0xff]  }
 0x173   : > { %3259 = vmatprep.mubr.bf16.mxu0 %v10236_v54  ;;  %v10494_v54 = vcombine.low %v989_v59, %v10424_v5  ;;  %8029 = vmatpush3.bf16.msra.mxu0 %v9213_v52  ;;  %v9216_v5 = vld [vmem:[%s12137_s4 + $0x8] sm:$0xff]   ;;  %v1402_v52 = vshll.u32 %v10426_v53, 16  ;;  %v9222_v53 = vld [vmem:[%s12137_s4 + $0x18] sm:$0xff]  }
 0x174   : > { %8030 = vmatprep.subr.bf16.mxu0 %v9215_v60  ;;  %v9220_v60 = vld [vmem:[%s12137_s4 + $0x90] sm:$0xff]  }
 0x175   : > { %v7690_v4 = vpop.f32.mrb[36].mxu0  ;;  %v7820_v30 = vpop.f32.mrb[32].mxu1  ;;  %v1397_v42 = vshll.u32 %v10494_v54, 16 }
 0x176   : > { %v7691_v15 = vpop.f32.mrb[37].mxu0  ;;  %v7821_v49 = vpop.f32.mrb[33].mxu1 }
 0x177   : > { %v10486_v34 = vadd.f32 %v7691_v15, %v7690_v4  ;;  %v7693_v50 = vpop.f32.mrb[38].mxu0  ;;  %v10488_v27 = vadd.f32 %v7821_v49, %v7820_v30  ;;  %v7823_v8 = vpop.f32.mrb[34].mxu1  ;;  %8031 = vmatpush3.bf16.msra.mxu0 %v9216_v5  ;;  %v9219_v49 = vld [vmem:[%s12137_s4 + $0x10] sm:$0xff]   ;;  %v9221_v5 = vld [vmem:[%s12137_s4 + $0x58] sm:$0xff]  }
 0x178   : > { %v7694_v0 = vpop.f32.mrb[39].mxu0  ;;  %v7824_v43 = vpop.f32.mrb[35].mxu1 }
 0x179   : > { %v10496_v37 = vadd.f32 %v7694_v0, %v7693_v50  ;;  %v10498_v7 = vadd.f32 %v7824_v43, %v7823_v8  ;;  %v1395_v50 = vshrl.u32 %v10494_v54, 16  ;;  %v1399_v8 = vrot.slane %v1397_v42, 1 }
 0x17a   : > { %3260 = vmatmul.mubr.bf16.gmra.mrb[144].mxu0 %v10117_v3  ;;  %v9217_v3 = vld [vmem:[%s12137_s4 + $0x88] sm:$0xff]  }
 0x17b   : > { %3267 = vmatprep.mubr.bf16.mxu0 %v10248_v40  ;;  %v9218_v40 = vld [vmem:[%s12137_s4 + $0x50] sm:$0xff]   ;;  %8582 = vmatprep.subr.bf16.mxu1 %v9217_v3  ;;  %v1400_v42 = vor.u32 %v1399_v8, %v1395_v50 }
 0x17c   : > { %8032 = vmatprep.subr.bf16.mxu0 %v9218_v40  ;;  %8583 = vmatpush3.bf16.msra.mxu1 %v9217_v3 }
 0x17d   : > { %v7696_v45 = vpop.f32.mrb[40].mxu0  ;;  %v7826_v12 = vpop.f32.mrb[36].mxu1  ;;  %8033 = vmatpush3.bf16.msra.mxu0 %v9219_v49  ;;  %8584 = vmatprep.subr.bf16.mxu1 %v9220_v60 }
 0x17e   : > { %v7697_v33 = vpop.f32.mrb[41].mxu0  ;;  %v7827_v24 = vpop.f32.mrb[37].mxu1  ;;  %8034 = vmatprep.subr.bf16.mxu0 %v9221_v5  ;;  %v9226_v5 = vld [vmem:[%s12137_s4 + $0xa0] sm:$0xff]  }
 0x17f   : > { %v10518_v59 = vadd.f32 %v7697_v33, %v7696_v45  ;;  %v7699_v4 = vpop.f32.mrb[42].mxu0  ;;  %v10520_v30 = vadd.f32 %v7827_v24, %v7826_v12  ;;  %v7829_v15 = vpop.f32.mrb[38].mxu1  ;;  %v1404_v45 = vrot.slane %v1402_v52, 1 }
 0x180   : > { %v7700_v31 = vpop.f32.mrb[43].mxu0  ;;  %v7830_v0 = vpop.f32.mrb[39].mxu1  ;;  %8585 = vmatpush3.bf16.msra.mxu1 %v9220_v60 }
 0x181   : > { %v10527_v43 = vadd.f32 %v7700_v31, %v7699_v4  ;;  %v10529_v62 = vadd.f32 %v7830_v0, %v7829_v15  ;;  %8035 = vmatpush3.bf16.msra.mxu0 %v9222_v53  ;;  %v9225_v31 = vld [vmem:[%s12137_s4 + $0x20] sm:$0xff]   ;;  %v1405_v8 = vsel %vm1189_vm2, %v1400_v42, %v1404_v45  ;;  %v9227_v53 = vld [vmem:[%s12137_s4 + $0x68] sm:$0xff]  }
 0x182   : > { %3268 = vmatmul.mubr.bf16.gmra.mrb[148].mxu0 %v10142_v41  ;;  %v9223_v41 = vld [vmem:[%s12137_s4 + $0x98] sm:$0xff]   ;;  %v9228_v42 = vld [vmem:[%s12137_s4 + $0x28] sm:$0xff]  }
 0x183   : > { %12188 = vst [vmem:[#allocation13_spill] sm:$0xff] %v10527_v43  ;;  %3275 = vmatprep.mubr.bf16.mxu0 %v10255_v47  ;;  %v9224_v47 = vld [vmem:[%s12137_s4 + $0x60] sm:$0xff]   ;;  %8586 = vmatprep.subr.bf16.mxu1 %v9223_v41 }
 0x184   : > { %8036 = vmatprep.subr.bf16.mxu0 %v9224_v47  ;;  %8587 = vmatpush3.bf16.msra.mxu1 %v9223_v41  ;;  %v4189_v47 = vld [vmem:[#allocation3 + $0x4] sm:$0xf] }
 0x185   : > { %v7702_v12 = vpop.f32.mrb[44].mxu0  ;;  %v7832_v3 = vpop.f32.mrb[40].mxu1  ;;  %8037 = vmatpush3.bf16.msra.mxu0 %v9225_v31  ;;  %8588 = vmatprep.subr.bf16.mxu1 %v9226_v5 }
 0x186   : > { %v7703_v33 = vpop.f32.mrb[45].mxu0  ;;  %v7833_v24 = vpop.f32.mrb[41].mxu1  ;;  %8038 = vmatprep.subr.bf16.mxu0 %v9227_v53 }
 0x187   : > { %v10548_v40 = vadd.f32 %v7703_v33, %v7702_v12  ;;  %v7705_v4 = vpop.f32.mrb[46].mxu0  ;;  %v10550_v15 = vadd.f32 %v7833_v24, %v7832_v3  ;;  %v7835_v49 = vpop.f32.mrb[42].mxu1  ;;  %v9229_v3 = vld [vmem:[%s12137_s4 + $0xa8] sm:$0xff]   ;;  %v9230_v24 = vld [vmem:[%s12137_s4 + $0x70] sm:$0xff]  }
 0x188   : > { %v7706_v50 = vpop.f32.mrb[47].mxu0  ;;  %v7836_v52 = vpop.f32.mrb[43].mxu1  ;;  %8589 = vmatpush3.bf16.msra.mxu1 %v9226_v5 }
 0x189   : > { %12189 = vst [vmem:[#allocation12_spill] sm:$0xff] %v10550_v15  ;;  %v10556_v0 = vadd.f32 %v7706_v50, %v7705_v4  ;;  %v10558_v60 = vadd.f32 %v7836_v52, %v7835_v49  ;;  %8039 = vmatpush3.bf16.msra.mxu0 %v9228_v42  ;;  %8590 = vmatprep.subr.bf16.mxu1 %v9229_v3  ;;  %v9236_v42 = vld [vmem:[#allocation3 + $0x8] ss:$0 sps:$4 sm:$0x11]  }
 0x18a   : > { %3276 = vmatmul.mubr.bf16.gmra.mrb[152].mxu0 %v10199_v16  ;;  %v4188_v16 = vld [vmem:[#allocation3] sm:$0xf]  ;;  %8040 = vmatprep.subr.bf16.mxu0 %v9230_v24 }
 0x18b   : > { %12190 = vst [vmem:[#allocation14_spill] sm:$0xff] %v10556_v0  ;;  %12191 = vst [vmem:[#allocation15_spill] sm:$0xff] %v10558_v60  ;;  %3283 = vmatprep.mubr.bf16.mxu0 %v1405_v8  ;;  %v9231_v8 = vld [vmem:[%s12137_s4 + $0x30] sm:$0xff]   ;;  %v7325_v52 = vcombine.low %v4188_v16, %v4189_v47  ;;  %v9233_v16 = vld [vmem:[%s12137_s4 + $0x78] sm:$0xff]  }
 0x18c   : > { %8591 = vmatpush3.bf16.msra.mxu1 %v9229_v3  ;;  %v9234_v3 = vld [vmem:[%s12137_s4 + $0x38] sm:$0xff]  }
 0x18d   : > { %v7708_v45 = vpop.f32.mrb[48].mxu0  ;;  %v7838_v12 = vpop.f32.mrb[44].mxu1  ;;  %8041 = vmatpush3.bf16.msra.mxu0 %v9231_v8 }
 0x18e   : > { %v7709_v41 = vpop.f32.mrb[49].mxu0  ;;  %v7839_v33 = vpop.f32.mrb[45].mxu1  ;;  %8042 = vmatprep.subr.bf16.mxu0 %v9233_v16 }
 0x18f   : > { %v10576_v4 = vadd.f32 %v7709_v41, %v7708_v45  ;;  %v7711_v49 = vpop.f32.mrb[50].mxu0  ;;  %v10578_v31 = vadd.f32 %v7839_v33, %v7838_v12  ;;  %v7841_v50 = vpop.f32.mrb[46].mxu1  ;;  %v9232_v45 = vld [vmem:[%s12137_s4 + $0xb0] sm:$0xff]   ;;  %v4425_v12 = vshll.u32 %v7325_v52, 16  ;;  %v4423_v41 = vshrl.u32 %v7325_v52, 16 }
 0x190   : > { %v7712_v5 = vpop.f32.mrb[51].mxu0  ;;  %v7842_v53 = vpop.f32.mrb[47].mxu1  ;;  %v4430_v33 = vshll.u32 %v9236_v42, 16  ;;  %8592 = vmatprep.subr.bf16.mxu1 %v9232_v45 }
 0x191   : > { %12192 = vst [vmem:[#allocation16_spill] sm:$0xff] %v10576_v4  ;;  %12193 = vst [vmem:[#allocation17_spill] sm:$0xff] %v10578_v31  ;;  %v10583_v60 = vadd.f32 %v7712_v5, %v7711_v49  ;;  %v10585_v43 = vadd.f32 %v7842_v53, %v7841_v50  ;;  %v4427_v24 = vrot.slane %v4425_v12, 1  ;;  %8593 = vmatpush3.bf16.msra.mxu1 %v9232_v45  ;;  %v4242_v50 = vld [vmem:[#allocation3] sm:$0xe]  ;;  %8043 = vmatpush3.bf16.msra.mxu0 %v9234_v3 }
 0x192   : > { %3284 = vmatmul.mubr.bf16.gmra.mrb[156].mxu0 %v10494_v54  ;;  %v4432_v49 = vrot.slane %v4430_v33, 1  ;;  %v9237_v53 = vld [vmem:[%s12137_s4 + $0xb8] sm:$0xff]  }
 0x193   : > { %12194 = vst [vmem:[#allocation18_spill] sm:$0xff] %v10583_v60  ;;  %12195 = vst [vmem:[#allocation19_spill] sm:$0xff] %v10585_v43  ;;  %v4428_v54 = vor.u32 %v4427_v24, %v4423_v41  ;;  %v7361_v60 = vcombine.low %v4242_v50, %v4189_v47  ;;  %8594 = vmatprep.subr.bf16.mxu1 %v9237_v53  ;;  %v4711_v41 = vrot.slane %v9236_v42, 1 }
 0x195   : > { %v7714_v8 = vpop.f32.mrb[52].mxu0  ;;  %v7844_v5 = vpop.f32.mrb[48].mxu1  ;;  %v4433_v45 = vsel %vm1189_vm2, %v4428_v54, %v4432_v49  ;;  %v4710_v16 = vrot.slane %v7361_v60, 1  ;;  %8595 = vmatpush3.bf16.msra.mxu1 %v9237_v53 }
 0x196   : > { %v7715_v4 = vpop.f32.mrb[53].mxu0  ;;  %v7845_v43 = vpop.f32.mrb[49].mxu1  ;;  %5108 = vmatprep.mubr.bf16.mxu0 %v4433_v45 }
 0x197   : > { %v10600_v15 = vadd.f32 %v7715_v4, %v7714_v8  ;;  %v7717_v0 = vpop.f32.mrb[54].mxu0  ;;  %v10602_v31 = vadd.f32 %v7845_v43, %v7844_v5  ;;  %v7847_v12 = vpop.f32.mrb[50].mxu1  ;;  %v4712_v4 = vsel %vm1478_vm9, %v4710_v16, %v4711_v41 }
 0x198   : > { %v7718_v33 = vpop.f32.mrb[55].mxu0  ;;  %v7848_v3 = vpop.f32.mrb[51].mxu1  ;;  %8596 = vmatprep.mubr.bf16.mxu1 %v4712_v4 }
 0x199   : > { %v10605_v24 = vadd.f32 %v7718_v33, %v7717_v0  ;;  %v10607_v47 = vadd.f32 %v7848_v3, %v7847_v12 }
 0x19a   : > { %5109 = vmatmul.mubr.bf16.vlgmr.msra.gmra.mrb[160].mxu0 %v7325_v52 }
 0x19b   : > { %12196 = vst [vmem:[#allocation20_spill] sm:$0xff] %v10607_v47 }
 0x19d   : > { %v7720_v43 = vpop.f32.mrb[56].mxu0  ;;  %v7850_v50 = vpop.f32.mrb[52].mxu1 }
 0x19e   : > { %v7721_v8 = vpop.f32.mrb[57].mxu0  ;;  %v7851_v5 = vpop.f32.mrb[53].mxu1 }
 0x19f   : > { %v10610_v49 = vadd.f32 %v7721_v8, %v7720_v43  ;;  %v7723_v60 = vpop.f32.mrb[58].mxu0  ;;  %v10612_v54 = vadd.f32 %v7851_v5, %v7850_v50  ;;  %v7853_v45 = vpop.f32.mrb[54].mxu1 }
 0x1a0   : > { %v7724_v53 = vpop.f32.mrb[59].mxu0  ;;  %v7854_v42 = vpop.f32.mrb[55].mxu1 }
 0x1a1   : > { %12197 = vst [vmem:[#allocation21_spill] sm:$0xff] %v10610_v49  ;;  %v10614_v0 = vadd.f32 %v7724_v53, %v7723_v60  ;;  %v10616_v12 = vadd.f32 %v7854_v42, %v7853_v45 }
 0x1a3   : > { %12198 = vst [vmem:[#allocation22_spill] sm:$0xff] %v10614_v0  ;;  %12199 = vst [vmem:[#allocation23_spill] sm:$0xff] %v10616_v12 }
 0x1a5   : > { %v7726_v52 = vpop.f32.mrb[60].mxu0  ;;  %v7856_v33 = vpop.f32.mrb[56].mxu1 }
 0x1a6   : > { %v7727_v16 = vpop.f32.mrb[61].mxu0  ;;  %v7857_v3 = vpop.f32.mrb[57].mxu1 }
 0x1a7   : > { %v10618_v41 = vadd.f32 %v7727_v16, %v7726_v52  ;;  %v7729_v4 = vpop.f32.mrb[62].mxu0  ;;  %v10620_v47 = vadd.f32 %v7857_v3, %v7856_v33  ;;  %v7859_v43 = vpop.f32.mrb[58].mxu1 }
 0x1a8   : > { %v7730_v8 = vpop.f32.mrb[63].mxu0  ;;  %v7860_v50 = vpop.f32.mrb[59].mxu1 }
 0x1a9   : > { %v10622_v5 = vadd.f32 %v7730_v8, %v7729_v4  ;;  %v10624_v49 = vadd.f32 %v7860_v50, %v7859_v43 }
 0x1ad   : > { %v8454_v60 = vpop.f32.mrb[64].mxu0  ;;  %v7862_v53 = vpop.f32.mrb[60].mxu1 }
 0x1ae   : > { %v2049_v45 = vadd.f32 %v8454_v60, %v10390_v11  ;;  %v2040_v42 = vpop.f32.mrb[65].mxu0  ;;  %v7863_v0 = vpop.f32.mrb[61].mxu1 }
 0x1af   : > { %v2041_v12 = vadd.f32 %v10376_v6, %v2040_v42  ;;  %v8455_v52 = vpop.f32.mrb[66].mxu0  ;;  %v10628_v16 = vadd.f32 %v7863_v0, %v7862_v53  ;;  %v7865_v33 = vpop.f32.mrb[62].mxu1 }
 0x1b0   : > { %v10631_v3 = vadd.f32 %v10400_v32, %v2049_v45  ;;  %v2052_v4 = vadd.f32 %v8455_v52, %v10394_v56  ;;  %v2043_v8 = vpop.f32.mrb[67].mxu0  ;;  %v7866_v43 = vpop.f32.mrb[63].mxu1 }
 0x1b1   : > { %v10635_v50 = vadd.f32 %v10388_v22, %v2041_v12  ;;  %v2044_v11 = vadd.f32 %v10378_v48, %v2043_v8  ;;  %v10638_v60 = vadd.f32 %v7866_v43, %v7865_v33 }
 0x1b2   : > { %v10641_v6 = vadd.f32 %v10404_v39, %v2052_v4 }
 0x1b3   : > { %v10644_v0 = vadd.f32 %v10392_v23, %v2044_v11 }
 0x1b5   : > { %v8458_v53 = vpop.f32.mrb[68].mxu0 }
 0x1b6   : > { %v2065_v32 = vadd.f32 %v8458_v53, %v10414_v14  ;;  %v2056_v45 = vpop.f32.mrb[69].mxu0 }
 0x1b7   : > { %v2057_v56 = vadd.f32 %v10402_v13, %v2056_v45  ;;  %v8459_v42 = vpop.f32.mrb[70].mxu0 }
 0x1b8   : > { %v10649_v22 = vadd.f32 %v10429_v19, %v2065_v32  ;;  %v2068_v48 = vadd.f32 %v8459_v42, %v10418_v1  ;;  %v2059_v12 = vpop.f32.mrb[71].mxu0 }
 0x1b9   : > { %v10653_v52 = vadd.f32 %v10412_v46, %v2057_v56  ;;  %v2060_v39 = vadd.f32 %v10406_v17, %v2059_v12 }
 0x1ba   : > { %v10657_v23 = vadd.f32 %v10433_v61, %v2068_v48 }
 0x1bb   : > { %v10660_v14 = vadd.f32 %v10416_v44, %v2060_v39 }
 0x1bd   : > { %v8462_v33 = vpop.f32.mrb[72].mxu0 }
 0x1be   : > { %v2081_v13 = vadd.f32 %v8462_v33, %v10445_v2  ;;  %v2072_v4 = vpop.f32.mrb[73].mxu0 }
 0x1bf   : > { %v2073_v19 = vadd.f32 %v10431_v55, %v2072_v4  ;;  %v8463_v8 = vpop.f32.mrb[74].mxu0 }
 0x1c0   : > { %v10665_v1 = vadd.f32 %v10453_v10, %v2081_v13  ;;  %v2084_v46 = vadd.f32 %v8463_v8, %v10449_v36  ;;  %v2075_v43 = vpop.f32.mrb[75].mxu0 }
 0x1c1   : > { %v10669_v17 = vadd.f32 %v10443_v20, %v2073_v19  ;;  %v2076_v61 = vadd.f32 %v10435_v29, %v2075_v43 }
 0x1c2   : > { %v10673_v44 = vadd.f32 %v10457_v28, %v2084_v46 }
 0x1c3   : > { %v10676_v2 = vadd.f32 %v10447_v21, %v2076_v61 }
 0x1c5   : > { %v8466_v11 = vpop.f32.mrb[76].mxu0 }
 0x1c6   : > { %v2097_v55 = vadd.f32 %v8466_v11, %v10465_v26  ;;  %v2088_v53 = vpop.f32.mrb[77].mxu0  ;;  %v12205_v11 = vld [vmem:[#allocation15_spill] sm:$0xff] }
 0x1c7   : > { %v2089_v10 = vadd.f32 %v10455_v9, %v2088_v53  ;;  %v8467_v32 = vpop.f32.mrb[78].mxu0 }
 0x1c8   : > { %v10681_v36 = vadd.f32 %v10475_v51, %v2097_v55  ;;  %v2100_v20 = vadd.f32 %v8467_v32, %v10469_v38  ;;  %v2091_v45 = vpop.f32.mrb[79].mxu0 }
 0x1c9   : > { %v10685_v29 = vadd.f32 %v10463_v35, %v2089_v10  ;;  %v2092_v28 = vadd.f32 %v10459_v25, %v2091_v45  ;;  %v12206_v10 = vld [vmem:[#allocation16_spill] sm:$0xff] }
 0x1ca   : > { %v10689_v21 = vadd.f32 %v10479_v18, %v2100_v20 }
 0x1cb   : > { %v10692_v26 = vadd.f32 %v10467_v63, %v2092_v28 }
 0x1cd   : > { %v8470_v56 = vpop.f32.mrb[80].mxu0 }
 0x1ce   : > { %v2113_v9 = vadd.f32 %v8470_v56, %v10486_v34  ;;  %v2104_v42 = vpop.f32.mrb[81].mxu0 }
 0x1cf   : > { %v2105_v51 = vadd.f32 %v10473_v57, %v2104_v42  ;;  %v8471_v48 = vpop.f32.mrb[82].mxu0  ;;  %v12209_v42 = vld [vmem:[#allocation18_spill] sm:$0xff] }
 0x1d0   : > { %v10697_v38 = vadd.f32 %v10520_v30, %v2113_v9  ;;  %v2116_v35 = vadd.f32 %v8471_v48, %v10496_v37  ;;  %v2107_v12 = vpop.f32.mrb[83].mxu0  ;;  %v12200_v37 = vld [vmem:[#allocation17_spill] sm:$0xff]  ;;  %v12210_v48 = vld [vmem:[#allocation23_spill] sm:$0xff] }
 0x1d1   : > { %v10701_v25 = vadd.f32 %v10488_v27, %v2105_v51  ;;  %v2108_v18 = vadd.f32 %v10477_v58, %v2107_v12  ;;  %v12201_v27 = vld [vmem:[#allocation14_spill] sm:$0xff]  ;;  %v12202_v58 = vld [vmem:[#allocation12_spill] sm:$0xff] }
 0x1d2   : > { %v10705_v63 = vadd.f32 %v10529_v62, %v2116_v35  ;;  %v12203_v62 = vld [vmem:[#allocation13_spill] sm:$0xff]  ;;  %v12212_v12 = vld [vmem:[#allocation20_spill] sm:$0xff] }
 0x1d3   : > { %v10708_v34 = vadd.f32 %v10498_v7, %v2108_v18  ;;  %v12204_v7 = vld [vmem:[#allocation19_spill] sm:$0xff] }
 0x1d5   : > { %v8474_v39 = vpop.f32.mrb[84].mxu0 }
 0x1d6   : > { %v2129_v57 = vadd.f32 %v8474_v39, %v10548_v40  ;;  %v2120_v33 = vpop.f32.mrb[85].mxu0 }
 0x1d7   : > { %v2121_v30 = vadd.f32 %v10518_v59, %v2120_v33  ;;  %v8475_v13 = vpop.f32.mrb[86].mxu0 }
 0x1d8   : > { %v10713_v4 = vadd.f32 %v12200_v37, %v2129_v57  ;;  %v2132_v19 = vadd.f32 %v8475_v13, %v12201_v27  ;;  %v2123_v8 = vpop.f32.mrb[87].mxu0  ;;  %v12217_v27 = vld [vmem:[#allocation22_spill] sm:$0xff] }
 0x1d9   : > { %v10717_v46 = vadd.f32 %v12202_v58, %v2121_v30  ;;  %v2124_v43 = vadd.f32 %v12203_v62, %v2123_v8 }
 0x1da   : > { %v10721_v61 = vadd.f32 %v12204_v7, %v2132_v19 }
 0x1db   : > { %v10724_v40 = vadd.f32 %v12205_v11, %v2124_v43 }
 0x1dd   : > { %v8478_v55 = vpop.f32.mrb[88].mxu0 }
 0x1de   : > { %v2145_v59 = vadd.f32 %v8478_v55, %v10600_v15  ;;  %v2136_v53 = vpop.f32.mrb[89].mxu0 }
 0x1df   : > { %v2137_v32 = vadd.f32 %v12206_v10, %v2136_v53  ;;  %v8479_v20 = vpop.f32.mrb[90].mxu0  ;;  %v10769_v53 = vld [vmem:[%s12135_s2] ss:$0 sm:$0xff] }
 0x1e0   : > { %v10729_v45 = vadd.f32 %v10612_v54, %v2145_v59  ;;  %v2148_v28 = vadd.f32 %v8479_v20, %v10605_v24  ;;  %v2139_v56 = vpop.f32.mrb[91].mxu0  ;;  %v12214_v54 = vld [vmem:[#allocation21_spill] sm:$0xff] }
 0x1e1   : > { %v10733_v9 = vadd.f32 %v10602_v31, %v2137_v32  ;;  %v2140_v51 = vadd.f32 %v12209_v42, %v2139_v56 }
 0x1e2   : > { %12207 = vst [vmem:[#allocation17_spill] sm:$0xff] %v10729_v45  ;;  %v10737_v35 = vadd.f32 %v12210_v48, %v2148_v28 }
 0x1e3   : > { %12208 = vst [vmem:[#allocation14_spill] sm:$0xff] %v10733_v9  ;;  %v10740_v15 = vadd.f32 %v12212_v12, %v2140_v51  ;;  %v4108_v9 = vld [vmem:[#allocation3 + $0x44] sm:$0x1] }
 0x1e4   : > { %12211 = vst [vmem:[#allocation12_spill] sm:$0xff] %v10737_v35 }
 0x1e5   : > { %12213 = vst [vmem:[#allocation13_spill] sm:$0xff] %v10740_v15  ;;  %v8482_v18 = vpop.f32.mrb[92].mxu0 }
 0x1e6   : > { %v2161_v39 = vadd.f32 %v8482_v18, %v10618_v41  ;;  %v2152_v57 = vpop.f32.mrb[93].mxu0 }
 0x1e7   : > { %v2153_v33 = vadd.f32 %v12214_v54, %v2152_v57  ;;  %v8483_v30 = vpop.f32.mrb[94].mxu0 }
 0x1e8   : > { %v10745_v24 = vadd.f32 %v10628_v16, %v2161_v39  ;;  %v2164_v31 = vadd.f32 %v8483_v30, %v10622_v5  ;;  %v2155_v13 = vpop.f32.mrb[95].mxu0  ;;  %v10761_v16 = vld [vmem:[%s12137_s4 + $0x140] sm:$0xff]  }
 0x1e9   : > { %v10749_v37 = vadd.f32 %v10620_v47, %v2153_v33  ;;  %v2156_v19 = vadd.f32 %v12217_v27, %v2155_v13  ;;  %8628 = vmatprep.subr.bf16.mxu1 %v10761_v16 }
 0x1ea   : > { %12215 = vst [vmem:[#allocation19_spill] sm:$0xff] %v10745_v24  ;;  %v10753_v8 = vadd.f32 %v10638_v60, %v2164_v31 }
 0x1eb   : > { %12216 = vst [vmem:[#allocation15_spill] sm:$0xff] %v10749_v37  ;;  %v10756_v41 = vadd.f32 %v10624_v49, %v2156_v19 }
 0x1ec   : > { %12218 = vst [vmem:[#allocation16_spill] sm:$0xff] %v10753_v8 }
 0x1ed   : > { %12219 = vst [vmem:[#allocation18_spill] sm:$0xff] %v10756_v41  ;;  %v7908_v58 = vpop.f32.mrb[96].mxu0 }
 0x1ee   : > { %v7909_v62 = vpop.f32.mrb[97].mxu0 }
 0x1ef   : > { %v7910_v5 = vadd.f32 %v7909_v62, %v7908_v58  ;;  %v7911_v43 = vpop.f32.mrb[98].mxu0 }
 0x1f0   : > { %v7912_v7 = vpop.f32.mrb[99].mxu0 }
 0x1f1   : > { %v8730_v47 = vadd.f32 %v10635_v50, %v7910_v5  ;;  %v7913_v11 = vadd.f32 %v7912_v7, %v7911_v43  ;;  %v10774_v50 = vld [vmem:[%s12136_s3] ss:$0 sm:$0xff] }
 0x1f3   : > { %v8738_v60 = vadd.f32 %v10644_v0, %v7913_v11 }
 0x1f5   : > { %v8550_v55 = vpop.f32.mrb[64].mxu1  ;;  %v7914_v49 = vpop.f32.mrb[100].mxu0 }
 0x1f6   : > { %v3326_v59 = vpop.f32.mrb[65].mxu1  ;;  %v7915_v10 = vpop.f32.mrb[101].mxu0 }
 0x1f7   : > { %v8731_v32 = vadd.f32 %v8730_v47, %v3326_v59  ;;  %v8551_v20 = vpop.f32.mrb[66].mxu1  ;;  %v7916_v28 = vadd.f32 %v7915_v10, %v7914_v49  ;;  %v7917_v56 = vpop.f32.mrb[102].mxu0 }
 0x1f8   : > { %v3329_v42 = vpop.f32.mrb[67].mxu1  ;;  %v7918_v0 = vpop.f32.mrb[103].mxu0 }
 0x1f9   : > { %v3556_v51 = vmul.f32 %v8731_v32, %v10769_v53  ;;  %v8739_v48 = vadd.f32 %v8738_v60, %v3329_v42  ;;  %v8726_v12 = vadd.f32 %v10631_v3, %v7916_v28  ;;  %v7919_v18 = vadd.f32 %v7918_v0, %v7917_v56 }
 0x1fb   : > { %v3595_v39 = vadd.f32 %v10774_v50, %v3556_v51  ;;  %v3557_v57 = vmul.f32 %v8739_v48, %v10769_v53  ;;  %v8727_v54 = vadd.f32 %v8726_v12, %v8550_v55  ;;  %v8734_v33 = vadd.f32 %v10641_v6, %v7919_v18  ;;  %v4076_v12 = vld [vmem:[#allocation3 + $0xc] sm:$0xf] }
 0x1fd   : > { %v3627_v30 = vmax.f32 %v3595_v39, 0.0  ;;  %v3596_v31 = vadd.f32 %v10774_v50, %v3557_v57  ;;  %v10782_v13 = vpop.f32.mrb[68].mxu1  ;;  %v3558_v27 = vmul.f32 %v8727_v54, %v10769_v53  ;;  %v8735_v19 = vadd.f32 %v8734_v33, %v8551_v20  ;;  %v7920_v58 = vpop.f32.mrb[104].mxu0 }
 0x1fe   : > { %v3342_v62 = vpop.f32.mrb[69].mxu1  ;;  %v7921_v5 = vpop.f32.mrb[105].mxu0 }
 0x1ff   : > { %v7587_v3 = vpack.c.bf16 %v3627_v30, %v3627_v30  ;;  %v3628_v43 = vmax.f32 %v3596_v31, 0.0  ;;  %v3597_v7 = vadd.f32 %v10774_v50, %v3558_v27  ;;  %v10786_v47 = vpop.f32.mrb[70].mxu1  ;;  %v3559_v11 = vmul.f32 %v8735_v19, %v10769_v53  ;;  %v7923_v6 = vpop.f32.mrb[106].mxu0 }
 0x200   : > { %v3345_v60 = vpop.f32.mrb[71].mxu1  ;;  %v7922_v55 = vadd.f32 %v7921_v5, %v7920_v58  ;;  %v7924_v49 = vpop.f32.mrb[107].mxu0  ;;  %v4080_v5 = vld [vmem:[#allocation3 + $0x14] sm:$0x1] }
 0x201   : > { %v3756_v59 = vshrl.u32 %v7587_v3, 16  ;;  %v7588_v10 = vpack.c.bf16 %v3628_v43, %v3628_v43  ;;  %v3629_v32 = vmax.f32 %v3597_v7, 0.0  ;;  %v3598_v20 = vadd.f32 %v10774_v50, %v3559_v11 }
 0x202   : > { %v8746_v28 = vadd.f32 %v10653_v52, %v7922_v55  ;;  %v7925_v56 = vadd.f32 %v7924_v49, %v7923_v6  ;;  %v3759_v0 = vshll.u32 %v7587_v3, 16 }
 0x203   : > { %v3758_v42 = vrot.slane %v3756_v59, 7  ;;  %v3764_v51 = vshrl.u32 %v7588_v10, 16  ;;  %v7589_v48 = vpack.c.bf16 %v3629_v32, %v3629_v32  ;;  %v3767_v18 = vshll.u32 %v7588_v10, 16 }
 0x204   : > { %v3630_v39 = vmax.f32 %v3598_v20, 0.0  ;;  %v8747_v57 = vadd.f32 %v8746_v28, %v3342_v62  ;;  %v8754_v54 = vadd.f32 %v10660_v14, %v7925_v56  ;;  %v4083_v20 = vld [vmem:[#allocation3 + $0x18] sm:$0xf] }
 0x205   : > { %v3761_v33 = vor.u32 %v3759_v0, %v3758_v42  ;;  %v3762_v30 = vrot.slane %v3758_v42, 4  ;;  %v3766_v31 = vrot.slane %v3764_v51, 7  ;;  %v3773_v27 = vshrl.u32 %v7589_v48, 16  ;;  %v10792_v19 = vpop.f32.mrb[72].mxu1  ;;  %v7926_v58 = vpop.f32.mrb[108].mxu0 }
 0x206   : > { %v3776_v52 = vshll.u32 %v7589_v48, 16  ;;  %v7590_v43 = vpack.c.bf16 %v3630_v39, %v3630_v39  ;;  %v3560_v3 = vmul.f32 %v8747_v57, %v10769_v53  ;;  %v10795_v7 = vpop.f32.mrb[73].mxu1  ;;  %v8755_v11 = vadd.f32 %v8754_v54, %v3345_v60  ;;  %v7927_v6 = vpop.f32.mrb[109].mxu0 }
 0x207   : > { %v4077_v62 = vsel %vm9736_vm7, %v3761_v33, %v4076_v12  ;;  %v3769_v14 = vor.u32 %v3767_v18, %v3766_v31  ;;  %v3771_v49 = vrot.slane %v3766_v31, 4  ;;  %v3775_v59 = vrot.slane %v3773_v27, 7  ;;  %v10799_v10 = vpop.f32.mrb[74].mxu1  ;;  %v7929_v32 = vpop.f32.mrb[110].mxu0 }
 0x208   : > { %4078 = vst [vmem:[#allocation3 + $0xc] sm:$0xf] %v4077_v62  ;;  %v3781_v28 = vshrl.u32 %v7590_v43, 16  ;;  %v3599_v56 = vadd.f32 %v10774_v50, %v3560_v3  ;;  %v3561_v42 = vmul.f32 %v8755_v11, %v10769_v53  ;;  %v10803_v0 = vpop.f32.mrb[75].mxu1  ;;  %v7930_v60 = vpop.f32.mrb[111].mxu0  ;;  %v3784_v57 = vshll.u32 %v7590_v43, 16 }
 0x209   : > { %v3770_v48 = vsel %vm9729_vm6, %v3762_v30, %v3769_v14  ;;  %v4081_v18 = vsel %vm9743_vm8, %v3771_v49, %v4080_v5  ;;  %v3778_v39 = vor.u32 %v3776_v52, %v3775_v59  ;;  %v7928_v27 = vadd.f32 %v7927_v6, %v7926_v58  ;;  %v4087_v62 = vld [vmem:[#allocation3 + $0x20] sm:$0x1] }
 0x20a   : > { %4079 = vst [vmem:[#allocation3 + $0x10] sm:$0xf] %v3770_v48  ;;  %4082 = vst [vmem:[#allocation3 + $0x14] sm:$0x1] %v4081_v18  ;;  %v3783_v54 = vrot.slane %v3781_v28, 7  ;;  %v3631_v33 = vmax.f32 %v3599_v56, 0.0  ;;  %v3600_v31 = vadd.f32 %v10774_v50, %v3561_v42  ;;  %v7931_v8 = vadd.f32 %v7930_v60, %v7929_v32 }
 0x20b   : > { %v3779_v3 = vrot.slane %v3775_v59, 4  ;;  %v4084_v11 = vsel %vm9736_vm7, %v3778_v39, %v4083_v20  ;;  %v8742_v43 = vadd.f32 %v10649_v22, %v7928_v27  ;;  %v4090_v56 = vld [vmem:[#allocation3 + $0x24] sm:$0xf] }
 0x20c   : > { %4085 = vst [vmem:[#allocation3 + $0x18] sm:$0xf] %v4084_v11  ;;  %v3786_v30 = vor.u32 %v3784_v57, %v3783_v54  ;;  %v3788_v14 = vrot.slane %v3783_v54, 4  ;;  %v7591_v24 = vpack.c.bf16 %v3631_v33, %v3631_v33  ;;  %v3632_v5 = vmax.f32 %v3600_v31, 0.0  ;;  %v9280_v31 = vld [vmem:[%s12137_s4 + $0x100] sm:$0xff]  }
 0x20d   : > { %v10812_v52 = vpop.f32.mrb[76].mxu1  ;;  %v8750_v49 = vadd.f32 %v10657_v23, %v7931_v8  ;;  %v7932_v28 = vpop.f32.mrb[112].mxu0  ;;  %v8743_v60 = vadd.f32 %v8742_v43, %v10782_v13  ;;  %v9281_v13 = vld [vmem:[%s12137_s4 + $0xc0] sm:$0xff]   ;;  %8164 = vmatprep.subr.bf16.mxu0 %v9280_v31 }
 0x20e   : > { %v3787_v58 = vsel %vm9729_vm6, %v3779_v3, %v3786_v30  ;;  %v4088_v6 = vsel %vm9743_vm8, %v3788_v14, %v4087_v62  ;;  %v3790_v59 = vshrl.u32 %v7591_v24, 16  ;;  %v10820_v32 = vpop.f32.mrb[77].mxu1  ;;  %v7933_v20 = vpop.f32.mrb[113].mxu0  ;;  %v7592_v42 = vpack.c.bf16 %v3632_v5, %v3632_v5  ;;  %8165 = vmatpush3.bf16.msra.mxu0 %v9281_v13 }
 0x20f   : > { %4086 = vst [vmem:[#allocation3 + $0x1c] sm:$0xf] %v3787_v58  ;;  %4089 = vst [vmem:[#allocation3 + $0x20] sm:$0x1] %v4088_v6  ;;  %v10823_v22 = vpop.f32.mrb[78].mxu1  ;;  %v8751_v23 = vadd.f32 %v8750_v49, %v10786_v47  ;;  %v7934_v8 = vadd.f32 %v7933_v20, %v7932_v28  ;;  %v7935_v48 = vpop.f32.mrb[114].mxu0  ;;  %v3562_v47 = vmul.f32 %v8743_v60, %v10769_v53 }
 0x210   : > { %v3792_v18 = vrot.slane %v3790_v59, 7  ;;  %v3793_v39 = vshll.u32 %v7591_v24, 16  ;;  %v10826_v57 = vpop.f32.mrb[79].mxu1  ;;  %v7936_v54 = vpop.f32.mrb[115].mxu0  ;;  %v4190_v33 = vld [vmem:[#allocation3 + $0xc] sm:$0xf] }
 0x211   : > { %v3798_v27 = vshrl.u32 %v7592_v42, 16  ;;  %v3801_v3 = vshll.u32 %v7592_v42, 16  ;;  %v3563_v11 = vmul.f32 %v8751_v23, %v10769_v53  ;;  %v4191_v62 = vld [vmem:[#allocation3 + $0x10] sm:$0xf]  ;;  %v8762_v14 = vadd.f32 %v10669_v17, %v7934_v8  ;;  %v4243_v59 = vld [vmem:[#allocation3 + $0xc] sm:$0xe] }
 0x212   : > { %v3795_v24 = vor.u32 %v3793_v39, %v3792_v18  ;;  %v3796_v30 = vrot.slane %v3792_v18, 4  ;;  %v7937_v5 = vadd.f32 %v7936_v54, %v7935_v48  ;;  %v10837_v43 = vld [vmem:[#allocation3 + $0x14] ss:$0 sps:$4 sm:$0x11]   ;;  %v3601_v58 = vadd.f32 %v10774_v50, %v3562_v47  ;;  %v4094_v60 = vld [vmem:[#allocation3 + $0x2c] sm:$0x1] }
 0x213   : > { %v9286_v49 = vld [vmem:[%s12137_s4 + $0x108] sm:$0xff]   ;;  %v3800_v28 = vrot.slane %v3798_v27, 7  ;;  %v3602_v6 = vadd.f32 %v10774_v50, %v3563_v11  ;;  %v10844_v20 = vcombine.low %v4190_v33, %v4191_v62  ;;  %v8763_v23 = vadd.f32 %v8762_v14, %v10795_v7  ;;  %v4244_v15 = vld [vmem:[#allocation3 + $0x18] sm:$0xe] }
 0x214   : > { %v9287_v17 = vld [vmem:[%s12137_s4 + $0xc8] sm:$0xff]   ;;  %v4091_v42 = vsel %vm9736_vm7, %v3795_v24, %v4090_v56  ;;  %v8770_v8 = vadd.f32 %v10676_v2, %v7937_v5  ;;  %v7362_v48 = vcombine.low %v4243_v59, %v4191_v62  ;;  %8166 = vmatprep.subr.bf16.mxu0 %v9286_v49  ;;  %v3633_v54 = vmax.f32 %v3601_v58, 0.0 }
 0x215   : > { %12223 = vst [vmem:[#allocation23_spill] sm:$0xff] %v10844_v20  ;;  %4092 = vst [vmem:[#allocation3 + $0x24] sm:$0xf] %v4091_v42  ;;  %v3803_v18 = vor.u32 %v3801_v3, %v3800_v28  ;;  %v3805_v39 = vrot.slane %v3800_v28, 4  ;;  %v3634_v33 = vmax.f32 %v3602_v6, 0.0  ;;  %v10853_v31 = vpop.f32.mrb[80].mxu1  ;;  %v3564_v27 = vmul.f32 %v8763_v23, %v10769_v53  ;;  %8167 = vmatpush3.bf16.msra.mxu0 %v9287_v17 }
 0x216   : > { %v7938_v13 = vpop.f32.mrb[116].mxu0  ;;  %v10856_v47 = vpop.f32.mrb[81].mxu1  ;;  %v8771_v56 = vadd.f32 %v8770_v8, %v10803_v0  ;;  %v4713_v11 = vrot.slane %v7362_v48, 1  ;;  %v4714_v7 = vrot.slane %v10837_v43, 1  ;;  %v7593_v24 = vpack.c.bf16 %v3633_v54, %v3633_v54  ;;  %v9267_v28 = vld [vmem:[%s12137_s4 + $0x148] sm:$0xff]   ;;  %v9288_v17 = vld [vmem:[%s12137_s4 + $0x110] sm:$0xff]  }
 0x217   : > { %v7939_v2 = vpop.f32.mrb[117].mxu0  ;;  %v3804_v62 = vsel %vm9729_vm6, %v3796_v30, %v3803_v18  ;;  %v4095_v3 = vsel %vm9743_vm8, %v3805_v39, %v4094_v60  ;;  %v7594_v14 = vpack.c.bf16 %v3634_v33, %v3634_v33  ;;  %v10864_v5 = vpop.f32.mrb[82].mxu1  ;;  %v3603_v0 = vadd.f32 %v10774_v50, %v3564_v27  ;;  %v9294_v27 = vld [vmem:[%s12137_s4 + $0x118] sm:$0xff]   ;;  %8168 = vmatprep.subr.bf16.mxu0 %v9288_v17  ;;  %v4193_v41 = vld [vmem:[#allocation3 + $0x1c] sm:$0xf] }
 0x218   : > { %v7941_v49 = vpop.f32.mrb[118].mxu0  ;;  %4093 = vst [vmem:[#allocation3 + $0x28] sm:$0xf] %v3804_v62  ;;  %4096 = vst [vmem:[#allocation3 + $0x2c] sm:$0x1] %v4095_v3  ;;  %v3565_v58 = vmul.f32 %v8771_v56, %v10769_v53  ;;  %v10871_v30 = vpop.f32.mrb[83].mxu1  ;;  %v10874_v6 = vsel %vm1478_vm9, %v4713_v11, %v4714_v7  ;;  %v7940_v59 = vadd.f32 %v7939_v2, %v7938_v13 }
 0x219   : > { %12224 = vst [vmem:[#allocation20_spill] sm:$0xff] %v10874_v6  ;;  %v7942_v42 = vpop.f32.mrb[119].mxu0  ;;  %v3807_v60 = vshrl.u32 %v7593_v24, 16  ;;  %v3810_v23 = vshll.u32 %v7593_v24, 16  ;;  %v3815_v8 = vshrl.u32 %v7594_v14, 16  ;;  %v3818_v48 = vshll.u32 %v7594_v14, 16  ;;  %8597 = vmatmul.mubr.bf16.vlgmr.msra.gmra.mrb[96].mxu1 %v10874_v6 }
 0x21a   : > { %v3635_v18 = vmax.f32 %v3603_v0, 0.0  ;;  %v3604_v39 = vadd.f32 %v10774_v50, %v3565_v58  ;;  %v8758_v54 = vadd.f32 %v10665_v1, %v7940_v59  ;;  %v4435_v33 = vshrl.u32 %v10844_v20, 16  ;;  %8629 = vmatpush3.bf16.msra.mxu1 %v10761_v16  ;;  %v9289_v13 = vld [vmem:[%s12137_s4 + $0xd0] sm:$0xff]   ;;  %v4097_v16 = vld [vmem:[#allocation3 + $0x30] sm:$0xf]  ;;  %v9295_v58 = vld [vmem:[%s12137_s4 + $0xd8] sm:$0xff]  }
 0x21b   : > { %v3809_v56 = vrot.slane %v3807_v60, 7  ;;  %v3817_v11 = vrot.slane %v3815_v8, 7  ;;  %v4437_v7 = vshll.u32 %v10844_v20, 16  ;;  %v4442_v2 = vshll.u32 %v10837_v43, 16  ;;  %8630 = vmatprep.subr.bf16.mxu1 %v9267_v28  ;;  %v9271_v1 = vld [vmem:[%s12137_s4 + $0x150] sm:$0xff]   ;;  %8169 = vmatpush3.bf16.msra.mxu0 %v9289_v13 }
 0x21c   : > { %v4101_v62 = vld [vmem:[#allocation3 + $0x38] sm:$0x1]  ;;  %v7595_v3 = vpack.c.bf16 %v3635_v18, %v3635_v18  ;;  %v3636_v24 = vmax.f32 %v3604_v39, 0.0  ;;  %v8759_v14 = vadd.f32 %v8758_v54, %v10792_v19  ;;  %v7943_v0 = vadd.f32 %v7942_v42, %v7941_v49  ;;  %8170 = vmatprep.subr.bf16.mxu0 %v9294_v27 }
 0x21d   : > { %v3812_v59 = vor.u32 %v3810_v23, %v3809_v56  ;;  %v3813_v43 = vrot.slane %v3809_v56, 4  ;;  %v3820_v60 = vor.u32 %v3818_v48, %v3817_v11  ;;  %v3822_v8 = vrot.slane %v3817_v11, 4  ;;  %v10899_v6 = vpop.f32.mrb[84].mxu1  ;;  %v10901_v17 = vpop.f32.mrb[120].mxu0  ;;  %v4192_v42 = vld [vmem:[#allocation3 + $0x18] sm:$0xf] }
 0x21e   : > { %v3824_v18 = vshrl.u32 %v7595_v3, 16  ;;  %v3827_v39 = vshll.u32 %v7595_v3, 16  ;;  %v7596_v37 = vpack.c.bf16 %v3636_v24, %v3636_v24  ;;  %v3566_v19 = vmul.f32 %v8759_v14, %v10769_v53  ;;  %v10904_v49 = vpop.f32.mrb[85].mxu1  ;;  %v7945_v54 = vpop.f32.mrb[121].mxu0  ;;  %8631 = vmatpush3.bf16.msra.mxu1 %v9267_v28  ;;  %v10909_v23 = vld [vmem:[%s12137_s4 + $0x158] sm:$0xff]   ;;  %v9296_v48 = vld [vmem:[%s12137_s4 + $0x120] sm:$0xff]  }
 0x21f   : > { %v4098_v13 = vsel %vm9736_vm7, %v3812_v59, %v4097_v16  ;;  %v3821_v27 = vsel %vm9729_vm6, %v3813_v43, %v3820_v60  ;;  %v4102_v56 = vsel %vm9743_vm8, %v3822_v8, %v4101_v62  ;;  %v10920_v11 = vpop.f32.mrb[86].mxu1  ;;  %v4439_v28 = vrot.slane %v4437_v7, 1  ;;  %v10922_v3 = vld [vmem:[#allocation3 + $0x20] ss:$0 sps:$4 sm:$0x11]   ;;  %v10924_v24 = vpop.f32.mrb[122].mxu0  ;;  %8632 = vmatprep.subr.bf16.mxu1 %v9271_v1  ;;  %8171 = vmatpush3.bf16.msra.mxu0 %v9295_v58 }
 0x220   : > { %12225 = vst [vmem:[#allocation21_spill] sm:$0xff] %v10920_v11  ;;  %4099 = vst [vmem:[#allocation3 + $0x30] sm:$0xf] %v4098_v13  ;;  %v3826_v14 = vrot.slane %v3824_v18, 7  ;;  %v3832_v35 = vshrl.u32 %v7596_v37, 16  ;;  %v3835_v16 = vshll.u32 %v7596_v37, 16  ;;  %v3605_v59 = vadd.f32 %v10774_v50, %v3566_v19  ;;  %8172 = vmatprep.subr.bf16.mxu0 %v9296_v48 }
 0x221   : > { %4100 = vst [vmem:[#allocation3 + $0x34] sm:$0xf] %v3821_v27  ;;  %4103 = vst [vmem:[#allocation3 + $0x38] sm:$0x1] %v4102_v56  ;;  %v10927_v43 = vpop.f32.mrb[87].mxu1  ;;  %v10929_v60 = vpop.f32.mrb[123].mxu0  ;;  %v4440_v8 = vor.u32 %v4439_v28, %v4435_v33  ;;  %v8766_v13 = vadd.f32 %v10673_v44, %v7943_v0  ;;  %v10935_v27 = vcombine.low %v4192_v42, %v4193_v41 }
 0x222   : > { %v9297_v7 = vld [vmem:[%s12137_s4 + $0xe0] sm:$0xff]   ;;  %v4104_v62 = vld [vmem:[#allocation3 + $0x3c] sm:$0xf]  ;;  %v4444_v45 = vrot.slane %v4442_v2, 1  ;;  %v3829_v37 = vor.u32 %v3827_v39, %v3826_v14  ;;  %v3830_v18 = vrot.slane %v3826_v14, 4  ;;  %v3834_v19 = vrot.slane %v3832_v35, 7  ;;  %8633 = vmatpush3.bf16.msra.mxu1 %v9271_v1 }
 0x223   : > { %v3637_v56 = vmax.f32 %v3605_v59, 0.0  ;;  %v9302_v58 = vld [vmem:[%s12137_s4 + $0x128] sm:$0xff]   ;;  %v8767_v33 = vadd.f32 %v8766_v13, %v10799_v10  ;;  %v7363_v44 = vcombine.low %v4244_v15, %v4193_v41  ;;  %v4717_v2 = vrot.slane %v10922_v3, 1  ;;  %8634 = vmatprep.subr.bf16.mxu1 %v10909_v23  ;;  %v9279_v35 = vld [vmem:[%s12137_s4 + $0x160] sm:$0xff]   ;;  %8173 = vmatpush3.bf16.msra.mxu0 %v9297_v7  ;;  %v4194_v14 = vld [vmem:[#allocation3 + $0x24] sm:$0xf] }
 0x224   : > { %v10941_v11 = vsel %vm1189_vm2, %v4440_v8, %v4444_v45  ;;  %v4105_v1 = vsel %vm9736_vm7, %v3829_v37, %v4104_v62  ;;  %v3837_v0 = vor.u32 %v3835_v16, %v3834_v19  ;;  %v3839_v39 = vrot.slane %v3834_v19, 4  ;;  %v9303_v45 = vld [vmem:[%s12137_s4 + $0xe8] sm:$0xff]   ;;  %v4195_v16 = vld [vmem:[#allocation3 + $0x28] sm:$0xf]  ;;  %8174 = vmatprep.subr.bf16.mxu0 %v9302_v58  ;;  %v4245_v19 = vld [vmem:[#allocation3 + $0x24] sm:$0xe] }
 0x225   : > { %12226 = vst [vmem:[#allocation22_spill] sm:$0xff] %v10941_v11  ;;  %v7597_v42 = vpack.c.bf16 %v3637_v56, %v3637_v56  ;;  %5116 = vmatprep.mubr.bf16.mxu0 %v10941_v11  ;;  %4106 = vst [vmem:[#allocation3 + $0x3c] sm:$0xf] %v4105_v1  ;;  %v3567_v15 = vmul.f32 %v8767_v33, %v10769_v53  ;;  %v4716_v41 = vrot.slane %v7363_v44, 1  ;;  %v10957_v10 = vpop.f32.mrb[88].mxu1  ;;  %v4447_v28 = vshrl.u32 %v10935_v27, 16 }
 0x226   : > { %5117 = vmatmul.mubr.bf16.gmra.mrb[164].mxu0 %v10844_v20  ;;  %v7946_v48 = vadd.f32 %v7945_v54, %v10901_v17  ;;  %v7950_v59 = vpop.f32.mrb[124].mxu0  ;;  %v3838_v7 = vsel %vm9729_vm6, %v3830_v18, %v3837_v0  ;;  %v4109_v62 = vsel %vm9743_vm8, %v3839_v39, %v4108_v9  ;;  %v10965_v37 = vpop.f32.mrb[89].mxu1  ;;  %8635 = vmatpush3.bf16.msra.mxu1 %v10909_v23  ;;  %v9285_v17 = vld [vmem:[%s12137_s4 + $0x168] sm:$0xff]   ;;  %v9304_v54 = vld [vmem:[%s12137_s4 + $0x130] sm:$0xff]   ;;  %v4449_v23 = vshll.u32 %v10935_v27, 16 }
 0x227   : > { %v3841_v8 = vshrl.u32 %v7597_v42, 16  ;;  %v3844_v13 = vshll.u32 %v7597_v42, 16  ;;  %v7951_v56 = vpop.f32.mrb[125].mxu0  ;;  %4107 = vst [vmem:[#allocation3 + $0x40] sm:$0xf] %v3838_v7  ;;  %v3606_v9 = vadd.f32 %v10774_v50, %v3567_v15  ;;  %v10976_v18 = vsel %vm1478_vm9, %v4716_v41, %v4717_v2  ;;  %v10979_v33 = vpop.f32.mrb[90].mxu1  ;;  %8636 = vmatprep.subr.bf16.mxu1 %v9279_v35  ;;  %8175 = vmatpush3.bf16.msra.mxu0 %v9303_v45 }
 0x228   : > { %4110 = vst [vmem:[#allocation3 + $0x44] sm:$0x1] %v4109_v62  ;;  %12227 = vst [vmem:[#allocation10_spill] sm:$0xff] %v10976_v18  ;;  %v8778_v58 = vadd.f32 %v10685_v29, %v7946_v48  ;;  %v10982_v44 = vld [vmem:[#allocation3 + $0x2c] ss:$0 sps:$4 sm:$0x11]   ;;  %8600 = vmatprep.mubr.bf16.mxu1 %v10976_v18  ;;  %v7949_v2 = vadd.f32 %v10929_v60, %v10924_v24  ;;  %v10994_v29 = vcombine.low %v4194_v14, %v4195_v16 }
 0x229   : > { %12228 = vst [vmem:[#allocation9_spill] sm:$0xff] %v10979_v33  ;;  %v10984_v1 = vpop.f32.mrb[126].mxu0  ;;  %v10986_v0 = vrot.slane %v3841_v8, 7  ;;  %v4454_v39 = vshll.u32 %v10922_v3, 16  ;;  %v10992_v42 = vpop.f32.mrb[91].mxu1  ;;  %v9305_v41 = vld [vmem:[%s12137_s4 + $0xf0] sm:$0xff]   ;;  %v7364_v20 = vcombine.low %v4245_v19, %v4195_v16  ;;  %8176 = vmatprep.subr.bf16.mxu0 %v9304_v54  ;;  %v7952_v54 = vadd.f32 %v7951_v56, %v7950_v59 }
 0x22a   : > { %v7954_v15 = vpop.f32.mrb[127].mxu0  ;;  %v4111_v48 = vld [vmem:[#allocation3 + $0x48] sm:$0xf]  ;;  %v3638_v7 = vmax.f32 %v3606_v9, 0.0  ;;  %v8779_v62 = vadd.f32 %v8778_v58, %v10820_v32  ;;  %v4451_v8 = vrot.slane %v4449_v23, 1  ;;  %v8786_v14 = vadd.f32 %v10692_v26, %v7949_v2  ;;  %8637 = vmatpush3.bf16.msra.mxu1 %v9279_v35  ;;  %v9307_v32 = vld [vmem:[%s12137_s4 + $0x138] sm:$0xff]  }
 0x22b   : > { %v3846_v3 = vor.u32 %v3844_v13, %v10986_v0  ;;  %v4456_v60 = vrot.slane %v4454_v39, 1  ;;  %v4719_v33 = vrot.slane %v7364_v20, 1  ;;  %8638 = vmatprep.subr.bf16.mxu1 %v9285_v17  ;;  %v4720_v19 = vrot.slane %v10982_v44, 1  ;;  %v11011_v26 = vld [vmem:[#allocation3 + $0x34] sm:$0xf]  ;;  %v9293_v35 = vld [vmem:[%s12137_s4 + $0x170] sm:$0xff]   ;;  %8177 = vmatpush3.bf16.msra.mxu0 %v9305_v41 }
 0x22c   : > { %v7598_v45 = vpack.c.bf16 %v3638_v7, %v3638_v7  ;;  %v3568_v11 = vmul.f32 %v8779_v62, %v10769_v53  ;;  %v4452_v18 = vor.u32 %v4451_v8, %v4447_v28  ;;  %v8787_v13 = vadd.f32 %v8786_v14, %v10826_v57  ;;  %8178 = vmatprep.subr.bf16.mxu0 %v9307_v32  ;;  %v9309_v59 = vld [vmem:[%s12137_s4 + $0xf8] sm:$0xff]   ;;  %v4196_v41 = vld [vmem:[#allocation3 + $0x30] sm:$0xf]  ;;  %v11055_v24 = vld [vmem:[#allocation3 + $0x38] ss:$0 sps:$4 sm:$0x11]  }
 0x22d   : > { %v4112_v16 = vsel %vm9736_vm7, %v3846_v3, %v4111_v48  ;;  %v11020_v23 = vpop.f32.mrb[92].mxu1  ;;  %v7956_v57 = vpop.f32.mrb[128].mxu0  ;;  %v11028_v39 = vsel %vm1478_vm9, %v4719_v33, %v4720_v19  ;;  %v9301_v7 = vld [vmem:[%s12137_s4 + $0x178] sm:$0xff]   ;;  %v4466_v3 = vshll.u32 %v10982_v44, 16  ;;  %v4115_v14 = vld [vmem:[#allocation3 + $0x50] sm:$0x1]  ;;  %v7955_v32 = vadd.f32 %v7954_v15, %v10984_v1 }
 0x22e   : > { %4113 = vst [vmem:[#allocation3 + $0x48] sm:$0xf] %v4112_v16  ;;  %v3849_v20 = vshrl.u32 %v7598_v45, 16  ;;  %v3852_v28 = vshll.u32 %v7598_v45, 16  ;;  %v3607_v9 = vadd.f32 %v10774_v50, %v3568_v11  ;;  %v11018_v58 = vsel %vm1189_vm2, %v4452_v18, %v4456_v60  ;;  %v11031_v2 = vpop.f32.mrb[93].mxu1  ;;  %v7957_v48 = vpop.f32.mrb[129].mxu0  ;;  %8639 = vmatpush3.bf16.msra.mxu1 %v9285_v17 }
 0x22f   : > { %5124 = vmatprep.mubr.bf16.mxu0 %v11018_v58  ;;  %v3569_v56 = vmul.f32 %v8787_v13, %v10769_v53  ;;  %v8774_v11 = vadd.f32 %v10681_v36, %v7952_v54  ;;  %v4459_v18 = vshrl.u32 %v10994_v29, 16  ;;  %8601 = vmatmul.mubr.bf16.gmra.mrb[100].mxu1 %v11028_v39  ;;  %v11039_v33 = vpop.f32.mrb[94].mxu1  ;;  %v4461_v36 = vshll.u32 %v10994_v29, 16  ;;  %v11043_v60 = vpop.f32.mrb[130].mxu0 }
 0x230   : > { %v3851_v62 = vrot.slane %v3849_v20, 7  ;;  %v3639_v8 = vmax.f32 %v3607_v9, 0.0  ;;  %5125 = vmatmul.mubr.bf16.gmra.mrb[168].mxu0 %v10935_v27  ;;  %v11048_v16 = vpop.f32.mrb[95].mxu1  ;;  %v11051_v13 = vcombine.low %v4196_v41, %v11011_v26  ;;  %v11053_v19 = vpop.f32.mrb[131].mxu0  ;;  %8640 = vmatprep.subr.bf16.mxu1 %v9293_v35  ;;  %v8782_v1 = vadd.f32 %v10689_v21, %v7955_v32 }
 0x231   : > { %v3608_v17 = vadd.f32 %v10774_v50, %v3569_v56  ;;  %v8775_v45 = vadd.f32 %v8774_v11, %v10812_v52  ;;  %v4463_v9 = vrot.slane %v4461_v36, 1  ;;  %8179 = vmatpush3.bf16.msra.mxu0 %v9309_v59  ;;  %v4468_v11 = vrot.slane %v4466_v3, 1  ;;  %v9306_v59 = vld [vmem:[%s12137_s4 + $0x1c0] sm:$0xff]   ;;  %v4246_v3 = vld [vmem:[#allocation3 + $0x30] sm:$0xe] }
 0x232   : > { %v3854_v54 = vor.u32 %v3852_v28, %v3851_v62  ;;  %v3856_v20 = vrot.slane %v3851_v62, 4  ;;  %v7599_v44 = vpack.c.bf16 %v3639_v8, %v3639_v8  ;;  %8641 = vmatpush3.bf16.msra.mxu1 %v9293_v35  ;;  %v12229_v15 = vrot.slane %v10986_v0, 4 }
 0x233   : > { %v3640_v56 = vmax.f32 %v3608_v17, 0.0  ;;  %v3570_v52 = vmul.f32 %v8775_v45, %v10769_v53  ;;  %8642 = vmatprep.subr.bf16.mxu1 %v9301_v7  ;;  %v4464_v35 = vor.u32 %v4463_v9, %v4459_v18  ;;  %v8783_v0 = vadd.f32 %v8782_v1, %v10823_v22 }
 0x234   : > { %v3855_v41 = vsel %vm9729_vm6, %v12229_v15, %v3854_v54  ;;  %v4116_v28 = vsel %vm9743_vm8, %v3856_v20, %v4115_v14  ;;  %v3858_v62 = vshrl.u32 %v7599_v44, 16  ;;  %v3861_v8 = vshll.u32 %v7599_v44, 16  ;;  %v4118_v20 = vld [vmem:[#allocation3 + $0x54] sm:$0xf] }
 0x235   : > { %4114 = vst [vmem:[#allocation3 + $0x4c] sm:$0xf] %v3855_v41  ;;  %4117 = vst [vmem:[#allocation3 + $0x50] sm:$0x1] %v4116_v28  ;;  %v7600_v36 = vpack.c.bf16 %v3640_v56, %v3640_v56  ;;  %v3609_v21 = vadd.f32 %v10774_v50, %v3570_v52  ;;  %v7365_v45 = vcombine.low %v4246_v3, %v11011_v26  ;;  %v4723_v14 = vrot.slane %v11055_v24, 1  ;;  %v11072_v54 = vpop.f32.mrb[132].mxu0 }
 0x236   : > { %v3860_v17 = vrot.slane %v3858_v62, 7  ;;  %v7958_v32 = vadd.f32 %v7957_v48, %v7956_v57  ;;  %v11075_v56 = vsel %vm1189_vm2, %v4464_v35, %v4468_v11  ;;  %v11077_v52 = vpop.f32.mrb[133].mxu0  ;;  %8643 = vmatpush3.bf16.msra.mxu1 %v9301_v7  ;;  %v3571_v26 = vmul.f32 %v8783_v0, %v10769_v53 }
 0x237   : > { %v3866_v44 = vshrl.u32 %v7600_v36, 16  ;;  %v3869_v15 = vshll.u32 %v7600_v36, 16  ;;  %v3641_v41 = vmax.f32 %v3609_v21, 0.0  ;;  %5132 = vmatprep.mubr.bf16.mxu0 %v11075_v56  ;;  %v4722_v9 = vrot.slane %v7365_v45, 1  ;;  %v11081_v57 = vpop.f32.mrb[134].mxu0  ;;  %8300 = vmatprep.subr.bf16.mxu1 %v9306_v59 }
 0x238   : > { %v3863_v22 = vor.u32 %v3861_v8, %v3860_v17  ;;  %v3864_v18 = vrot.slane %v3860_v17, 4  ;;  %5133 = vmatmul.mubr.bf16.gmra.mrb[172].mxu0 %v10994_v29  ;;  %v8794_v11 = vadd.f32 %v10701_v25, %v7958_v32  ;;  %v4471_v28 = vshrl.u32 %v11051_v13, 16  ;;  %v11086_v62 = vpop.f32.mrb[135].mxu0  ;;  %v4122_v8 = vld [vmem:[#allocation3 + $0x5c] sm:$0x1] }
 0x239   : > { %v3868_v48 = vrot.slane %v3866_v44, 7  ;;  %v7601_v1 = vpack.c.bf16 %v3641_v41, %v3641_v41  ;;  %v3610_v36 = vadd.f32 %v10774_v50, %v3571_v26  ;;  %v11092_v21 = vsel %vm1478_vm9, %v4722_v9, %v4723_v14  ;;  %v4199_v44 = vld [vmem:[#allocation3 + $0x40] sm:$0xf]  ;;  %v9252_v26 = vld [vmem:[#allocation3 + $0x44] ss:$0 sps:$4 sm:$0x11]  }
 0x23a   : > { %v4119_v7 = vsel %vm9736_vm7, %v3863_v22, %v4118_v20  ;;  %v4473_v59 = vshll.u32 %v11051_v13, 16  ;;  %8604 = vmatprep.mubr.bf16.mxu1 %v11092_v21  ;;  %v8795_v45 = vadd.f32 %v8794_v11, %v10856_v47  ;;  %v4478_v20 = vshll.u32 %v11055_v24, 16  ;;  %v4125_v9 = vld [vmem:[#allocation3 + $0x60] sm:$0xf]  ;;  %v4198_v11 = vld [vmem:[#allocation3 + $0x3c] sm:$0xf] }
 0x23b   : > { %4120 = vst [vmem:[#allocation3 + $0x54] sm:$0xf] %v4119_v7  ;;  %v3871_v35 = vor.u32 %v3869_v15, %v3868_v48  ;;  %v3873_v0 = vrot.slane %v3868_v48, 4  ;;  %v3875_v3 = vshrl.u32 %v7601_v1, 16  ;;  %v3878_v25 = vshll.u32 %v7601_v1, 16 }
 0x23c   : > { %v3642_v17 = vmax.f32 %v3610_v36, 0.0  ;;  %v4475_v32 = vrot.slane %v4473_v59, 1  ;;  %v7961_v15 = vadd.f32 %v11053_v19, %v11043_v60  ;;  %v3572_v47 = vmul.f32 %v8795_v45, %v10769_v53 }
 0x23d   : > { %v3872_v14 = vsel %vm9729_vm6, %v3864_v18, %v3871_v35  ;;  %v4123_v41 = vsel %vm9743_vm8, %v3873_v0, %v4122_v8  ;;  %v3877_v22 = vrot.slane %v3875_v3, 7  ;;  %v4480_v24 = vrot.slane %v4478_v20, 1  ;;  %v11105_v7 = vpop.f32.mrb[136].mxu0 }
 0x23e   : > { %4121 = vst [vmem:[#allocation3 + $0x58] sm:$0xf] %v3872_v14  ;;  %4124 = vst [vmem:[#allocation3 + $0x5c] sm:$0x1] %v4123_v41  ;;  %v7602_v48 = vpack.c.bf16 %v3642_v17, %v3642_v17  ;;  %v4476_v1 = vor.u32 %v4475_v32, %v4471_v28  ;;  %v8802_v8 = vadd.f32 %v10708_v34, %v7961_v15  ;;  %v11110_v35 = vpop.f32.mrb[137].mxu0  ;;  %v4726_v32 = vrot.slane %v9252_v26, 1 }
 0x23f   : > { %v3880_v18 = vor.u32 %v3878_v25, %v3877_v22  ;;  %v3881_v36 = vrot.slane %v3877_v22, 4  ;;  %v11108_v59 = vcombine.low %v4198_v11, %v4199_v44  ;;  %v3611_v0 = vadd.f32 %v10774_v50, %v3572_v47  ;;  %v4247_v28 = vld [vmem:[#allocation3 + $0x3c] sm:$0xe]  ;;  %v11116_v17 = vpop.f32.mrb[138].mxu0 }
 0x240   : > { %v3883_v60 = vshrl.u32 %v7602_v48, 16  ;;  %v3886_v19 = vshll.u32 %v7602_v48, 16  ;;  %v11114_v3 = vsel %vm1189_vm2, %v4476_v1, %v4480_v24  ;;  %v8803_v34 = vadd.f32 %v8802_v8, %v10871_v30  ;;  %v11122_v20 = vpop.f32.mrb[139].mxu0  ;;  %v4129_v48 = vld [vmem:[#allocation3 + $0x68] sm:$0x1] }
 0x241   : > { %v4126_v25 = vsel %vm9736_vm7, %v3880_v18, %v4125_v9  ;;  %5140 = vmatprep.mubr.bf16.mxu0 %v11114_v3  ;;  %v7366_v45 = vcombine.low %v4247_v28, %v4199_v44  ;;  %v3643_v41 = vmax.f32 %v3611_v0, 0.0  ;;  %v7964_v22 = vadd.f32 %v11077_v52, %v11072_v54  ;;  %v11131_v8 = vld [vmem:[#allocation3 + $0x50] ss:$0 sps:$4 sm:$0x11]   ;;  %v4201_v28 = vld [vmem:[#allocation3 + $0x4c] sm:$0xf] }
 0x242   : > { %4127 = vst [vmem:[#allocation3 + $0x60] sm:$0xf] %v4126_v25  ;;  %v3885_v14 = vrot.slane %v3883_v60, 7  ;;  %5141 = vmatmul.mubr.bf16.gmra.mrb[176].mxu0 %v11051_v13  ;;  %v4483_v15 = vshrl.u32 %v11108_v59, 16  ;;  %v3573_v9 = vmul.f32 %v8803_v34, %v10769_v53  ;;  %v4485_v30 = vshll.u32 %v11108_v59, 16 }
 0x243   : > { %v4725_v47 = vrot.slane %v7366_v45, 1  ;;  %v4490_v44 = vshll.u32 %v9252_v26, 16  ;;  %v7603_v11 = vpack.c.bf16 %v3643_v41, %v3643_v41  ;;  %v8790_v18 = vadd.f32 %v10697_v38, %v7964_v22  ;;  %v4200_v41 = vld [vmem:[#allocation3 + $0x48] sm:$0xf] }
 0x244   : > { %v3888_v1 = vor.u32 %v3886_v19, %v3885_v14  ;;  %v3890_v24 = vrot.slane %v3885_v14, 4  ;;  %v3612_v60 = vadd.f32 %v10774_v50, %v3573_v9  ;;  %v4487_v52 = vrot.slane %v4485_v30, 1 }
 0x245   : > { %v11135_v54 = vsel %vm1478_vm9, %v4725_v47, %v4726_v32  ;;  %v4492_v0 = vrot.slane %v4490_v44, 1  ;;  %v3892_v19 = vshrl.u32 %v7603_v11, 16  ;;  %v3895_v34 = vshll.u32 %v7603_v11, 16  ;;  %v11142_v38 = vpop.f32.mrb[140].mxu0 }
 0x246   : > { %v3889_v25 = vsel %vm9729_vm6, %v3881_v36, %v3888_v1  ;;  %v4130_v26 = vsel %vm9743_vm8, %v3890_v24, %v4129_v48  ;;  %8605 = vmatmul.mubr.bf16.gmra.mrb[104].mxu1 %v11135_v54  ;;  %v3644_v50 = vmax.f32 %v3612_v60, 0.0  ;;  %v8791_v45 = vadd.f32 %v8790_v18, %v10853_v31  ;;  %v4248_v36 = vld [vmem:[#allocation3 + $0x48] sm:$0xe]  ;;  %v11147_v22 = vpop.f32.mrb[141].mxu0  ;;  %v4132_v1 = vld [vmem:[#allocation3 + $0x6c] sm:$0xf] }
 0x247   : > { %4128 = vst [vmem:[#allocation3 + $0x64] sm:$0xf] %v3889_v25  ;;  %4131 = vst [vmem:[#allocation3 + $0x68] sm:$0x1] %v4130_v26  ;;  %v4488_v32 = vor.u32 %v4487_v52, %v4483_v15  ;;  %v7967_v14 = vadd.f32 %v11086_v62, %v11081_v57  ;;  %v3894_v48 = vrot.slane %v3892_v19, 7  ;;  %v11149_v9 = vcombine.low %v4200_v41, %v4201_v28  ;;  %v11152_v44 = vpop.f32.mrb[142].mxu0 }
 0x248   : > { %v7367_v47 = vcombine.low %v4248_v36, %v4201_v28  ;;  %v4729_v30 = vrot.slane %v11131_v8, 1  ;;  %v7604_v24 = vpack.c.bf16 %v3644_v50, %v3644_v50  ;;  %v3574_v31 = vmul.f32 %v8791_v45, %v10769_v53  ;;  %v11159_v62 = vpop.f32.mrb[143].mxu0  ;;  %v11167_v53 = vld [vmem:[%s12136_s3] ss:$0 sm:$0xff]  ;;  %v4203_v26 = vld [vmem:[#allocation3 + $0x58] sm:$0xf] }
 0x249   : > { %12230 = vst [vmem:[#allocation11_spill] sm:$0xff] %v11149_v9  ;;  %v11156_v15 = vsel %vm1189_vm2, %v4488_v32, %v4492_v0  ;;  %v8798_v57 = vadd.f32 %v10705_v63, %v7967_v14  ;;  %v3897_v11 = vor.u32 %v3895_v34, %v3894_v48  ;;  %v3898_v18 = vrot.slane %v3894_v48, 4  ;;  %v4202_v41 = vld [vmem:[#allocation3 + $0x54] sm:$0xf] }
 0x24a   : > { %5148 = vmatprep.mubr.bf16.mxu0 %v11156_v15  ;;  %v4728_v60 = vrot.slane %v7367_v47, 1  ;;  %v7970_v52 = vadd.f32 %v11110_v35, %v11105_v7  ;;  %v3900_v28 = vshrl.u32 %v7604_v24, 16  ;;  %v3903_v25 = vshll.u32 %v7604_v24, 16  ;;  %v4136_v36 = vld [vmem:[#allocation3 + $0x74] sm:$0x1] }
 0x24b   : > { %v3613_v0 = vadd.f32 %v11167_v53, %v3574_v31  ;;  %v8799_v63 = vadd.f32 %v8798_v57, %v10864_v5  ;;  %5149 = vmatmul.mubr.bf16.gmra.mrb[180].mxu0 %v11108_v59  ;;  %v4133_v19 = vsel %vm9736_vm7, %v3897_v11, %v4132_v1  ;;  %v4495_v35 = vshrl.u32 %v11149_v9, 16  ;;  %v11182_v5 = vld [vmem:[%s12135_s2] ss:$0 sm:$0xff] }
 0x24c   : > { %v11175_v34 = vsel %vm1478_vm9, %v4728_v60, %v4729_v30  ;;  %v8810_v7 = vadd.f32 %v10717_v46, %v7970_v52  ;;  %4134 = vst [vmem:[#allocation3 + $0x6c] sm:$0xf] %v4133_v19  ;;  %v3902_v50 = vrot.slane %v3900_v28, 7  ;;  %v4497_v14 = vshll.u32 %v11149_v9, 16 }
 0x24d   : > { %v3645_v45 = vmax.f32 %v3613_v0, 0.0  ;;  %v3575_v32 = vmul.f32 %v11182_v5, %v8799_v63  ;;  %8608 = vmatprep.mubr.bf16.mxu1 %v11175_v34  ;;  %v4502_v48 = vshll.u32 %v11131_v8, 16  ;;  %v7973_v47 = vadd.f32 %v11122_v20, %v11116_v17  ;;  %v11193_v1 = vpop.f32.mrb[144].mxu0  ;;  %v11196_v60 = vld [vmem:[#allocation3 + $0x5c] ss:$0 sps:$4 sm:$0x11]  }
 0x24e   : > { %v8811_v46 = vadd.f32 %v8810_v7, %v10904_v49  ;;  %v11191_v30 = vcombine.low %v4202_v41, %v4203_v26  ;;  %v3905_v24 = vor.u32 %v3903_v25, %v3902_v50  ;;  %v3907_v31 = vrot.slane %v3902_v50, 4  ;;  %v11198_v52 = vpop.f32.mrb[145].mxu0 }
 0x24f   : > { %v7605_v57 = vpack.c.bf16 %v3645_v45, %v3645_v45  ;;  %v3614_v11 = vadd.f32 %v11167_v53, %v3575_v32  ;;  %v4499_v28 = vrot.slane %v4497_v14, 1  ;;  %v4504_v8 = vrot.slane %v4502_v48, 1  ;;  %v11202_v17 = vpop.f32.mrb[146].mxu0  ;;  %v4249_v14 = vld [vmem:[#allocation3 + $0x54] sm:$0xe] }
 0x250   : > { %12231 = vst [vmem:[#allocation24_spill] sm:$0xff] %v11191_v30  ;;  %v3576_v49 = vmul.f32 %v11182_v5, %v8811_v46  ;;  %v8818_v0 = vadd.f32 %v10724_v40, %v7973_v47  ;;  %v3906_v20 = vsel %vm9729_vm6, %v3898_v18, %v3905_v24  ;;  %v4137_v25 = vsel %vm9743_vm8, %v3907_v31, %v4136_v36  ;;  %v11208_v7 = vpop.f32.mrb[147].mxu0  ;;  %v4139_v48 = vld [vmem:[#allocation3 + $0x78] sm:$0xf] }
 0x251   : > { %v3909_v63 = vshrl.u32 %v7605_v57, 16  ;;  %v3912_v19 = vshll.u32 %v7605_v57, 16  ;;  %4135 = vst [vmem:[#allocation3 + $0x70] sm:$0xf] %v3906_v20  ;;  %4138 = vst [vmem:[#allocation3 + $0x74] sm:$0x1] %v4137_v25  ;;  %v4500_v32 = vor.u32 %v4499_v28, %v4495_v35  ;;  %v7368_v46 = vcombine.low %v4249_v14, %v4203_v26 }
 0x252   : > { %v3646_v50 = vmax.f32 %v3614_v11, 0.0  ;;  %v3615_v45 = vadd.f32 %v11167_v53, %v3576_v49  ;;  %v8819_v40 = vadd.f32 %v8818_v0, %v10927_v43  ;;  %v4732_v18 = vrot.slane %v11196_v60, 1  ;;  %v4143_v20 = vld [vmem:[#allocation3 + $0x80] sm:$0x1] }
 0x253   : > { %v3911_v41 = vrot.slane %v3909_v63, 7  ;;  %v7976_v36 = vadd.f32 %v11147_v22, %v11142_v38  ;;  %v11216_v31 = vsel %vm1189_vm2, %v4500_v32, %v4504_v8  ;;  %v4731_v43 = vrot.slane %v7368_v46, 1 }
 0x254   : > { %v7606_v47 = vpack.c.bf16 %v3646_v50, %v3646_v50  ;;  %v3647_v24 = vmax.f32 %v3615_v45, 0.0  ;;  %v3577_v57 = vmul.f32 %v11182_v5, %v8819_v40  ;;  %5156 = vmatprep.mubr.bf16.mxu0 %v11216_v31 }
 0x255   : > { %v3914_v11 = vor.u32 %v3912_v19, %v3911_v41  ;;  %v3915_v35 = vrot.slane %v3911_v41, 4  ;;  %v8806_v26 = vadd.f32 %v10713_v4, %v7976_v36  ;;  %5157 = vmatmul.mubr.bf16.gmra.mrb[184].mxu0 %v11149_v9  ;;  %v11223_v22 = vpop.f32.mrb[148].mxu0  ;;  %v11228_v25 = vsel %vm1478_vm9, %v4731_v43, %v4732_v18  ;;  %v4146_v41 = vld [vmem:[#allocation3 + $0x84] sm:$0xf] }
 0x256   : > { %v3917_v49 = vshrl.u32 %v7606_v47, 16  ;;  %v3920_v28 = vshll.u32 %v7606_v47, 16  ;;  %v7607_v0 = vpack.c.bf16 %v3647_v24, %v3647_v24  ;;  %v3616_v38 = vadd.f32 %v11167_v53, %v3577_v57  ;;  %v11232_v19 = vpop.f32.mrb[149].mxu0  ;;  %8609 = vmatmul.mubr.bf16.gmra.mrb[108].mxu1 %v11228_v25 }
 0x257   : > { %v4140_v8 = vsel %vm9736_vm7, %v3914_v11, %v4139_v48  ;;  %v8807_v63 = vadd.f32 %v8806_v26, %v10899_v6  ;;  %v4507_v4 = vshrl.u32 %v11191_v30, 16  ;;  %v11235_v14 = vpop.f32.mrb[150].mxu0  ;;  %v4509_v18 = vshll.u32 %v11191_v30, 16  ;;  %v4205_v11 = vld [vmem:[#allocation3 + $0x64] sm:$0xf] }
 0x258   : > { %4141 = vst [vmem:[#allocation3 + $0x78] sm:$0xf] %v4140_v8  ;;  %v3919_v50 = vrot.slane %v3917_v49, 7  ;;  %v3926_v45 = vshrl.u32 %v7607_v0, 16  ;;  %v3929_v32 = vshll.u32 %v7607_v0, 16  ;;  %v3648_v40 = vmax.f32 %v3616_v38, 0.0 }
 0x259   : > { %v3578_v46 = vmul.f32 %v11182_v5, %v8807_v63  ;;  %v4514_v6 = vshll.u32 %v11196_v60, 16  ;;  %v7979_v36 = vadd.f32 %v11159_v62, %v11152_v44  ;;  %v11242_v43 = vpop.f32.mrb[151].mxu0  ;;  %v4511_v49 = vrot.slane %v4509_v18, 1  ;;  %v9261_v8 = vld [vmem:[#allocation3 + $0x68] ss:$0 sps:$4 sm:$0x11]  }
 0x25a   : > { %v3922_v48 = vor.u32 %v3920_v28, %v3919_v50  ;;  %v3924_v47 = vrot.slane %v3919_v50, 4  ;;  %v3928_v24 = vrot.slane %v3926_v45, 7  ;;  %v7608_v57 = vpack.c.bf16 %v3648_v40, %v3648_v40  ;;  %v4204_v63 = vld [vmem:[#allocation3 + $0x60] sm:$0xf] }
 0x25b   : > { %v3617_v26 = vadd.f32 %v11167_v53, %v3578_v46  ;;  %v4516_v0 = vrot.slane %v4514_v6, 1  ;;  %v8814_v38 = vadd.f32 %v10721_v61, %v7979_v36  ;;  %v4512_v46 = vor.u32 %v4511_v49, %v4507_v4  ;;  %v4250_v18 = vld [vmem:[#allocation3 + $0x60] sm:$0xe]  ;;  %v12232_v6 = vld [vmem:[#allocation21_spill] sm:$0xff] }
 0x25c   : > { %v3923_v60 = vsel %vm9729_vm6, %v3915_v35, %v3922_v48  ;;  %v4144_v44 = vsel %vm9743_vm8, %v3924_v47, %v4143_v20  ;;  %v3931_v62 = vor.u32 %v3929_v32, %v3928_v24  ;;  %v3932_v28 = vrot.slane %v3928_v24, 4 }
 0x25d   : > { %4142 = vst [vmem:[#allocation3 + $0x7c] sm:$0xf] %v3923_v60  ;;  %4145 = vst [vmem:[#allocation3 + $0x80] sm:$0x1] %v4144_v44  ;;  %v3934_v50 = vshrl.u32 %v7608_v57, 16  ;;  %v3937_v45 = vshll.u32 %v7608_v57, 16  ;;  %v8815_v36 = vadd.f32 %v8814_v38, %v12232_v6  ;;  %v11253_v9 = vcombine.low %v4204_v63, %v4205_v11 }
 0x25e   : > { %v3649_v40 = vmax.f32 %v3617_v26, 0.0  ;;  %v4147_v61 = vsel %vm9736_vm7, %v3931_v62, %v4146_v41  ;;  %v7369_v35 = vcombine.low %v4250_v18, %v4205_v11  ;;  %v11255_v48 = vpop.f32.mrb[152].mxu0  ;;  %v11258_v47 = vsel %vm1189_vm2, %v4512_v46, %v4516_v0  ;;  %v4150_v57 = vld [vmem:[#allocation3 + $0x8c] sm:$0x1]  ;;  %v4153_v63 = vld [vmem:[#allocation3 + $0x90] sm:$0xf] }
 0x25f   : > { %12233 = vst [vmem:[#allocation21_spill] sm:$0xff] %v11253_v9  ;;  %4148 = vst [vmem:[#allocation3 + $0x84] sm:$0xf] %v4147_v61  ;;  %v3936_v20 = vrot.slane %v3934_v50, 7  ;;  %v4735_v24 = vrot.slane %v9261_v8, 1  ;;  %5164 = vmatprep.mubr.bf16.mxu0 %v11258_v47  ;;  %v3579_v4 = vmul.f32 %v11182_v5, %v8815_v36  ;;  %v7982_v26 = vadd.f32 %v11198_v52, %v11193_v1  ;;  %v11265_v49 = vpop.f32.mrb[153].mxu0 }
 0x260   : > { %v7609_v32 = vpack.c.bf16 %v3649_v40, %v3649_v40  ;;  %v4734_v41 = vrot.slane %v7369_v35, 1  ;;  %v4519_v11 = vshrl.u32 %v11253_v9, 16  ;;  %5165 = vmatmul.mubr.bf16.gmra.mrb[188].mxu0 %v11191_v30  ;;  %v11268_v0 = vpop.f32.mrb[154].mxu0  ;;  %v12234_v46 = vld [vmem:[#allocation14_spill] sm:$0xff]  ;;  %v4521_v52 = vshll.u32 %v11253_v9, 16 }
 0x261   : > { %v3939_v38 = vor.u32 %v3937_v45, %v3936_v20  ;;  %v3941_v60 = vrot.slane %v3936_v20, 4  ;;  %v3618_v50 = vadd.f32 %v11167_v53, %v3579_v4  ;;  %v8826_v1 = vadd.f32 %v12234_v46, %v7982_v26  ;;  %v4207_v18 = vld [vmem:[#allocation3 + $0x70] sm:$0xf]  ;;  %v11276_v61 = vpop.f32.mrb[155].mxu0  ;;  %v4206_v26 = vld [vmem:[#allocation3 + $0x6c] sm:$0xf] }
 0x262   : > { %v3943_v44 = vshrl.u32 %v7609_v32, 16  ;;  %v3946_v62 = vshll.u32 %v7609_v32, 16  ;;  %v11272_v40 = vsel %vm1478_vm9, %v4734_v41, %v4735_v24  ;;  %v4526_v35 = vshll.u32 %v9261_v8, 16  ;;  %v9265_v20 = vld [vmem:[#allocation3 + $0x74] ss:$0 sps:$4 sm:$0x11]  }
 0x263   : > { %v3940_v45 = vsel %vm9729_vm6, %v3932_v28, %v3939_v38  ;;  %v4151_v6 = vsel %vm9743_vm8, %v3941_v60, %v4150_v57  ;;  %8612 = vmatprep.mubr.bf16.mxu1 %v11272_v40  ;;  %v3650_v32 = vmax.f32 %v3618_v50, 0.0  ;;  %v8827_v24 = vadd.f32 %v8826_v1, %v10965_v37 }
 0x264   : > { %v3945_v36 = vrot.slane %v3943_v44, 7  ;;  %4149 = vst [vmem:[#allocation3 + $0x88] sm:$0xf] %v3940_v45  ;;  %4152 = vst [vmem:[#allocation3 + $0x8c] sm:$0x1] %v4151_v6  ;;  %v4523_v4 = vrot.slane %v4521_v52, 1  ;;  %v7985_v41 = vadd.f32 %v11208_v7, %v11202_v17  ;;  %v11286_v30 = vcombine.low %v4206_v26, %v4207_v18 }
 0x265   : > { %v4528_v38 = vrot.slane %v4526_v35, 1  ;;  %v7610_v57 = vpack.c.bf16 %v3650_v32, %v3650_v32  ;;  %v3580_v60 = vmul.f32 %v11182_v5, %v8827_v24  ;;  %v12235_v44 = vld [vmem:[#allocation13_spill] sm:$0xff]  ;;  %v4251_v6 = vld [vmem:[#allocation3 + $0x6c] sm:$0xe]  ;;  %v11290_v50 = vpop.f32.mrb[156].mxu0  ;;  %v4738_v17 = vrot.slane %v9265_v20, 1 }
 0x266   : > { %v3948_v46 = vor.u32 %v3946_v62, %v3945_v36  ;;  %v3949_v28 = vrot.slane %v3945_v36, 4  ;;  %v4524_v8 = vor.u32 %v4523_v4, %v4519_v11  ;;  %v8834_v45 = vadd.f32 %v12235_v44, %v7985_v41  ;;  %v11296_v62 = vpop.f32.mrb[157].mxu0  ;;  %v12236_v24 = vld [vmem:[#allocation17_spill] sm:$0xff] }
 0x267   : > { %v7370_v1 = vcombine.low %v4251_v6, %v4207_v18  ;;  %v7988_v7 = vadd.f32 %v11232_v19, %v11223_v22  ;;  %v3951_v52 = vshrl.u32 %v7610_v57, 16  ;;  %v3954_v36 = vshll.u32 %v7610_v57, 16  ;;  %v11302_v32 = vpop.f32.mrb[158].mxu0  ;;  %v4157_v57 = vld [vmem:[#allocation3 + $0x98] sm:$0x1] }
 0x268   : > { %v4154_v37 = vsel %vm9736_vm7, %v3948_v46, %v4153_v63  ;;  %v3619_v11 = vadd.f32 %v11167_v53, %v3580_v60  ;;  %v11300_v35 = vsel %vm1189_vm2, %v4524_v8, %v4528_v38  ;;  %v8835_v63 = vadd.f32 %v8834_v45, %v10992_v42  ;;  %v11308_v19 = vpop.f32.mrb[159].mxu0 }
 0x269   : > { %4155 = vst [vmem:[#allocation3 + $0x90] sm:$0xf] %v4154_v37  ;;  %5172 = vmatprep.mubr.bf16.mxu0 %v11300_v35  ;;  %v4737_v18 = vrot.slane %v7370_v1, 1  ;;  %v8822_v4 = vadd.f32 %v12236_v24, %v7988_v7  ;;  %v4531_v22 = vshrl.u32 %v11286_v30, 16  ;;  %v3953_v41 = vrot.slane %v3951_v52, 7 }
 0x26a   : > { %v3651_v26 = vmax.f32 %v3619_v11, 0.0  ;;  %5173 = vmatmul.mubr.bf16.gmra.mrb[192].mxu0 %v11253_v9  ;;  %v4533_v46 = vshll.u32 %v11286_v30, 16  ;;  %v4538_v38 = vshll.u32 %v9265_v20, 16  ;;  %v3581_v60 = vmul.f32 %v11182_v5, %v8835_v63  ;;  %v9269_v7 = vld [vmem:[#allocation3 + $0x80] ss:$0 sps:$4 sm:$0x11]  }
 0x26b   : > { %v11314_v8 = vsel %vm1478_vm9, %v4737_v18, %v4738_v17  ;;  %v8823_v42 = vadd.f32 %v8822_v4, %v10957_v10  ;;  %v7991_v44 = vadd.f32 %v11242_v43, %v11235_v14  ;;  %v3956_v45 = vor.u32 %v3954_v36, %v3953_v41  ;;  %v12237_v63 = vld [vmem:[#allocation12_spill] sm:$0xff]  ;;  %v4209_v18 = vld [vmem:[#allocation3 + $0x7c] sm:$0xf] }
 0x26c   : > { %v3958_v6 = vrot.slane %v3953_v41, 4  ;;  %v7611_v37 = vpack.c.bf16 %v3651_v26, %v3651_v26  ;;  %8613 = vmatmul.mubr.bf16.gmra.mrb[112].mxu1 %v11314_v8  ;;  %v4535_v1 = vrot.slane %v4533_v46, 1  ;;  %v3620_v20 = vadd.f32 %v11167_v53, %v3581_v60  ;;  %v12238_v26 = vld [vmem:[#allocation9_spill] sm:$0xff] }
 0x26d   : > { %v3582_v52 = vmul.f32 %v11182_v5, %v8823_v42  ;;  %v4540_v11 = vrot.slane %v4538_v38, 1  ;;  %v8830_v17 = vadd.f32 %v12237_v63, %v7991_v44  ;;  %v3957_v10 = vsel %vm9729_vm6, %v3949_v28, %v3956_v45  ;;  %v4208_v38 = vld [vmem:[#allocation3 + $0x78] sm:$0xf]  ;;  %v4160_v45 = vld [vmem:[#allocation3 + $0x9c] sm:$0xf] }
 0x26e   : > { %v4158_v14 = vsel %vm9743_vm8, %v3958_v6, %v4157_v57  ;;  %v3960_v43 = vshrl.u32 %v7611_v37, 16  ;;  %v3963_v36 = vshll.u32 %v7611_v37, 16  ;;  %4156 = vst [vmem:[#allocation3 + $0x94] sm:$0xf] %v3957_v10  ;;  %v3652_v24 = vmax.f32 %v3620_v20, 0.0 }
 0x26f   : > { %4159 = vst [vmem:[#allocation3 + $0x98] sm:$0x1] %v4158_v14  ;;  %v3621_v4 = vadd.f32 %v11167_v53, %v3582_v52  ;;  %v4536_v41 = vor.u32 %v4535_v1, %v4531_v22  ;;  %v8831_v46 = vadd.f32 %v8830_v17, %v12238_v26  ;;  %v4252_v60 = vld [vmem:[#allocation3 + $0x78] sm:$0xe]  ;;  %v11329_v44 = vcombine.low %v4208_v38, %v4209_v18  ;;  %v4164_v26 = vld [vmem:[#allocation3 + $0xa4] sm:$0x1] }
 0x270   : > { %v3962_v42 = vrot.slane %v3960_v43, 7  ;;  %v7371_v63 = vcombine.low %v4252_v60, %v4209_v18  ;;  %v4741_v28 = vrot.slane %v9269_v7, 1  ;;  %v7612_v9 = vpack.c.bf16 %v3652_v24, %v3652_v24 }
 0x271   : > { %v3653_v57 = vmax.f32 %v3621_v4, 0.0  ;;  %v11332_v6 = vsel %vm1189_vm2, %v4536_v41, %v4540_v11  ;;  %v3583_v37 = vmul.f32 %v11182_v5, %v8831_v46  ;;  %v7994_v1 = vadd.f32 %v11265_v49, %v11255_v48 }
 0x272   : > { %v3965_v20 = vor.u32 %v3963_v36, %v3962_v42  ;;  %v3966_v52 = vrot.slane %v3962_v42, 4  ;;  %5180 = vmatprep.mubr.bf16.mxu0 %v11332_v6  ;;  %v4740_v22 = vrot.slane %v7371_v63, 1  ;;  %v3968_v17 = vshrl.u32 %v7612_v9, 16  ;;  %v12239_v36 = vld [vmem:[#allocation15_spill] sm:$0xff] }
 0x273   : > { %v3971_v10 = vshll.u32 %v7612_v9, 16  ;;  %v7613_v18 = vpack.c.bf16 %v3653_v57, %v3653_v57  ;;  %v3622_v14 = vadd.f32 %v11167_v53, %v3583_v37  ;;  %5181 = vmatmul.mubr.bf16.gmra.mrb[196].mxu0 %v11286_v30  ;;  %v8842_v24 = vadd.f32 %v12239_v36, %v7994_v1  ;;  %v4167_v57 = vld [vmem:[#allocation3 + $0xa8] sm:$0xf] }
 0x274   : > { %v4161_v11 = vsel %vm9736_vm7, %v3965_v20, %v4160_v45  ;;  %v11343_v43 = vsel %vm1478_vm9, %v4740_v22, %v4741_v28  ;;  %v4543_v4 = vshrl.u32 %v11329_v44, 16  ;;  %v3970_v41 = vrot.slane %v3968_v17, 7  ;;  %v4211_v20 = vld [vmem:[#allocation3 + $0x88] sm:$0xf] }
 0x275   : > { %4162 = vst [vmem:[#allocation3 + $0x9c] sm:$0xf] %v4161_v11  ;;  %v3977_v48 = vshrl.u32 %v7613_v18, 16  ;;  %v3980_v49 = vshll.u32 %v7613_v18, 16  ;;  %v3654_v9 = vmax.f32 %v3622_v14, 0.0  ;;  %8616 = vmatprep.mubr.bf16.mxu1 %v11343_v43  ;;  %v8843_v46 = vadd.f32 %v8842_v24, %v11031_v2  ;;  %v12240_v18 = vld [vmem:[#allocation18_spill] sm:$0xff] }
 0x276   : > { %v4545_v38 = vshll.u32 %v11329_v44, 16  ;;  %v4550_v60 = vshll.u32 %v9269_v7, 16  ;;  %v7997_v42 = vadd.f32 %v11276_v61, %v11268_v0  ;;  %v3973_v63 = vor.u32 %v3971_v10, %v3970_v41  ;;  %v9273_v11 = vld [vmem:[#allocation3 + $0x8c] ss:$0 sps:$4 sm:$0x11]  }
 0x277   : > { %v3975_v28 = vrot.slane %v3970_v41, 4  ;;  %v3979_v45 = vrot.slane %v3977_v48, 7  ;;  %v7614_v37 = vpack.c.bf16 %v3654_v9, %v3654_v9  ;;  %v3584_v22 = vmul.f32 %v11182_v5, %v8843_v46  ;;  %v4210_v48 = vld [vmem:[#allocation3 + $0x84] sm:$0xf] }
 0x278   : > { %v4547_v1 = vrot.slane %v4545_v38, 1  ;;  %v4552_v17 = vrot.slane %v4550_v60, 1  ;;  %v8850_v14 = vadd.f32 %v12240_v18, %v7997_v42  ;;  %v3974_v2 = vsel %vm9729_vm6, %v3966_v52, %v3973_v63  ;;  %v4253_v9 = vld [vmem:[#allocation3 + $0x84] sm:$0xe] }
 0x279   : > { %v4165_v7 = vsel %vm9743_vm8, %v3975_v28, %v4164_v26  ;;  %v3982_v0 = vor.u32 %v3980_v49, %v3979_v45  ;;  %v3983_v61 = vrot.slane %v3979_v45, 4  ;;  %4163 = vst [vmem:[#allocation3 + $0xa0] sm:$0xf] %v3974_v2  ;;  %v3985_v10 = vshrl.u32 %v7614_v37, 16  ;;  %v4171_v28 = vld [vmem:[#allocation3 + $0xb0] sm:$0x1] }
 0x27a   : > { %4166 = vst [vmem:[#allocation3 + $0xa4] sm:$0x1] %v4165_v7  ;;  %v3988_v36 = vshll.u32 %v7614_v37, 16  ;;  %v3623_v24 = vadd.f32 %v11167_v53, %v3584_v22  ;;  %v4548_v41 = vor.u32 %v4547_v1, %v4543_v4  ;;  %v8851_v38 = vadd.f32 %v8850_v14, %v11048_v16  ;;  %v12241_v14 = vld [vmem:[#allocation19_spill] sm:$0xff] }
 0x27b   : > { %v4168_v46 = vsel %vm9736_vm7, %v3982_v0, %v4167_v57  ;;  %v11362_v52 = vcombine.low %v4210_v48, %v4211_v20  ;;  %v7372_v60 = vcombine.low %v4253_v9, %v4211_v20  ;;  %v3987_v49 = vrot.slane %v3985_v10, 7  ;;  %v4213_v0 = vld [vmem:[#allocation3 + $0x94] sm:$0xf]  ;;  %v9277_v10 = vld [vmem:[#allocation3 + $0x98] ss:$0 sps:$4 sm:$0x11]  }
 0x27c   : > { %4169 = vst [vmem:[#allocation3 + $0xa8] sm:$0xf] %v4168_v46  ;;  %v3655_v26 = vmax.f32 %v3623_v24, 0.0  ;;  %v11365_v42 = vsel %vm1189_vm2, %v4548_v41, %v4552_v17  ;;  %v4744_v63 = vrot.slane %v9273_v11, 1  ;;  %v3585_v4 = vmul.f32 %v11182_v5, %v8851_v38  ;;  %v4212_v41 = vld [vmem:[#allocation3 + $0x90] sm:$0xf] }
 0x27d   : > { %5188 = vmatprep.mubr.bf16.mxu0 %v11365_v42  ;;  %v4743_v45 = vrot.slane %v7372_v60, 1  ;;  %v8000_v57 = vadd.f32 %v11296_v62, %v11290_v50  ;;  %v4555_v16 = vshrl.u32 %v11362_v52, 16  ;;  %v3990_v37 = vor.u32 %v3988_v36, %v3987_v49  ;;  %v4254_v38 = vld [vmem:[#allocation3 + $0x90] sm:$0xe]  ;;  %v11385_v60 = vpop.f32.mrb[160].mxu0 }
 0x27e   : > { %v3992_v20 = vrot.slane %v3987_v49, 4  ;;  %v7615_v22 = vpack.c.bf16 %v3655_v26, %v3655_v26  ;;  %5189 = vmatmul.mubr.bf16.gmra.mrb[200].mxu0 %v11329_v44  ;;  %v4557_v1 = vshll.u32 %v11362_v52, 16  ;;  %v3624_v17 = vadd.f32 %v11167_v53, %v3585_v4 }
 0x27f   : > { %v11376_v18 = vsel %vm1478_vm9, %v4743_v45, %v4744_v63  ;;  %v8838_v2 = vadd.f32 %v12241_v14, %v8000_v57  ;;  %v4562_v7 = vshll.u32 %v9273_v11, 16  ;;  %v3991_v50 = vsel %vm9729_vm6, %v3983_v61, %v3990_v37 }
 0x280   : > { %v4172_v62 = vsel %vm9743_vm8, %v3992_v20, %v4171_v28  ;;  %v3994_v36 = vshrl.u32 %v7615_v22, 16  ;;  %v3997_v24 = vshll.u32 %v7615_v22, 16  ;;  %8617 = vmatmul.mubr.bf16.gmra.mrb[116].mxu1 %v11376_v18  ;;  %4170 = vst [vmem:[#allocation3 + $0xac] sm:$0xf] %v3991_v50  ;;  %v3656_v48 = vmax.f32 %v3624_v17, 0.0  ;;  %v11392_v20 = vpop.f32.mrb[161].mxu0 }
 0x281   : > { %4173 = vst [vmem:[#allocation3 + $0xb0] sm:$0x1] %v4172_v62  ;;  %v8839_v9 = vadd.f32 %v8838_v2, %v11020_v23  ;;  %v4559_v46 = vrot.slane %v4557_v1, 1  ;;  %v4564_v11 = vrot.slane %v4562_v7, 1  ;;  %v8003_v61 = vadd.f32 %v11308_v19, %v11302_v32  ;;  %v4174_v28 = vld [vmem:[#allocation3 + $0xb4] sm:$0xf] }
 0x282   : > { %v3996_v49 = vrot.slane %v3994_v36, 7  ;;  %v11389_v26 = vcombine.low %v4212_v41, %v4213_v0  ;;  %v7373_v63 = vcombine.low %v4254_v38, %v4213_v0  ;;  %v7616_v4 = vpack.c.bf16 %v3656_v48, %v3656_v48  ;;  %v12242_v1 = vld [vmem:[#allocation16_spill] sm:$0xff]  ;;  %v11395_v2 = vld [vmem:[#allocation3 + $0xa4] ss:$0 sps:$4 sm:$0x11]  }
 0x283   : > { %v3586_v45 = vmul.f32 %v11182_v5, %v8839_v9  ;;  %v4560_v57 = vor.u32 %v4559_v46, %v4555_v16  ;;  %v4747_v37 = vrot.slane %v9277_v10, 1  ;;  %v8846_v17 = vadd.f32 %v12242_v1, %v8003_v61  ;;  %v4215_v50 = vld [vmem:[#allocation3 + $0xa0] sm:$0xf]  ;;  %v4214_v41 = vld [vmem:[#allocation3 + $0x9c] sm:$0xf] }
 0x284   : > { %v3999_v23 = vor.u32 %v3997_v24, %v3996_v49  ;;  %v4000_v22 = vrot.slane %v3996_v49, 4  ;;  %v4746_v14 = vrot.slane %v7373_v63, 1  ;;  %v4002_v7 = vshrl.u32 %v7616_v4, 16  ;;  %v4255_v38 = vld [vmem:[#allocation3 + $0x9c] sm:$0xe] }
 0x285   : > { %v4005_v32 = vshll.u32 %v7616_v4, 16  ;;  %v3625_v19 = vadd.f32 %v11167_v53, %v3586_v45  ;;  %v11399_v0 = vsel %vm1189_vm2, %v4560_v57, %v4564_v11  ;;  %v8847_v62 = vadd.f32 %v8846_v17, %v11039_v33  ;;  %v4178_v49 = vld [vmem:[#allocation3 + $0xbc] sm:$0x1]  ;;  %v8047_v4 = vpop.f32.mrb[162].mxu0 }
 0x286   : > { %v4175_v16 = vsel %vm9736_vm7, %v3999_v23, %v4174_v28  ;;  %5196 = vmatprep.mubr.bf16.mxu0 %v11399_v0  ;;  %v11406_v36 = vsel %vm1478_vm9, %v4746_v14, %v4747_v37  ;;  %v4567_v24 = vshrl.u32 %v11389_v26, 16  ;;  %v4004_v48 = vrot.slane %v4002_v7, 7  ;;  %v8048_v17 = vpop.f32.mrb[163].mxu0 }
 0x287   : > { %4176 = vst [vmem:[#allocation3 + $0xb4] sm:$0xf] %v4175_v16  ;;  %v3657_v9 = vmax.f32 %v3625_v19, 0.0  ;;  %5197 = vmatmul.mubr.bf16.gmra.mrb[204].mxu0 %v11362_v52  ;;  %8620 = vmatprep.mubr.bf16.mxu1 %v11406_v36  ;;  %v4569_v46 = vshll.u32 %v11389_v26, 16  ;;  %v4574_v11 = vshll.u32 %v9277_v10, 16  ;;  %v3587_v33 = vmul.f32 %v11182_v5, %v8847_v62 }
 0x288   : > { %v11413_v61 = vcombine.low %v4214_v41, %v4215_v50  ;;  %v7374_v63 = vcombine.low %v4255_v38, %v4215_v50  ;;  %v4750_v28 = vrot.slane %v11395_v2, 1  ;;  %v4007_v45 = vor.u32 %v4005_v32, %v4004_v48  ;;  %v4217_v1 = vld [vmem:[#allocation3 + $0xac] sm:$0xf]  ;;  %v9291_v16 = vld [vmem:[#allocation3 + $0xb0] ss:$0 sps:$4 sm:$0x11]  }
 0x289   : > { %v4009_v57 = vrot.slane %v4004_v48, 4  ;;  %v7617_v37 = vpack.c.bf16 %v3657_v9, %v3657_v9  ;;  %v4571_v23 = vrot.slane %v4569_v46, 1  ;;  %v3626_v14 = vadd.f32 %v11167_v53, %v3587_v33  ;;  %v4216_v46 = vld [vmem:[#allocation3 + $0xa8] sm:$0xf] }
 0x28a   : > { %v4576_v7 = vrot.slane %v4574_v11, 1  ;;  %v4749_v10 = vrot.slane %v7374_v63, 1  ;;  %v4579_v19 = vshrl.u32 %v11413_v61, 16  ;;  %v4008_v5 = vsel %vm9729_vm6, %v4000_v22, %v4007_v45  ;;  %v4256_v11 = vld [vmem:[#allocation3 + $0xa8] sm:$0xe] }
 0x28b   : > { %v4179_v50 = vsel %vm9743_vm8, %v4009_v57, %v4178_v49  ;;  %v4011_v62 = vshrl.u32 %v7617_v37, 16  ;;  %v4014_v32 = vshll.u32 %v7617_v37, 16  ;;  %4177 = vst [vmem:[#allocation3 + $0xb8] sm:$0xf] %v4008_v5  ;;  %v3658_v41 = vmax.f32 %v3626_v14, 0.0 }
 0x28c   : > { %4180 = vst [vmem:[#allocation3 + $0xbc] sm:$0x1] %v4179_v50  ;;  %v4572_v48 = vor.u32 %v4571_v23, %v4567_v24  ;;  %v11423_v9 = vsel %vm1478_vm9, %v4749_v10, %v4750_v28  ;;  %v4581_v53 = vshll.u32 %v11413_v61, 16  ;;  %v4586_v22 = vshll.u32 %v11395_v2, 16  ;;  %v4181_v63 = vld [vmem:[#allocation3 + $0xc0] sm:$0xf] }
 0x28d   : > { %v4013_v38 = vrot.slane %v4011_v62, 7  ;;  %8621 = vmatmul.mubr.bf16.gmra.mrb[120].mxu1 %v11423_v9  ;;  %v11428_v33 = vcombine.low %v4216_v46, %v4217_v1  ;;  %v7375_v49 = vcombine.low %v4256_v11, %v4217_v1  ;;  %v7618_v45 = vpack.c.bf16 %v3658_v41, %v3658_v41  ;;  %v4185_v62 = vld [vmem:[#allocation3 + $0xc8] sm:$0x1] }
 0x28e   : > { %v11431_v57 = vsel %vm1189_vm2, %v4572_v48, %v4576_v7  ;;  %v4583_v24 = vrot.slane %v4581_v53, 1  ;;  %v4753_v28 = vrot.slane %v9291_v16, 1  ;;  %v4588_v50 = vrot.slane %v4586_v22, 1  ;;  %v4218_v46 = vld [vmem:[#allocation3 + $0xb4] sm:$0xf] }
 0x28f   : > { %v4016_v37 = vor.u32 %v4014_v32, %v4013_v38  ;;  %v4017_v23 = vrot.slane %v4013_v38, 4  ;;  %5204 = vmatprep.mubr.bf16.mxu0 %v11431_v57  ;;  %v4752_v14 = vrot.slane %v7375_v49, 1  ;;  %v4019_v10 = vshrl.u32 %v7618_v45, 16 }
 0x290   : > { %v4022_v5 = vshll.u32 %v7618_v45, 16  ;;  %5205 = vmatmul.mubr.bf16.gmra.mrb[208].mxu0 %v11389_v26  ;;  %v4584_v2 = vor.u32 %v4583_v24, %v4579_v19  ;;  %v4593_v41 = vshll.u32 %v11428_v33, 16  ;;  %v4598_v32 = vshll.u32 %v9291_v16, 16  ;;  %v4257_v19 = vld [vmem:[#allocation3 + $0xb4] sm:$0xe] }
 0x291   : > { %v4182_v1 = vsel %vm9736_vm7, %v4016_v37, %v4181_v63  ;;  %v11438_v7 = vsel %vm1478_vm9, %v4752_v14, %v4753_v28  ;;  %v4021_v48 = vrot.slane %v4019_v10, 7  ;;  %v11447_v55 = vadd.f32 %v11392_v20, %v11385_v60 }
 0x292   : > { %4183 = vst [vmem:[#allocation3 + $0xc0] sm:$0xf] %v4182_v1  ;;  %v11442_v53 = vsel %vm1189_vm2, %v4584_v2, %v4588_v50  ;;  %8624 = vmatprep.mubr.bf16.mxu1 %v11438_v7  ;;  %v11449_v11 = vadd.f32 %v8048_v17, %v8047_v4  ;;  %v4591_v38 = vshrl.u32 %v11428_v33, 16  ;;  %v4595_v16 = vrot.slane %v4593_v41, 1  ;;  %v4219_v22 = vld [vmem:[#allocation3 + $0xb8] sm:$0xf] }
 0x293   : > { %5212 = vmatprep.mubr.bf16.mxu0 %v11442_v53  ;;  %v4024_v49 = vor.u32 %v4022_v5, %v4021_v48  ;;  %v4026_v63 = vrot.slane %v4021_v48, 4  ;;  %v11453_v45 = vcombine.low %v4218_v46, %v4219_v22  ;;  %v9299_v24 = vld [vmem:[#allocation3 + $0xbc] ss:$0 sps:$4 sm:$0x11]   ;;  %v7376_v28 = vcombine.low %v4257_v19, %v4219_v22  ;;  %v9308_v41 = vld [vmem:[%s12137_s4 + $0x180] sm:$0xff]   ;;  %v9310_v19 = vld [vmem:[%s12137_s4 + $0x1c8] sm:$0xff]  }
 0x294   : > { %v4596_v37 = vor.u32 %v4595_v16, %v4591_v38  ;;  %v4600_v14 = vrot.slane %v4598_v32, 1  ;;  %v4756_v17 = vrot.slane %v9299_v24, 1  ;;  %v4610_v50 = vshll.u32 %v9299_v24, 16  ;;  %v12244_v22 = vld [vmem:[#allocation10_spill] sm:$0xff] }
 0x295   : > { %v4025_v60 = vsel %vm9729_vm6, %v4017_v23, %v4024_v49  ;;  %v4186_v20 = vsel %vm9743_vm8, %v4026_v63, %v4185_v62  ;;  %v4755_v4 = vrot.slane %v7376_v28, 1  ;;  %v4605_v5 = vshll.u32 %v11453_v45, 16  ;;  %v12243_v23 = vld [vmem:[#allocation20_spill] sm:$0xff]  ;;  %v9312_v28 = vld [vmem:[%s12137_s4 + $0x1d0] sm:$0xff]  }
 0x296   : > { %4184 = vst [vmem:[#allocation3 + $0xc4] sm:$0xf] %v4025_v60  ;;  %4187 = vst [vmem:[#allocation3 + $0xc8] sm:$0x1] %v4186_v20  ;;  %v11460_v10 = vsel %vm1189_vm2, %v4596_v37, %v4600_v14  ;;  %v4603_v51 = vshrl.u32 %v11453_v45, 16  ;;  %v4612_v62 = vrot.slane %v4610_v50, 1 }
 0x297   : > { %v11465_v2 = vsel %vm1478_vm9, %v4755_v4, %v4756_v17  ;;  %v4607_v12 = vrot.slane %v4605_v5, 1  ;;  %v9311_v63 = vld [vmem:[%s12137_s4 + $0x188] sm:$0xff]   ;;  %v9313_v4 = vld [vmem:[%s12137_s4 + $0x190] sm:$0xff]   ;;  %v9314_v17 = vld [vmem:[%s12137_s4 + $0x1d8] sm:$0xff]  }
 0x298   : > { %5213 = vmatmul.mubr.bf16.gmra.mrb[212].mxu0 %v11413_v61  ;;  %8625 = vmatmul.mubr.bf16.gmra.mrb[124].mxu1 %v11465_v2  ;;  %v12245_v50 = vld [vmem:[#allocation22_spill] sm:$0xff] }
 0x299   : > { %5220 = vmatprep.mubr.bf16.mxu0 %v11460_v10  ;;  %8644 = vmatprep.mubr.bf16.mxu1 %v12243_v23  ;;  %v4608_v1 = vor.u32 %v4607_v12, %v4603_v51  ;;  %v4220_v48 = vld [vmem:[#allocation3 + $0xc0] sm:$0xf]  ;;  %v9316_v12 = vld [vmem:[%s12137_s4 + $0x1e0] sm:$0xff]  }
 0x29a   : > { %v9315_v51 = vld [vmem:[%s12137_s4 + $0x198] sm:$0xff]   ;;  %v9317_v23 = vld [vmem:[%s12137_s4 + $0x1a0] sm:$0xff]  }
 0x29b   : > { %v11475_v32 = vsel %vm1189_vm2, %v4608_v1, %v4612_v62  ;;  %v9318_v1 = vld [vmem:[%s12137_s4 + $0x1e8] sm:$0xff]   ;;  %v12246_v62 = vld [vmem:[#allocation23_spill] sm:$0xff] }
 0x29d   : > { %v11477_v46 = vld [vmem:[#allocation3 + $0xc4] sm:$0xf]  ;;  %v11485_v16 = vld [vmem:[#allocation3 + $0xc8] ss:$0 sps:$4 sm:$0x11]  }
 0x29e   : > { %v11483_v38 = vcombine.low %v4220_v48, %v11477_v46  ;;  %v4622_v24 = vshll.u32 %v11485_v16, 16  ;;  %v9320_v48 = vld [vmem:[%s12137_s4 + $0x1f0] sm:$0xff]  }
 0x2a0   : > { %5221 = vmatmul.mubr.bf16.gmra.mrb[216].mxu0 %v11428_v33  ;;  %8645 = vmatmul.mubr.bf16.vlgmr.msra.gmra.mrb[96].mxu1 %v12244_v22  ;;  %v4617_v49 = vshll.u32 %v11483_v38, 16  ;;  %v4615_v37 = vshrl.u32 %v11483_v38, 16  ;;  %v4624_v20 = vrot.slane %v4622_v24, 1  ;;  %v9327_v24 = vld [vmem:[%s12137_s4 + $0x200] sm:$0xff]  }
 0x2a1   : > { %5228 = vmatprep.mubr.bf16.mxu0 %v11475_v32  ;;  %8648 = vmatprep.mubr.bf16.mxu1 %v11028_v39 }
 0x2a2   : > { %8301 = vmatpush3.bf16.msra.mxu1 %v9308_v41  ;;  %v4619_v14 = vrot.slane %v4617_v49, 1  ;;  %v9319_v41 = vld [vmem:[%s12137_s4 + $0x1a8] sm:$0xff]   ;;  %v9325_v49 = vld [vmem:[%s12137_s4 + $0x1f8] sm:$0xff]  }
 0x2a3   : > { %8302 = vmatprep.subr.bf16.mxu1 %v9310_v19  ;;  %v9321_v19 = vld [vmem:[%s12137_s4 + $0x1b0] sm:$0xff]  }
 0x2a4   : > { %v4620_v60 = vor.u32 %v4619_v14, %v4615_v37 }
 0x2a6   : > { %8303 = vmatpush3.bf16.msra.mxu1 %v9311_v63  ;;  %v11507_v5 = vsel %vm1189_vm2, %v4620_v60, %v4624_v20  ;;  %v9326_v63 = vld [vmem:[%s12137_s4 + $0x1b8] sm:$0xff]   ;;  %v4759_v60 = vrot.slane %v11485_v16, 1  ;;  %v12247_v20 = vld [vmem:[#allocation11_spill] sm:$0xff]  ;;  %v9329_v16 = vld [vmem:[%s12137_s4 + $0x210] sm:$0xff]  }
 0x2a7   : > { %8304 = vmatprep.subr.bf16.mxu1 %v9312_v28  ;;  %v4258_v28 = vld [vmem:[#allocation3 + $0xc0] sm:$0xe] }
 0x2a8   : > { %5229 = vmatmul.mubr.bf16.gmra.mrb[220].mxu0 %v11453_v45  ;;  %8649 = vmatmul.mubr.bf16.gmra.mrb[100].mxu1 %v11092_v21  ;;  %v7377_v37 = vcombine.low %v4258_v28, %v11477_v46  ;;  %v9328_v46 = vld [vmem:[%s12137_s4 + $0x208] sm:$0xff]  }
 0x2a9   : > { %5735 = vmatprep.mubr.bf16.mxu0 %v12245_v50  ;;  %8652 = vmatprep.mubr.bf16.mxu1 %v11135_v54  ;;  %v12249_v50 = vld [vmem:[#allocation21_spill] sm:$0xff] }
 0x2aa   : > { %8305 = vmatpush3.bf16.msra.mxu1 %v9313_v4  ;;  %v4758_v14 = vrot.slane %v7377_v37, 1 }
 0x2ab   : > { %8306 = vmatprep.subr.bf16.mxu1 %v9314_v17  ;;  %v12248_v17 = vld [vmem:[#allocation24_spill] sm:$0xff] }
 0x2ac   : > { %v11567_v4 = vsel %vm1478_vm9, %v4758_v14, %v4759_v60 }
 0x2ae   : > { %8307 = vmatpush3.bf16.msra.mxu1 %v9315_v51 }
 0x2af   : > { %8308 = vmatprep.subr.bf16.mxu1 %v9316_v12 }
 0x2b0   : > { %5736 = vmatmul.mubr.bf16.vlgmr.msra.gmra.mrb[224].mxu0 %v12246_v62  ;;  %8653 = vmatmul.mubr.bf16.gmra.mrb[104].mxu1 %v11175_v34 }
 0x2b1   : > { %5743 = vmatprep.mubr.bf16.mxu0 %v11018_v58  ;;  %8656 = vmatprep.mubr.bf16.mxu1 %v11228_v25 }
 0x2b2   : > { %8309 = vmatpush3.bf16.msra.mxu1 %v9317_v23 }
 0x2b3   : > { %8310 = vmatprep.subr.bf16.mxu1 %v9318_v1 }
 0x2b6   : > { %8311 = vmatpush3.bf16.msra.mxu1 %v9319_v41 }
 0x2b7   : > { %8312 = vmatprep.subr.bf16.mxu1 %v9320_v48 }
 0x2b8   : > { %5744 = vmatmul.mubr.bf16.gmra.mrb[228].mxu0 %v10935_v27  ;;  %8657 = vmatmul.mubr.bf16.gmra.mrb[108].mxu1 %v11272_v40 }
 0x2b9   : > { %5751 = vmatprep.mubr.bf16.mxu0 %v11075_v56  ;;  %8660 = vmatprep.mubr.bf16.mxu1 %v11314_v8 }
 0x2ba   : > { %8313 = vmatpush3.bf16.msra.mxu1 %v9321_v19 }
 0x2bb   : > { %8314 = vmatprep.subr.bf16.mxu1 %v9325_v49 }
 0x2be   : > { %8315 = vmatpush3.bf16.msra.mxu1 %v9326_v63 }
 0x2bf   : > { %8676 = vmatprep.subr.bf16.mxu1 %v9327_v24 }
 0x2c0   : > { %5752 = vmatmul.mubr.bf16.gmra.mrb[232].mxu0 %v10994_v29  ;;  %8661 = vmatmul.mubr.bf16.gmra.mrb[112].mxu1 %v11343_v43 }
 0x2c1   : > { %5759 = vmatprep.mubr.bf16.mxu0 %v11114_v3  ;;  %8664 = vmatprep.mubr.bf16.mxu1 %v11376_v18 }
 0x2c8   : > { %5760 = vmatmul.mubr.bf16.gmra.mrb[236].mxu0 %v11051_v13  ;;  %8665 = vmatmul.mubr.bf16.gmra.mrb[116].mxu1 %v11406_v36 }
 0x2c9   : > { %5767 = vmatprep.mubr.bf16.mxu0 %v11156_v15  ;;  %8668 = vmatprep.mubr.bf16.mxu1 %v11423_v9 }
 0x2d0   : > { %5768 = vmatmul.mubr.bf16.gmra.mrb[240].mxu0 %v11108_v59  ;;  %8669 = vmatmul.mubr.bf16.gmra.mrb[120].mxu1 %v11438_v7 }
 0x2d1   : > { %5775 = vmatprep.mubr.bf16.mxu0 %v11216_v31  ;;  %8672 = vmatprep.mubr.bf16.mxu1 %v11465_v2 }
 0x2d8   : > { %5776 = vmatmul.mubr.bf16.gmra.mrb[244].mxu0 %v12247_v20  ;;  %8673 = vmatmul.mubr.bf16.gmra.mrb[124].mxu1 %v11567_v4 }
 0x2d9   : > { %5783 = vmatprep.mubr.bf16.mxu0 %v11258_v47  ;;  %6394 = vmatprep.mubr.bf16.mxu1 %v11018_v58  ;;  %v9330_v58 = vld [vmem:[%s12137_s4 + $0x218] sm:$0xff]  }
 0x2e0   : > { %5784 = vmatmul.mubr.bf16.gmra.mrb[248].mxu0 %v12248_v17  ;;  %6395 = vmatmul.mubr.bf16.vlgmr.msra.gmra.mrb[128].mxu1 %v10935_v27  ;;  %v9331_v27 = vld [vmem:[%s12137_s4 + $0x220] sm:$0xff]  }
 0x2e1   : > { %5791 = vmatprep.mubr.bf16.mxu0 %v11300_v35  ;;  %6402 = vmatprep.mubr.bf16.mxu1 %v11075_v56  ;;  %v9332_v56 = vld [vmem:[%s12137_s4 + $0x228] sm:$0xff]  }
 0x2e2   : > { %8677 = vmatpush3.bf16.msra.mxu1 %v9327_v24 }
 0x2e3   : > { %8678 = vmatprep.subr.bf16.mxu1 %v9328_v46 }
 0x2e6   : > { %8679 = vmatpush3.bf16.msra.mxu1 %v9328_v46 }
 0x2e7   : > { %8680 = vmatprep.subr.bf16.mxu1 %v9329_v16 }
 0x2e8   : > { %5792 = vmatmul.mubr.bf16.gmra.mrb[252].mxu0 %v12249_v50  ;;  %6403 = vmatmul.mubr.bf16.gmra.mrb[132].mxu1 %v10994_v29  ;;  %v9333_v29 = vld [vmem:[%s12137_s4 + $0x230] sm:$0xff]  }
 0x2e9   : > { %5799 = vmatprep.mubr.bf16.mxu0 %v11332_v6  ;;  %6410 = vmatprep.mubr.bf16.mxu1 %v11114_v3  ;;  %v9334_v3 = vld [vmem:[%s12137_s4 + $0x238] sm:$0xff]  }
 0x2ea   : > { %8681 = vmatpush3.bf16.msra.mxu1 %v9329_v16 }
 0x2eb   : > { %8682 = vmatprep.subr.bf16.mxu1 %v9330_v58 }
 0x2ee   : > { %8683 = vmatpush3.bf16.msra.mxu1 %v9330_v58 }
 0x2ef   : > { %8684 = vmatprep.subr.bf16.mxu1 %v9331_v27 }
 0x2f0   : > { %5800 = vmatmul.mubr.bf16.gmra.mrb[0].mxu0 %v11286_v30  ;;  %6411 = vmatmul.mubr.bf16.gmra.mrb[136].mxu1 %v11051_v13 }
 0x2f1   : > { %5807 = vmatprep.mubr.bf16.mxu0 %v11365_v42  ;;  %6418 = vmatprep.mubr.bf16.mxu1 %v11156_v15 }
 0x2f2   : > { %8685 = vmatpush3.bf16.msra.mxu1 %v9331_v27 }
 0x2f3   : > { %8686 = vmatprep.subr.bf16.mxu1 %v9332_v56 }
 0x2f6   : > { %8687 = vmatpush3.bf16.msra.mxu1 %v9332_v56 }
 0x2f7   : > { %8688 = vmatprep.subr.bf16.mxu1 %v9333_v29 }
 0x2f8   : > { %5808 = vmatmul.mubr.bf16.gmra.mrb[4].mxu0 %v11329_v44  ;;  %6419 = vmatmul.mubr.bf16.gmra.mrb[140].mxu1 %v11108_v59 }
 0x2f9   : > { %5815 = vmatprep.mubr.bf16.mxu0 %v11399_v0  ;;  %v8050_v13 = vpop.f32.mrb[164].mxu0  ;;  %6426 = vmatprep.mubr.bf16.mxu1 %v11216_v31 }
 0x2fa   : > { %v8051_v15 = vpop.f32.mrb[165].mxu0  ;;  %8689 = vmatpush3.bf16.msra.mxu1 %v9333_v29 }
 0x2fb   : > { %v11609_v51 = vadd.f32 %v8051_v15, %v8050_v13  ;;  %v8053_v12 = vpop.f32.mrb[166].mxu0  ;;  %8690 = vmatprep.subr.bf16.mxu1 %v9334_v3 }
 0x2fc   : > { %v8054_v23 = vpop.f32.mrb[167].mxu0 }
 0x2fd   : > { %v11611_v1 = vadd.f32 %v8054_v23, %v8053_v12 }
 0x2fe   : > { %8691 = vmatpush3.bf16.msra.mxu1 %v9334_v3 }
 0x300   : > { %5816 = vmatmul.mubr.bf16.gmra.mrb[8].mxu0 %v11362_v52  ;;  %6427 = vmatmul.mubr.bf16.gmra.mrb[144].mxu1 %v12247_v20 }
 0x301   : > { %5823 = vmatprep.mubr.bf16.mxu0 %v11431_v57  ;;  %6434 = vmatprep.mubr.bf16.mxu1 %v11258_v47 }
 0x303   : > { %v8056_v59 = vpop.f32.mrb[168].mxu0 }
 0x304   : > { %v8057_v31 = vpop.f32.mrb[169].mxu0 }
 0x305   : > { %v11617_v62 = vadd.f32 %v8057_v31, %v8056_v59  ;;  %v8059_v41 = vpop.f32.mrb[170].mxu0  ;;  %v11664_v31 = vld [vmem:[#allocation3 + $0xd0] sm:$0xf] }
 0x306   : > { %v8060_v48 = vpop.f32.mrb[171].mxu0 }
 0x307   : > { %v11619_v19 = vadd.f32 %v8060_v48, %v8059_v41 }
 0x308   : > { %5824 = vmatmul.mubr.bf16.gmra.mrb[12].mxu0 %v11389_v26  ;;  %6435 = vmatmul.mubr.bf16.gmra.mrb[148].mxu1 %v12248_v17 }
 0x309   : > { %5831 = vmatprep.mubr.bf16.mxu0 %v11442_v53  ;;  %6442 = vmatprep.mubr.bf16.mxu1 %v11300_v35 }
 0x30b   : > { %v8062_v49 = vpop.f32.mrb[172].mxu0 }
 0x30c   : > { %v8063_v63 = vpop.f32.mrb[173].mxu0 }
 0x30d   : > { %v11625_v24 = vadd.f32 %v8063_v63, %v8062_v49  ;;  %v8065_v47 = vpop.f32.mrb[174].mxu0 }
 0x30e   : > { %v8066_v28 = vpop.f32.mrb[175].mxu0 }
 0x30f   : > { %v11628_v37 = vadd.f32 %v8066_v28, %v8065_v47 }
 0x310   : > { %5832 = vmatmul.mubr.bf16.gmra.mrb[16].mxu0 %v11413_v61  ;;  %6443 = vmatmul.mubr.bf16.gmra.mrb[152].mxu1 %v12249_v50 }
 0x311   : > { %5839 = vmatprep.mubr.bf16.mxu0 %v11460_v10  ;;  %6450 = vmatprep.mubr.bf16.mxu1 %v11332_v6 }
 0x315   : > { %v8068_v14 = vpop.f32.mrb[176].mxu0 }
 0x316   : > { %v8069_v60 = vpop.f32.mrb[177].mxu0 }
 0x317   : > { %v11633_v20 = vadd.f32 %v8069_v60, %v8068_v14  ;;  %v8071_v35 = vpop.f32.mrb[178].mxu0 }
 0x318   : > { %5840 = vmatmul.mubr.bf16.gmra.mrb[20].mxu0 %v11428_v33  ;;  %v8072_v46 = vpop.f32.mrb[179].mxu0  ;;  %6451 = vmatmul.mubr.bf16.gmra.mrb[156].mxu1 %v11286_v30 }
 0x319   : > { %5847 = vmatprep.mubr.bf16.mxu0 %v11475_v32  ;;  %v11638_v17 = vadd.f32 %v8072_v46, %v8071_v35  ;;  %6458 = vmatprep.mubr.bf16.mxu1 %v11365_v42 }
 0x31e   : > { %v8074_v16 = vpop.f32.mrb[180].mxu0 }
 0x31f   : > { %v8075_v58 = vpop.f32.mrb[181].mxu0 }
 0x320   : > { %5848 = vmatmul.mubr.bf16.gmra.mrb[24].mxu0 %v11453_v45  ;;  %v11642_v6 = vadd.f32 %v8075_v58, %v8074_v16  ;;  %v8077_v50 = vpop.f32.mrb[182].mxu0  ;;  %6459 = vmatmul.mubr.bf16.gmra.mrb[160].mxu1 %v11329_v44 }
 0x321   : > { %5855 = vmatprep.mubr.bf16.mxu0 %v11507_v5  ;;  %v8078_v27 = vpop.f32.mrb[183].mxu0  ;;  %6466 = vmatprep.mubr.bf16.mxu1 %v11399_v0 }
 0x322   : > { %v11647_v56 = vadd.f32 %v8078_v27, %v8077_v50 }
 0x328   : > { %5856 = vmatmul.mubr.bf16.gmra.mrb[28].mxu0 %v11483_v38  ;;  %v8080_v30 = vpop.f32.mrb[184].mxu0  ;;  %6467 = vmatmul.mubr.bf16.gmra.mrb[164].mxu1 %v11362_v52 }
 0x329   : > { %v8081_v42 = vpop.f32.mrb[185].mxu0  ;;  %6474 = vmatprep.mubr.bf16.mxu1 %v11431_v57  ;;  %v4222_v57 = vld [vmem:[#allocation3 + $0xcc] sm:$0xf] }
 0x32a   : > { %v11652_v29 = vadd.f32 %v8081_v42, %v8080_v30  ;;  %v8083_v3 = vpop.f32.mrb[186].mxu0  ;;  %v7342_v49 = vcombine.low %v4222_v57, %v11664_v31 }
 0x32b   : > { %v8084_v13 = vpop.f32.mrb[187].mxu0 }
 0x32c   : > { %v11654_v15 = vadd.f32 %v8084_v13, %v8083_v3  ;;  %v4627_v60 = vshrl.u32 %v7342_v49, 16 }
 0x330   : > { %6475 = vmatmul.mubr.bf16.gmra.mrb[168].mxu1 %v11389_v26 }
 0x331   : > { %6482 = vmatprep.mubr.bf16.mxu1 %v11442_v53 }
 0x333   : > { %v8086_v44 = vpop.f32.mrb[188].mxu0 }
 0x334   : > { %v8087_v0 = vpop.f32.mrb[189].mxu0 }
 0x335   : > { %v11658_v12 = vadd.f32 %v8087_v0, %v8086_v44  ;;  %v8089_v23 = vpop.f32.mrb[190].mxu0 }
 0x336   : > { %v8090_v59 = vpop.f32.mrb[191].mxu0 }
 0x337   : > { %v11660_v52 = vadd.f32 %v8090_v59, %v8089_v23 }
 0x338   : > { %6483 = vmatmul.mubr.bf16.gmra.mrb[172].mxu1 %v11413_v61  ;;  %v11673_v61 = vld [vmem:[#allocation3 + $0xd4] ss:$0 sps:$4 sm:$0x11]  }
 0x339   : > { %6490 = vmatprep.mubr.bf16.mxu1 %v11460_v10  ;;  %v4629_v10 = vshll.u32 %v7342_v49, 16  ;;  %v4634_v46 = vshll.u32 %v11673_v61, 16 }
 0x33b   : > { %v4631_v35 = vrot.slane %v4629_v10, 1 }
 0x33d   : > { %v8092_v41 = vpop.f32.mrb[192].mxu0 }
 0x33e   : > { %v8093_v48 = vpop.f32.mrb[193].mxu0 }
 0x33f   : > { %v11666_v26 = vadd.f32 %v8093_v48, %v8092_v41  ;;  %v8095_v53 = vpop.f32.mrb[194].mxu0 }
 0x340   : > { %v8096_v63 = vpop.f32.mrb[195].mxu0  ;;  %6491 = vmatmul.mubr.bf16.gmra.mrb[176].mxu1 %v11428_v33  ;;  %v4632_v33 = vor.u32 %v4631_v35, %v4627_v60 }
 0x341   : > { %v11669_v47 = vadd.f32 %v8096_v63, %v8095_v53  ;;  %6498 = vmatprep.mubr.bf16.mxu1 %v11475_v32  ;;  %v4636_v32 = vrot.slane %v4634_v46, 1 }
 0x343   : > { %v4637_v30 = vsel %vm1189_vm2, %v4632_v33, %v4636_v32 }
 0x346   : > { %v8098_v28 = vpop.f32.mrb[196].mxu0 }
 0x347   : > { %v8099_v14 = vpop.f32.mrb[197].mxu0 }
 0x348   : > { %v11676_v16 = vadd.f32 %v8099_v14, %v8098_v28  ;;  %v8101_v58 = vpop.f32.mrb[198].mxu0  ;;  %6499 = vmatmul.mubr.bf16.gmra.mrb[180].mxu1 %v11453_v45 }
 0x349   : > { %v8102_v50 = vpop.f32.mrb[199].mxu0  ;;  %6506 = vmatprep.mubr.bf16.mxu1 %v11507_v5 }
 0x34a   : > { %v11679_v27 = vadd.f32 %v8102_v50, %v8101_v58 }
 0x350   : > { %6507 = vmatmul.mubr.bf16.gmra.mrb[184].mxu1 %v11483_v38 }
 0x351   : > { %v8104_v42 = vpop.f32.mrb[200].mxu0  ;;  %6514 = vmatprep.mubr.bf16.mxu1 %v4637_v30 }
 0x352   : > { %v8105_v3 = vpop.f32.mrb[201].mxu0 }
 0x353   : > { %v11684_v13 = vadd.f32 %v8105_v3, %v8104_v42  ;;  %v8107_v44 = vpop.f32.mrb[202].mxu0 }
 0x354   : > { %v8108_v0 = vpop.f32.mrb[203].mxu0 }
 0x355   : > { %v11686_v23 = vadd.f32 %v8108_v0, %v8107_v44 }
 0x358   : > { %6515 = vmatmul.mubr.bf16.gmra.mrb[188].mxu1 %v7342_v49 }
 0x359   : > { %8692 = vmatprep.mubr.bf16.mxu1 %v12244_v22 }
 0x35a   : > { %v8110_v45 = vpop.f32.mrb[204].mxu0 }
 0x35b   : > { %v8111_v5 = vpop.f32.mrb[205].mxu0 }
 0x35c   : > { %v11689_v59 = vadd.f32 %v8111_v5, %v8110_v45  ;;  %v8113_v57 = vpop.f32.mrb[206].mxu0 }
 0x35d   : > { %v8114_v41 = vpop.f32.mrb[207].mxu0 }
 0x35e   : > { %v11691_v48 = vadd.f32 %v8114_v41, %v8113_v57 }
 0x360   : > { %8693 = vmatmul.mubr.bf16.vlgmr.msra.gmra.mrb[96].mxu1 %v11028_v39 }
 0x361   : > { %8696 = vmatprep.mubr.bf16.mxu1 %v11092_v21 }
 0x363   : > { %v8116_v38 = vpop.f32.mrb[208].mxu0 }
 0x364   : > { %v8117_v53 = vpop.f32.mrb[209].mxu0 }
 0x365   : > { %v11695_v63 = vadd.f32 %v8117_v53, %v8116_v38  ;;  %v8119_v10 = vpop.f32.mrb[210].mxu0 }
 0x366   : > { %v8120_v49 = vpop.f32.mrb[211].mxu0 }
 0x367   : > { %v11697_v28 = vadd.f32 %v8120_v49, %v8119_v10 }
 0x368   : > { %8697 = vmatmul.mubr.bf16.gmra.mrb[100].mxu1 %v11135_v54 }
 0x369   : > { %8700 = vmatprep.mubr.bf16.mxu1 %v11175_v34 }
 0x36b   : > { %v8122_v22 = vpop.f32.mrb[212].mxu0 }
 0x36c   : > { %v8123_v14 = vpop.f32.mrb[213].mxu0 }
 0x36d   : > { %v11701_v60 = vadd.f32 %v8123_v14, %v8122_v22  ;;  %v8125_v35 = vpop.f32.mrb[214].mxu0 }
 0x36e   : > { %v8126_v39 = vpop.f32.mrb[215].mxu0 }
 0x36f   : > { %v11703_v46 = vadd.f32 %v8126_v39, %v8125_v35 }
 0x370   : > { %8701 = vmatmul.mubr.bf16.gmra.mrb[104].mxu1 %v11228_v25 }
 0x371   : > { %8704 = vmatprep.mubr.bf16.mxu1 %v11272_v40 }
 0x373   : > { %v8128_v21 = vpop.f32.mrb[216].mxu0 }
 0x374   : > { %v8129_v58 = vpop.f32.mrb[217].mxu0 }
 0x375   : > { %v11707_v50 = vadd.f32 %v8129_v58, %v8128_v21  ;;  %v8131_v33 = vpop.f32.mrb[218].mxu0 }
 0x376   : > { %v8132_v54 = vpop.f32.mrb[219].mxu0 }
 0x377   : > { %v11709_v32 = vadd.f32 %v8132_v54, %v8131_v33 }
 0x378   : > { %8705 = vmatmul.mubr.bf16.gmra.mrb[108].mxu1 %v11314_v8 }
 0x379   : > { %8708 = vmatprep.mubr.bf16.mxu1 %v11343_v43 }
 0x37b   : > { %v8134_v34 = vpop.f32.mrb[220].mxu0 }
 0x37c   : > { %v8135_v30 = vpop.f32.mrb[221].mxu0 }
 0x37d   : > { %v11713_v42 = vadd.f32 %v8135_v30, %v8134_v34  ;;  %v8137_v3 = vpop.f32.mrb[222].mxu0 }
 0x37e   : > { %v8138_v25 = vpop.f32.mrb[223].mxu0 }
 0x37f   : > { %v11715_v44 = vadd.f32 %v8138_v25, %v8137_v3 }
 0x380   : > { %8709 = vmatmul.mubr.bf16.gmra.mrb[112].mxu1 %v11376_v18  ;;  %v4259_v18 = vld [vmem:[#allocation3 + $0xcc] sm:$0xe] }
 0x381   : > { %8712 = vmatprep.mubr.bf16.mxu1 %v11406_v36  ;;  %v7378_v22 = vcombine.low %v4259_v18, %v11664_v31 }
 0x383   : > { %v8180_v40 = vpop.f32.mrb[224].mxu0 }
 0x384   : > { %v8181_v0 = vpop.f32.mrb[225].mxu0 }
 0x385   : > { %v8182_v45 = vadd.f32 %v8181_v0, %v8180_v40  ;;  %v8183_v5 = vpop.f32.mrb[226].mxu0 }
 0x386   : > { %v8184_v57 = vpop.f32.mrb[227].mxu0 }
 0x387   : > { %v11720_v8 = vadd.f32 %v8182_v45, %v11447_v55  ;;  %v8185_v43 = vadd.f32 %v8184_v57, %v8183_v5 }
 0x388   : > { %8713 = vmatmul.mubr.bf16.gmra.mrb[116].mxu1 %v11423_v9  ;;  %v4761_v9 = vrot.slane %v7378_v22, 1 }
 0x389   : > { %v11723_v41 = vadd.f32 %v8185_v43, %v11449_v11  ;;  %8716 = vmatprep.mubr.bf16.mxu1 %v11438_v7  ;;  %v4762_v7 = vrot.slane %v11673_v61, 1 }
 0x38b   : > { %v8186_v38 = vpop.f32.mrb[228].mxu0  ;;  %v4763_v31 = vsel %vm1478_vm9, %v4761_v9, %v4762_v7 }
 0x38c   : > { %v8187_v53 = vpop.f32.mrb[229].mxu0 }
 0x38d   : > { %v8188_v36 = vadd.f32 %v8187_v53, %v8186_v38  ;;  %v8189_v10 = vpop.f32.mrb[230].mxu0 }
 0x38e   : > { %v8190_v49 = vpop.f32.mrb[231].mxu0 }
 0x38f   : > { %v11729_v14 = vadd.f32 %v8188_v36, %v11609_v51  ;;  %v8191_v55 = vadd.f32 %v8190_v49, %v8189_v10 }
 0x390   : > { %8717 = vmatmul.mubr.bf16.gmra.mrb[120].mxu1 %v11465_v2 }
 0x391   : > { %v11732_v35 = vadd.f32 %v8191_v55, %v11611_v1  ;;  %8720 = vmatprep.mubr.bf16.mxu1 %v11567_v4 }
 0x393   : > { %v8192_v11 = vpop.f32.mrb[232].mxu0 }
 0x394   : > { %v8193_v39 = vpop.f32.mrb[233].mxu0 }
 0x395   : > { %v8194_v21 = vadd.f32 %v8193_v39, %v8192_v11  ;;  %v8195_v58 = vpop.f32.mrb[234].mxu0 }
 0x396   : > { %v8196_v33 = vpop.f32.mrb[235].mxu0 }
 0x397   : > { %v11739_v51 = vadd.f32 %v8194_v21, %v11617_v62  ;;  %v8197_v54 = vadd.f32 %v8196_v33, %v8195_v58 }
 0x398   : > { %8721 = vmatmul.mubr.bf16.gmra.mrb[124].mxu1 %v4763_v31 }
 0x399   : > { %v11742_v1 = vadd.f32 %v8197_v54, %v11619_v19 }
 0x39b   : > { %v8198_v2 = vpop.f32.mrb[236].mxu0 }
 0x39c   : > { %v8199_v4 = vpop.f32.mrb[237].mxu0 }
 0x39d   : > { %v8200_v34 = vadd.f32 %v8199_v4, %v8198_v2  ;;  %v8201_v30 = vpop.f32.mrb[238].mxu0 }
 0x39e   : > { %v8202_v61 = vpop.f32.mrb[239].mxu0 }
 0x39f   : > { %v11745_v3 = vadd.f32 %v8200_v34, %v11625_v24  ;;  %v8203_v25 = vadd.f32 %v8202_v61, %v8201_v30 }
 0x3a1   : > { %v11748_v40 = vadd.f32 %v8203_v25, %v11628_v37 }
 0x3a3   : > { %v8204_v0 = vpop.f32.mrb[240].mxu0 }
 0x3a4   : > { %v8205_v62 = vpop.f32.mrb[241].mxu0 }
 0x3a5   : > { %v8206_v45 = vadd.f32 %v8205_v62, %v8204_v0  ;;  %v8207_v5 = vpop.f32.mrb[242].mxu0 }
 0x3a6   : > { %v8208_v57 = vpop.f32.mrb[243].mxu0 }
 0x3a7   : > { %v11751_v19 = vadd.f32 %v8206_v45, %v11633_v20  ;;  %v8209_v43 = vadd.f32 %v8208_v57, %v8207_v5 }
 0x3a9   : > { %v11754_v38 = vadd.f32 %v8209_v43, %v11638_v17 }
 0x3ab   : > { %v8210_v18 = vpop.f32.mrb[244].mxu0 }
 0x3ac   : > { %v8211_v53 = vpop.f32.mrb[245].mxu0 }
 0x3ad   : > { %v8212_v24 = vadd.f32 %v8211_v53, %v8210_v18  ;;  %v8213_v36 = vpop.f32.mrb[246].mxu0 }
 0x3ae   : > { %v8214_v10 = vpop.f32.mrb[247].mxu0 }
 0x3af   : > { %v11757_v37 = vadd.f32 %v8212_v24, %v11642_v6  ;;  %v8215_v49 = vadd.f32 %v8214_v10, %v8213_v36 }
 0x3b1   : > { %v11760_v22 = vadd.f32 %v8215_v49, %v11647_v56 }
 0x3b3   : > { %v8216_v55 = vpop.f32.mrb[248].mxu0  ;;  %v8316_v20 = vpop.f32.mrb[128].mxu1 }
 0x3b4   : > { %v8217_v9 = vpop.f32.mrb[249].mxu0  ;;  %v8317_v39 = vpop.f32.mrb[129].mxu1 }
 0x3b5   : > { %v8218_v7 = vadd.f32 %v8217_v9, %v8216_v55  ;;  %v8219_v11 = vpop.f32.mrb[250].mxu0  ;;  %v8318_v21 = vadd.f32 %v8317_v39, %v8316_v20  ;;  %v8319_v58 = vpop.f32.mrb[130].mxu1 }
 0x3b6   : > { %v8220_v17 = vpop.f32.mrb[251].mxu0  ;;  %v8320_v54 = vpop.f32.mrb[131].mxu1 }
 0x3b7   : > { %v11763_v33 = vadd.f32 %v8218_v7, %v11652_v29  ;;  %v8221_v31 = vadd.f32 %v8220_v17, %v8219_v11  ;;  %v8321_v6 = vadd.f32 %v8320_v54, %v8319_v58  ;;  %v11766_v2 = vadd.f32 %v11720_v8, %v8318_v21 }
 0x3b9   : > { %v11769_v56 = vadd.f32 %v8221_v31, %v11654_v15  ;;  %v11772_v4 = vadd.f32 %v11723_v41, %v8321_v6 }
 0x3bb   : > { %v8222_v34 = vpop.f32.mrb[252].mxu0  ;;  %v8322_v61 = vpop.f32.mrb[132].mxu1 }
 0x3bc   : > { %v8223_v30 = vpop.f32.mrb[253].mxu0  ;;  %v8323_v62 = vpop.f32.mrb[133].mxu1 }
 0x3bd   : > { %v8224_v25 = vadd.f32 %v8223_v30, %v8222_v34  ;;  %v8225_v0 = vpop.f32.mrb[254].mxu0  ;;  %v8324_v45 = vadd.f32 %v8323_v62, %v8322_v61  ;;  %v8325_v5 = vpop.f32.mrb[134].mxu1 }
 0x3be   : > { %v8226_v29 = vpop.f32.mrb[255].mxu0  ;;  %v8326_v43 = vpop.f32.mrb[135].mxu1 }
 0x3bf   : > { %v11775_v57 = vadd.f32 %v8224_v25, %v11658_v12  ;;  %v8227_v8 = vadd.f32 %v8226_v29, %v8225_v0  ;;  %v8327_v18 = vadd.f32 %v8326_v43, %v8325_v5  ;;  %v11778_v15 = vadd.f32 %v11729_v14, %v8324_v45 }
 0x3c1   : > { %v11781_v41 = vadd.f32 %v8227_v8, %v11660_v52  ;;  %v11784_v53 = vadd.f32 %v11732_v35, %v8327_v18 }
 0x3c3   : > { %v8228_v24 = vpop.f32.mrb[0].mxu0  ;;  %v8328_v10 = vpop.f32.mrb[136].mxu1 }
 0x3c4   : > { %v8229_v36 = vpop.f32.mrb[1].mxu0  ;;  %v8329_v9 = vpop.f32.mrb[137].mxu1 }
 0x3c5   : > { %v8230_v49 = vadd.f32 %v8229_v36, %v8228_v24  ;;  %v8231_v55 = vpop.f32.mrb[2].mxu0  ;;  %v8330_v20 = vadd.f32 %v8329_v9, %v8328_v10  ;;  %v8331_v7 = vpop.f32.mrb[138].mxu1 }
 0x3c6   : > { %v8232_v12 = vpop.f32.mrb[3].mxu0  ;;  %v8332_v39 = vpop.f32.mrb[139].mxu1 }
 0x3c7   : > { %v11787_v11 = vadd.f32 %v8230_v49, %v11666_v26  ;;  %v8233_v14 = vadd.f32 %v8232_v12, %v8231_v55  ;;  %v8333_v17 = vadd.f32 %v8332_v39, %v8331_v7  ;;  %v11790_v52 = vadd.f32 %v11739_v51, %v8330_v20 }
 0x3c9   : > { %v11793_v35 = vadd.f32 %v8233_v14, %v11669_v47  ;;  %v11796_v21 = vadd.f32 %v11742_v1, %v8333_v17 }
 0x3cb   : > { %v8234_v58 = vpop.f32.mrb[4].mxu0  ;;  %v8334_v54 = vpop.f32.mrb[140].mxu1 }
 0x3cc   : > { %v8235_v31 = vpop.f32.mrb[5].mxu0  ;;  %v8335_v30 = vpop.f32.mrb[141].mxu1 }
 0x3cd   : > { %v8236_v6 = vadd.f32 %v8235_v31, %v8234_v58  ;;  %v8237_v34 = vpop.f32.mrb[6].mxu0  ;;  %v8336_v61 = vadd.f32 %v8335_v30, %v8334_v54  ;;  %v8337_v25 = vpop.f32.mrb[142].mxu1 }
 0x3ce   : > { %v8238_v26 = vpop.f32.mrb[7].mxu0  ;;  %v8338_v62 = vpop.f32.mrb[143].mxu1 }
 0x3cf   : > { %v11799_v0 = vadd.f32 %v8236_v6, %v11676_v16  ;;  %v8239_v51 = vadd.f32 %v8238_v26, %v8237_v34  ;;  %v8339_v29 = vadd.f32 %v8338_v62, %v8337_v25  ;;  %v11802_v47 = vadd.f32 %v11745_v3, %v8336_v61 }
 0x3d1   : > { %v11805_v1 = vadd.f32 %v8239_v51, %v11679_v27  ;;  %v11808_v45 = vadd.f32 %v11748_v40, %v8339_v29 }
 0x3d3   : > { %v8240_v5 = vpop.f32.mrb[8].mxu0  ;;  %v8340_v43 = vpop.f32.mrb[144].mxu1 }
 0x3d4   : > { %v8241_v8 = vpop.f32.mrb[9].mxu0  ;;  %v8341_v36 = vpop.f32.mrb[145].mxu1 }
 0x3d5   : > { %v8242_v18 = vadd.f32 %v8241_v8, %v8240_v5  ;;  %v8243_v24 = vpop.f32.mrb[10].mxu0  ;;  %v8342_v10 = vadd.f32 %v8341_v36, %v8340_v43  ;;  %v8343_v49 = vpop.f32.mrb[146].mxu1 }
 0x3d6   : > { %v8244_v16 = vpop.f32.mrb[11].mxu0  ;;  %v8344_v9 = vpop.f32.mrb[147].mxu1 }
 0x3d7   : > { %v11811_v55 = vadd.f32 %v8242_v18, %v11684_v13  ;;  %v8245_v3 = vadd.f32 %v8244_v16, %v8243_v24  ;;  %v8345_v12 = vadd.f32 %v8344_v9, %v8343_v49  ;;  %v11814_v27 = vadd.f32 %v11751_v19, %v8342_v10 }
 0x3d9   : > { %v11817_v40 = vadd.f32 %v8245_v3, %v11686_v23  ;;  %v11820_v20 = vadd.f32 %v11754_v38, %v8345_v12 }
 0x3db   : > { %v8246_v7 = vpop.f32.mrb[12].mxu0  ;;  %v8346_v39 = vpop.f32.mrb[148].mxu1 }
 0x3dc   : > { %v8247_v14 = vpop.f32.mrb[13].mxu0  ;;  %v8347_v31 = vpop.f32.mrb[149].mxu1 }
 0x3dd   : > { %v8248_v17 = vadd.f32 %v8247_v14, %v8246_v7  ;;  %v8249_v58 = vpop.f32.mrb[14].mxu0  ;;  %v8348_v54 = vadd.f32 %v8347_v31, %v8346_v39  ;;  %v8349_v6 = vpop.f32.mrb[150].mxu1 }
 0x3de   : > { %v8250_v13 = vpop.f32.mrb[15].mxu0  ;;  %v8350_v30 = vpop.f32.mrb[151].mxu1 }
 0x3df   : > { %v11823_v34 = vadd.f32 %v8248_v17, %v11689_v59  ;;  %v8251_v19 = vadd.f32 %v8250_v13, %v8249_v58  ;;  %v8351_v26 = vadd.f32 %v8350_v30, %v8349_v6  ;;  %v11826_v23 = vadd.f32 %v11757_v37, %v8348_v54 }
 0x3e1   : > { %v11829_v38 = vadd.f32 %v8251_v19, %v11691_v48  ;;  %v11832_v61 = vadd.f32 %v11760_v22, %v8351_v26 }
 0x3e3   : > { %v8252_v25 = vpop.f32.mrb[16].mxu0  ;;  %v8352_v62 = vpop.f32.mrb[152].mxu1 }
 0x3e4   : > { %v8253_v51 = vpop.f32.mrb[17].mxu0  ;;  %v8353_v8 = vpop.f32.mrb[153].mxu1 }
 0x3e5   : > { %v8254_v29 = vadd.f32 %v8253_v51, %v8252_v25  ;;  %v8255_v5 = vpop.f32.mrb[18].mxu0  ;;  %v8354_v43 = vadd.f32 %v8353_v8, %v8352_v62  ;;  %v8355_v18 = vpop.f32.mrb[154].mxu1 }
 0x3e6   : > { %v8256_v59 = vpop.f32.mrb[19].mxu0  ;;  %v8356_v36 = vpop.f32.mrb[155].mxu1 }
 0x3e7   : > { %v11835_v24 = vadd.f32 %v8254_v29, %v11695_v63  ;;  %v8257_v37 = vadd.f32 %v8256_v59, %v8255_v5  ;;  %v8357_v16 = vadd.f32 %v8356_v36, %v8355_v18  ;;  %v11838_v48 = vadd.f32 %v11763_v33, %v8354_v43 }
 0x3e9   : > { %v11841_v22 = vadd.f32 %v8257_v37, %v11697_v28  ;;  %v11844_v10 = vadd.f32 %v11769_v56, %v8357_v16 }
 0x3eb   : > { %v8258_v49 = vpop.f32.mrb[20].mxu0  ;;  %v8358_v9 = vpop.f32.mrb[156].mxu1 }
 0x3ec   : > { %v8259_v3 = vpop.f32.mrb[21].mxu0  ;;  %v8359_v14 = vpop.f32.mrb[157].mxu1 }
 0x3ed   : > { %v8260_v12 = vadd.f32 %v8259_v3, %v8258_v49  ;;  %v8261_v7 = vpop.f32.mrb[22].mxu0  ;;  %v8360_v39 = vadd.f32 %v8359_v14, %v8358_v9  ;;  %v8361_v17 = vpop.f32.mrb[158].mxu1 }
 0x3ee   : > { %v8262_v63 = vpop.f32.mrb[23].mxu0  ;;  %v8362_v31 = vpop.f32.mrb[159].mxu1 }
 0x3ef   : > { %v11847_v58 = vadd.f32 %v8260_v12, %v11701_v60  ;;  %v8263_v33 = vadd.f32 %v8262_v63, %v8261_v7  ;;  %v8363_v13 = vadd.f32 %v8362_v31, %v8361_v17  ;;  %v11850_v28 = vadd.f32 %v11775_v57, %v8360_v39 }
 0x3f1   : > { %v11853_v56 = vadd.f32 %v8263_v33, %v11703_v46  ;;  %v11856_v54 = vadd.f32 %v11781_v41, %v8363_v13 }
 0x3f3   : > { %v8264_v6 = vpop.f32.mrb[24].mxu0  ;;  %v8364_v30 = vpop.f32.mrb[160].mxu1 }
 0x3f4   : > { %v8265_v19 = vpop.f32.mrb[25].mxu0  ;;  %v8365_v51 = vpop.f32.mrb[161].mxu1 }
 0x3f5   : > { %v8266_v26 = vadd.f32 %v8265_v19, %v8264_v6  ;;  %v8267_v25 = vpop.f32.mrb[26].mxu0  ;;  %v8366_v62 = vadd.f32 %v8365_v51, %v8364_v30  ;;  %v8367_v29 = vpop.f32.mrb[162].mxu1 }
 0x3f6   : > { %v8268_v60 = vpop.f32.mrb[27].mxu0  ;;  %v8368_v57 = vpop.f32.mrb[163].mxu1 }
 0x3f7   : > { %v8939_v5 = vadd.f32 %v8266_v26, %v11707_v50  ;;  %v8269_v8 = vadd.f32 %v8268_v60, %v8267_v25  ;;  %v8369_v59 = vadd.f32 %v8368_v57, %v8367_v29  ;;  %v11860_v46 = vadd.f32 %v11787_v11, %v8366_v62 }
 0x3f9   : > { %v8945_v41 = vadd.f32 %v8269_v8, %v11709_v32  ;;  %v11864_v43 = vadd.f32 %v11793_v35, %v8369_v59 }
 0x3fb   : > { %v8270_v18 = vpop.f32.mrb[28].mxu0  ;;  %v8370_v36 = vpop.f32.mrb[164].mxu1 }
 0x3fc   : > { %v8271_v37 = vpop.f32.mrb[29].mxu0  ;;  %v8371_v3 = vpop.f32.mrb[165].mxu1 }
 0x3fd   : > { %v8272_v16 = vadd.f32 %v8271_v37, %v8270_v18  ;;  %v8273_v49 = vpop.f32.mrb[30].mxu0  ;;  %v8372_v12 = vadd.f32 %v8371_v3, %v8370_v36  ;;  %v8373_v50 = vpop.f32.mrb[166].mxu1 }
 0x3fe   : > { %v8274_v9 = vpop.f32.mrb[31].mxu0  ;;  %v8374_v63 = vpop.f32.mrb[167].mxu1 }
 0x3ff   : > { %v8936_v7 = vadd.f32 %v8272_v16, %v11713_v42  ;;  %v8275_v14 = vadd.f32 %v8274_v9, %v8273_v49  ;;  %v8375_v11 = vadd.f32 %v8374_v63, %v8373_v50  ;;  %v11868_v39 = vadd.f32 %v11799_v0, %v8372_v12 }
 0x401   : > { %v8942_v32 = vadd.f32 %v8275_v14, %v11715_v44  ;;  %v11872_v35 = vadd.f32 %v11805_v1, %v8375_v11 }
 0x403   : > { %v8376_v17 = vpop.f32.mrb[168].mxu1 }
 0x404   : > { %v8377_v33 = vpop.f32.mrb[169].mxu1 }
 0x405   : > { %v8378_v31 = vadd.f32 %v8377_v33, %v8376_v17  ;;  %v8379_v13 = vpop.f32.mrb[170].mxu1 }
 0x406   : > { %v8380_v6 = vpop.f32.mrb[171].mxu1 }
 0x407   : > { %v8381_v19 = vadd.f32 %v8380_v6, %v8379_v13  ;;  %v11875_v30 = vadd.f32 %v11811_v55, %v8378_v31 }
 0x409   : > { %v11878_v42 = vadd.f32 %v11817_v40, %v8381_v19 }
 0x40b   : > { %v8382_v26 = vpop.f32.mrb[172].mxu1 }
 0x40c   : > { %v8383_v0 = vpop.f32.mrb[173].mxu1 }
 0x40d   : > { %v8384_v25 = vadd.f32 %v8383_v0, %v8382_v26  ;;  %v8385_v51 = vpop.f32.mrb[174].mxu1 }
 0x40e   : > { %v8386_v44 = vpop.f32.mrb[175].mxu1 }
 0x40f   : > { %v8387_v60 = vadd.f32 %v8386_v44, %v8385_v51  ;;  %v11881_v1 = vadd.f32 %v11823_v34, %v8384_v25  ;;  %v11916_v44 = vld [vmem:[%s12139_s6] ss:$0 sm:$0xff] }
 0x411   : > { %v11884_v62 = vadd.f32 %v11829_v38, %v8387_v60 }
 0x413   : > { %v8388_v29 = vpop.f32.mrb[176].mxu1 }
 0x414   : > { %v8389_v8 = vpop.f32.mrb[177].mxu1 }
 0x415   : > { %v8390_v57 = vadd.f32 %v8389_v8, %v8388_v29  ;;  %v8391_v55 = vpop.f32.mrb[178].mxu1 }
 0x416   : > { %v8392_v59 = vpop.f32.mrb[179].mxu1 }
 0x417   : > { %v8393_v18 = vadd.f32 %v8392_v59, %v8391_v55  ;;  %v11887_v40 = vadd.f32 %v11835_v24, %v8390_v57  ;;  %v6860_v57 = vld [vmem:[%s9716_s29 + $0x10] sm:$0xff] }
 0x419   : > { %v11890_v37 = vadd.f32 %v11841_v22, %v8393_v18  ;;  %v6858_v18 = vld [vmem:[%s9716_s29] sm:$0xff] }
 0x41b   : > { %v8394_v36 = vpop.f32.mrb[180].mxu1 }
 0x41c   : > { %v8395_v16 = vpop.f32.mrb[181].mxu1 }
 0x41d   : > { %v8396_v49 = vadd.f32 %v8395_v16, %v8394_v36  ;;  %v8397_v34 = vpop.f32.mrb[182].mxu1  ;;  %v6861_v16 = vld [vmem:[%s9716_s29 + $0x18] sm:$0xff] }
 0x41e   : > { %v8398_v3 = vpop.f32.mrb[183].mxu1 }
 0x41f   : > { %v8399_v9 = vadd.f32 %v8398_v3, %v8397_v34  ;;  %v11893_v38 = vadd.f32 %v11847_v58, %v8396_v49 }
 0x421   : > { %v11896_v12 = vadd.f32 %v11853_v56, %v8399_v9 }
 0x423   : > { %v8400_v50 = vpop.f32.mrb[184].mxu1 }
 0x424   : > { %v8401_v14 = vpop.f32.mrb[185].mxu1 }
 0x425   : > { %v8402_v24 = vadd.f32 %v8401_v14, %v8400_v50  ;;  %v8403_v63 = vpop.f32.mrb[186].mxu1 }
 0x426   : > { %v8404_v11 = vpop.f32.mrb[187].mxu1 }
 0x427   : > { %v8405_v22 = vadd.f32 %v8404_v11, %v8403_v63  ;;  %v11898_v17 = vadd.f32 %v8939_v5, %v8402_v24  ;;  %v11910_v5 = vld [vmem:[%s12138_s5] ss:$0 sm:$0xff] }
 0x429   : > { %v11900_v33 = vadd.f32 %v8945_v41, %v8405_v22 }
 0x42b   : > { %v8406_v31 = vpop.f32.mrb[188].mxu1 }
 0x42c   : > { %v8407_v13 = vpop.f32.mrb[189].mxu1 }
 0x42d   : > { %v8408_v6 = vadd.f32 %v8407_v13, %v8406_v31  ;;  %v8409_v58 = vpop.f32.mrb[190].mxu1 }
 0x42e   : > { %v8410_v19 = vpop.f32.mrb[191].mxu1 }
 0x42f   : > { %v8411_v56 = vadd.f32 %v8410_v19, %v8409_v58  ;;  %v11902_v26 = vadd.f32 %v8936_v7, %v8408_v6  ;;  %v6864_v19 = vld [vmem:[%s9716_s29 + $0x30] sm:$0xff] }
 0x431   : > { %v11904_v0 = vadd.f32 %v8942_v32, %v8411_v56 }
 0x433   : > { %v8694_v25 = vpop.f32.mrb[96].mxu1 }
 0x434   : > { %v8854_v41 = vadd.f32 %v11778_v15, %v8694_v25  ;;  %v6557_v51 = vpop.f32.mrb[97].mxu1 }
 0x435   : > { %v8857_v7 = vadd.f32 %v11766_v2, %v6557_v51  ;;  %v8695_v32 = vpop.f32.mrb[98].mxu1 }
 0x436   : > { %v6789_v60 = vmul.f32 %v8854_v41, %v11910_v5  ;;  %v8860_v29 = vadd.f32 %v11784_v53, %v8695_v32  ;;  %v6560_v8 = vpop.f32.mrb[99].mxu1  ;;  %v6859_v53 = vld [vmem:[%s9716_s29 + $0x8] sm:$0xff]  ;;  %v6862_v41 = vld [vmem:[%s9716_s29 + $0x20] sm:$0xff] }
 0x437   : > { %v6787_v15 = vmul.f32 %v8857_v7, %v11910_v5  ;;  %v8863_v55 = vadd.f32 %v11772_v4, %v6560_v8  ;;  %v6865_v7 = vld [vmem:[%s9716_s29 + $0x38] sm:$0xff] }
 0x438   : > { %v6828_v59 = vadd.f32 %v11916_v44, %v6789_v60  ;;  %v6790_v36 = vmul.f32 %v8860_v29, %v11910_v5  ;;  %v6863_v29 = vld [vmem:[%s9716_s29 + $0x28] sm:$0xff] }
 0x439   : > { %v6826_v2 = vadd.f32 %v11916_v44, %v6787_v15  ;;  %v6788_v49 = vmul.f32 %v8863_v55, %v11910_v5 }
 0x43a   : > { %v6892_v34 = vadd.f32 %v6860_v57, %v6828_v59  ;;  %v6829_v3 = vadd.f32 %v11916_v44, %v6790_v36 }
 0x43b   : > { %v6890_v9 = vadd.f32 %v6858_v18, %v6826_v2  ;;  %v6827_v50 = vadd.f32 %v11916_v44, %v6788_v49  ;;  %v8698_v14 = vpop.f32.mrb[100].mxu1 }
 0x43c   : > { %6924 = vst [vmem:[%s11935_s16 + $0x10] sm:$0xff] %v6892_v34  ;;  %v6893_v4 = vadd.f32 %v6861_v16, %v6829_v3  ;;  %v8866_v24 = vadd.f32 %v11802_v47, %v8698_v14  ;;  %v6573_v63 = vpop.f32.mrb[101].mxu1  ;;  %v6868_v3 = vld [vmem:[%s9716_s29 + $0x50] sm:$0xff] }
 0x43d   : > { %6922 = vst [vmem:[%s11935_s16] sm:$0xff] %v6890_v9  ;;  %v6891_v11 = vadd.f32 %v6859_v53, %v6827_v50  ;;  %v8869_v22 = vadd.f32 %v11790_v52, %v6573_v63  ;;  %v8699_v31 = vpop.f32.mrb[102].mxu1  ;;  %v6866_v50 = vld [vmem:[%s9716_s29 + $0x40] sm:$0xff] }
 0x43e   : > { %6925 = vst [vmem:[%s11935_s16 + $0x18] sm:$0xff] %v6893_v4  ;;  %v6793_v13 = vmul.f32 %v8866_v24, %v11910_v5  ;;  %v8872_v6 = vadd.f32 %v11808_v45, %v8699_v31  ;;  %v6576_v58 = vpop.f32.mrb[103].mxu1  ;;  %v6869_v4 = vld [vmem:[%s9716_s29 + $0x58] sm:$0xff] }
 0x43f   : > { %6923 = vst [vmem:[%s11935_s16 + $0x8] sm:$0xff] %v6891_v11  ;;  %v6791_v56 = vmul.f32 %v8869_v22, %v11910_v5  ;;  %v8875_v47 = vadd.f32 %v11796_v21, %v6576_v58  ;;  %v6867_v11 = vld [vmem:[%s9716_s29 + $0x48] sm:$0xff] }
 0x440   : > { %v6832_v25 = vadd.f32 %v11916_v44, %v6793_v13  ;;  %v6794_v52 = vmul.f32 %v8872_v6, %v11910_v5 }
 0x441   : > { %v6830_v51 = vadd.f32 %v11916_v44, %v6791_v56  ;;  %v6792_v45 = vmul.f32 %v8875_v47, %v11910_v5 }
 0x442   : > { %v6896_v32 = vadd.f32 %v6864_v19, %v6832_v25  ;;  %v6833_v60 = vadd.f32 %v11916_v44, %v6794_v52 }
 0x443   : > { %v6894_v8 = vadd.f32 %v6862_v41, %v6830_v51  ;;  %v6831_v21 = vadd.f32 %v11916_v44, %v6792_v45  ;;  %v8702_v57 = vpop.f32.mrb[104].mxu1  ;;  %v6872_v51 = vld [vmem:[%s9716_s29 + $0x70] sm:$0xff] }
 0x444   : > { %6928 = vst [vmem:[%s11935_s16 + $0x30] sm:$0xff] %v6896_v32  ;;  %v6897_v15 = vadd.f32 %v6865_v7, %v6833_v60  ;;  %v8878_v55 = vadd.f32 %v11826_v23, %v8702_v57  ;;  %v6589_v59 = vpop.f32.mrb[105].mxu1  ;;  %v6870_v32 = vld [vmem:[%s9716_s29 + $0x60] sm:$0xff]  ;;  %v6871_v57 = vld [vmem:[%s9716_s29 + $0x68] sm:$0xff] }
 0x445   : > { %6926 = vst [vmem:[%s11935_s16 + $0x20] sm:$0xff] %v6894_v8  ;;  %v6895_v18 = vadd.f32 %v6863_v29, %v6831_v21  ;;  %v8881_v36 = vadd.f32 %v11814_v27, %v6589_v59  ;;  %v8703_v2 = vpop.f32.mrb[106].mxu1  ;;  %v6873_v29 = vld [vmem:[%s9716_s29 + $0x78] sm:$0xff] }
 0x446   : > { %6929 = vst [vmem:[%s11935_s16 + $0x38] sm:$0xff] %v6897_v15  ;;  %v6797_v16 = vmul.f32 %v8878_v55, %v11910_v5  ;;  %v8884_v49 = vadd.f32 %v11832_v61, %v8703_v2  ;;  %v6592_v34 = vpop.f32.mrb[107].mxu1 }
 0x447   : > { %6927 = vst [vmem:[%s11935_s16 + $0x28] sm:$0xff] %v6895_v18  ;;  %v6795_v53 = vmul.f32 %v8881_v36, %v11910_v5  ;;  %v8887_v23 = vadd.f32 %v11820_v20, %v6592_v34 }
 0x448   : > { %v6836_v9 = vadd.f32 %v11916_v44, %v6797_v16  ;;  %v6798_v27 = vmul.f32 %v8884_v49, %v11910_v5 }
 0x449   : > { %v6834_v14 = vadd.f32 %v11916_v44, %v6795_v53  ;;  %v6796_v61 = vmul.f32 %v8887_v23, %v11910_v5  ;;  %v6876_v23 = vld [vmem:[%s9716_s29 + $0x90] sm:$0xff] }
 0x44a   : > { %v6900_v24 = vadd.f32 %v6868_v3, %v6836_v9  ;;  %v6837_v63 = vadd.f32 %v11916_v44, %v6798_v27  ;;  %v6874_v27 = vld [vmem:[%s9716_s29 + $0x80] sm:$0xff] }
 0x44b   : > { %v6898_v22 = vadd.f32 %v6866_v50, %v6834_v14  ;;  %v6835_v20 = vadd.f32 %v11916_v44, %v6796_v61  ;;  %v8706_v31 = vpop.f32.mrb[108].mxu1 }
 0x44c   : > { %6932 = vst [vmem:[%s11935_s16 + $0x50] sm:$0xff] %v6900_v24  ;;  %v6901_v13 = vadd.f32 %v6869_v4, %v6837_v63  ;;  %v8890_v6 = vadd.f32 %v11850_v28, %v8706_v31  ;;  %v6605_v58 = vpop.f32.mrb[109].mxu1  ;;  %v6877_v4 = vld [vmem:[%s9716_s29 + $0x98] sm:$0xff]  ;;  %v6875_v63 = vld [vmem:[%s9716_s29 + $0x88] sm:$0xff] }
 0x44d   : > { %6930 = vst [vmem:[%s11935_s16 + $0x40] sm:$0xff] %v6898_v22  ;;  %v6899_v19 = vadd.f32 %v6867_v11, %v6835_v20  ;;  %v8893_v56 = vadd.f32 %v11838_v48, %v6605_v58  ;;  %v8707_v47 = vpop.f32.mrb[110].mxu1 }
 0x44e   : > { %6933 = vst [vmem:[%s11935_s16 + $0x58] sm:$0xff] %v6901_v13  ;;  %v6801_v25 = vmul.f32 %v8890_v6, %v11910_v5  ;;  %v8896_v41 = vadd.f32 %v11856_v54, %v8707_v47  ;;  %v6608_v52 = vpop.f32.mrb[111].mxu1 }
 0x44f   : > { %6931 = vst [vmem:[%s11935_s16 + $0x48] sm:$0xff] %v6899_v19  ;;  %v6799_v7 = vmul.f32 %v8893_v56, %v11910_v5  ;;  %v8899_v28 = vadd.f32 %v11844_v10, %v6608_v52 }
 0x450   : > { %v6840_v45 = vadd.f32 %v11916_v44, %v6801_v25  ;;  %v6802_v48 = vmul.f32 %v8896_v41, %v11910_v5  ;;  %v6880_v41 = vld [vmem:[%s9716_s29 + $0xb0] sm:$0xff] }
 0x451   : > { %v6838_v60 = vadd.f32 %v11916_v44, %v6799_v7  ;;  %v6800_v54 = vmul.f32 %v8899_v28, %v11910_v5  ;;  %v6878_v7 = vld [vmem:[%s9716_s29 + $0xa0] sm:$0xff] }
 0x452   : > { %v6904_v8 = vadd.f32 %v6872_v51, %v6840_v45  ;;  %v6841_v21 = vadd.f32 %v11916_v44, %v6802_v48  ;;  %v6881_v45 = vld [vmem:[%s9716_s29 + $0xb8] sm:$0xff] }
 0x453   : > { %v6902_v15 = vadd.f32 %v6870_v32, %v6838_v60  ;;  %v6839_v10 = vadd.f32 %v11916_v44, %v6800_v54  ;;  %v8710_v55 = vpop.f32.mrb[112].mxu1  ;;  %v6879_v60 = vld [vmem:[%s9716_s29 + $0xa8] sm:$0xff] }
 0x454   : > { %6936 = vst [vmem:[%s11935_s16 + $0x70] sm:$0xff] %v6904_v8  ;;  %v6905_v59 = vadd.f32 %v6873_v29, %v6841_v21  ;;  %v8902_v18 = vadd.f32 %v11868_v39, %v8710_v55  ;;  %v6621_v36 = vpop.f32.mrb[113].mxu1 }
 0x455   : > { %6934 = vst [vmem:[%s11935_s16 + $0x60] sm:$0xff] %v6902_v15  ;;  %v6903_v2 = vadd.f32 %v6871_v57, %v6839_v10  ;;  %v8905_v16 = vadd.f32 %v11860_v46, %v6621_v36  ;;  %v8711_v49 = vpop.f32.mrb[114].mxu1 }
 0x456   : > { %6937 = vst [vmem:[%s11935_s16 + $0x78] sm:$0xff] %v6905_v59  ;;  %v6805_v34 = vmul.f32 %v8902_v18, %v11910_v5  ;;  %v8908_v3 = vadd.f32 %v11872_v35, %v8711_v49  ;;  %v6624_v53 = vpop.f32.mrb[115].mxu1 }
 0x457   : > { %6935 = vst [vmem:[%s11935_s16 + $0x68] sm:$0xff] %v6903_v2  ;;  %v6803_v9 = vmul.f32 %v8905_v16, %v11910_v5  ;;  %v8911_v39 = vadd.f32 %v11864_v43, %v6624_v53  ;;  %v6884_v2 = vld [vmem:[%s9716_s29 + $0xd0] sm:$0xff]  ;;  %v6885_v53 = vld [vmem:[%s9716_s29 + $0xd8] sm:$0xff] }
 0x458   : > { %v6844_v50 = vadd.f32 %v11916_v44, %v6805_v34  ;;  %v6806_v46 = vmul.f32 %v8908_v3, %v11910_v5  ;;  %v6882_v34 = vld [vmem:[%s9716_s29 + $0xc0] sm:$0xff] }
 0x459   : > { %v6842_v14 = vadd.f32 %v11916_v44, %v6803_v9  ;;  %v6804_v35 = vmul.f32 %v8911_v39, %v11910_v5  ;;  %v6883_v39 = vld [vmem:[%s9716_s29 + $0xc8] sm:$0xff] }
 0x45a   : > { %v6908_v61 = vadd.f32 %v6876_v23, %v6844_v50  ;;  %v6845_v24 = vadd.f32 %v11916_v44, %v6806_v46 }
 0x45b   : > { %v6906_v11 = vadd.f32 %v6874_v27, %v6842_v14  ;;  %v6843_v43 = vadd.f32 %v11916_v44, %v6804_v35  ;;  %v8714_v22 = vpop.f32.mrb[116].mxu1 }
 0x45c   : > { %6940 = vst [vmem:[%s11935_s16 + $0x90] sm:$0xff] %v6908_v61  ;;  %v6909_v20 = vadd.f32 %v6877_v4, %v6845_v24  ;;  %v8914_v31 = vadd.f32 %v11881_v1, %v8714_v22  ;;  %v6637_v13 = vpop.f32.mrb[117].mxu1  ;;  %v6888_v22 = vld [vmem:[%s9716_s29 + $0xf0] sm:$0xff] }
 0x45d   : > { %6938 = vst [vmem:[%s11935_s16 + $0x80] sm:$0xff] %v6906_v11  ;;  %v6907_v6 = vadd.f32 %v6875_v63, %v6843_v43  ;;  %v8917_v58 = vadd.f32 %v11875_v30, %v6637_v13  ;;  %v8715_v19 = vpop.f32.mrb[118].mxu1 }
 0x45e   : > { %6941 = vst [vmem:[%s11935_s16 + $0x98] sm:$0xff] %v6909_v20  ;;  %v6809_v56 = vmul.f32 %v8914_v31, %v11910_v5  ;;  %v8920_v47 = vadd.f32 %v11884_v62, %v8715_v19  ;;  %v6640_v25 = vpop.f32.mrb[119].mxu1 }
 0x45f   : > { %6939 = vst [vmem:[%s11935_s16 + $0x88] sm:$0xff] %v6907_v6  ;;  %v6807_v52 = vmul.f32 %v8917_v58, %v11910_v5  ;;  %v8923_v1 = vadd.f32 %v11878_v42, %v6640_v25  ;;  %v6889_v58 = vld [vmem:[%s9716_s29 + $0xf8] sm:$0xff] }
 0x460   : > { %v6848_v51 = vadd.f32 %v11916_v44, %v6809_v56  ;;  %v6810_v30 = vmul.f32 %v8920_v47, %v11910_v5  ;;  %v6887_v56 = vld [vmem:[%s9716_s29 + $0xe8] sm:$0xff] }
 0x461   : > { %v6846_v28 = vadd.f32 %v11916_v44, %v6807_v52  ;;  %v6808_v62 = vmul.f32 %v8923_v1, %v11910_v5 }
 0x462   : > { %v6912_v32 = vadd.f32 %v6880_v41, %v6848_v51  ;;  %v6849_v48 = vadd.f32 %v11916_v44, %v6810_v30 }
 0x463   : > { %v6910_v29 = vadd.f32 %v6878_v7, %v6846_v28  ;;  %v6847_v42 = vadd.f32 %v11916_v44, %v6808_v62  ;;  %v8718_v54 = vpop.f32.mrb[120].mxu1 }
 0x464   : > { %6944 = vst [vmem:[%s11935_s16 + $0xb0] sm:$0xff] %v6912_v32  ;;  %v6913_v8 = vadd.f32 %v6881_v45, %v6849_v48  ;;  %v8926_v21 = vadd.f32 %v11893_v38, %v8718_v54  ;;  %v6653_v57 = vpop.f32.mrb[121].mxu1 }
 0x465   : > { %6942 = vst [vmem:[%s11935_s16 + $0xa0] sm:$0xff] %v6910_v29  ;;  %v6911_v15 = vadd.f32 %v6879_v60, %v6847_v42  ;;  %v8929_v10 = vadd.f32 %v11887_v40, %v6653_v57  ;;  %v8719_v55 = vpop.f32.mrb[122].mxu1 }
 0x466   : > { %6945 = vst [vmem:[%s11935_s16 + $0xb8] sm:$0xff] %v6913_v8  ;;  %v6813_v59 = vmul.f32 %v8926_v21, %v11910_v5  ;;  %v8932_v18 = vadd.f32 %v11896_v12, %v8719_v55  ;;  %v6656_v36 = vpop.f32.mrb[123].mxu1 }
 0x467   : > { %6943 = vst [vmem:[%s11935_s16 + $0xa8] sm:$0xff] %v6911_v15  ;;  %v6811_v16 = vmul.f32 %v8929_v10, %v11910_v5  ;;  %v8935_v38 = vadd.f32 %v11890_v37, %v6656_v36 }
 0x468   : > { %v6852_v49 = vadd.f32 %v11916_v44, %v6813_v59  ;;  %v6814_v40 = vmul.f32 %v8932_v18, %v11910_v5 }
 0x469   : > { %v6850_v3 = vadd.f32 %v11916_v44, %v6811_v16  ;;  %v6812_v12 = vmul.f32 %v8935_v38, %v11910_v5 }
 0x46a   : > { %v6916_v23 = vadd.f32 %v6884_v2, %v6852_v49  ;;  %v6853_v9 = vadd.f32 %v11916_v44, %v6814_v40 }
 0x46b   : > { %v6914_v50 = vadd.f32 %v6882_v34, %v6850_v3  ;;  %v6851_v37 = vadd.f32 %v11916_v44, %v6812_v12  ;;  %v8722_v27 = vpop.f32.mrb[124].mxu1 }
 0x46c   : > { %6948 = vst [vmem:[%s11935_s16 + $0xd0] sm:$0xff] %v6916_v23  ;;  %v6917_v46 = vadd.f32 %v6885_v53, %v6853_v9  ;;  %v8938_v14 = vadd.f32 %v11902_v26, %v8722_v27  ;;  %v6669_v4 = vpop.f32.mrb[125].mxu1 }
 0x46d   : > { %6946 = vst [vmem:[%s11935_s16 + $0xc0] sm:$0xff] %v6914_v50  ;;  %v6915_v35 = vadd.f32 %v6883_v39, %v6851_v37  ;;  %v8941_v61 = vadd.f32 %v11898_v17, %v6669_v4  ;;  %v8723_v24 = vpop.f32.mrb[126].mxu1  ;;  %v6886_v17 = vld [vmem:[%s9716_s29 + $0xe0] sm:$0xff]  ;;  %s9348_s29 = scalar_lea.vmem %s12085_s18, 4096 }
 0x46e   : > { %6949 = vst [vmem:[%s11935_s16 + $0xd8] sm:$0xff] %v6917_v46  ;;  %v6817_v63 = vmul.f32 %v8938_v14, %v11910_v5  ;;  %v8944_v11 = vadd.f32 %v11904_v0, %v8723_v24  ;;  %v6672_v43 = vpop.f32.mrb[127].mxu1  ;;  %p9349_p11 = scmp.ne.s32.totalorder %s12085_s18, %s9348_s29  ;;  %p9356_p1 = scmp.lt.s32.totalorder %s9354_s9, %s9348_s29 }
 0x46f   : > { %6947 = vst [vmem:[%s11935_s16 + $0xc8] sm:$0xff] %v6915_v35  ;;  %v6815_v26 = vmul.f32 %v8941_v61, %v11910_v5  ;;  %v8947_v20 = vadd.f32 %v11900_v33, %v6672_v43 }
 0x470   : > { %v6856_v31 = vadd.f32 %v11916_v44, %v6817_v63  ;;  %v6818_v13 = vmul.f32 %v8944_v11, %v11910_v5  ;;  %p9350_p12 = pnand %p9349_p11, %p9494_p5  ;;  %p9357_p2 = por %p9356_p1, %p9355_p0 }
 0x471   : > { %v6854_v6 = vadd.f32 %v11916_v44, %v6815_v26  ;;  %v6816_v0 = vmul.f32 %v8947_v20, %v11910_v5 }
 0x472   : > { %v6920_v19 = vadd.f32 %v6888_v22, %v6856_v31  ;;  %v6857_v33 = vadd.f32 %v11916_v44, %v6818_v13  ;;  %p9351_p13 = pneg %p9350_p12 }
 0x473   : > { %v6918_v47 = vadd.f32 %v6886_v17, %v6854_v6  ;;  %v6855_v25 = vadd.f32 %v11916_v44, %v6816_v0 }
 0x474   : > { %6952 = vst [vmem:[%s11935_s16 + $0xf0] sm:$0xff] %v6920_v19  ;;  %v6921_v41 = vadd.f32 %v6889_v58, %v6857_v33  ;;  %p9358_p3 = pnand %p9357_p2, %p9351_p13 }
 0x475   : > { %6950 = vst [vmem:[%s11935_s16 + $0xe0] sm:$0xff] %v6918_v47  ;;  %v6919_v5 = vadd.f32 %v6887_v56, %v6855_v25 }
 0x476   : > { %6953 = vst [vmem:[%s11935_s16 + $0xf8] sm:$0xff] %v6921_v41 }
 0x477   : > { %6951 = vst [vmem:[%s11935_s16 + $0xe8] sm:$0xff] %v6919_v5 }
 0x478   : > { %9361 = shalt.err (!%p9358_p3)
}
 0x479   : > { %s9362_s19 = scalar_lea.hbm %s12083_s22, 4096  ;;  %s9366_s15 = scalar_lea.hbm %s12140_s7, 8192 }
 0x47a   : > { %p9363_p4 = scmp.ne.s32.totalorder %s12083_s22, %s9362_s19  ;;  %p9367_p9 = scmp.lt.u32.totalorder %s12083_s22, %s12140_s7 }
 0x47b   : > { %p9368_p10 = scmp.lt.u32.totalorder %s9366_s15, %s9362_s19  ;;  %p9370_p12 = scmp.lt.u32.totalorder %s9362_s19, %s12083_s22 }
 0x47c   : > { %p9364_p7 = pnand %p9363_p4, %p9494_p5 }
 0x47d   : > { %p9369_p11 = por %p9368_p10, %p9367_p9 }
 0x47e   : > { %p9365_p8 = pneg %p9364_p7 }
 0x47f   : > { %p9371_p13 = por %p9370_p12, %p9369_p11 }
 0x481   : > { %p9372_p0 = pnand %p9371_p13, %p9365_p8 }
 0x483   : > { %9375 = shalt.err (!%p9372_p0)
}
 0x484   : > { %s9414_s20 = smov 128   ;;  %s9415_s21 = smov 8  }
 0x485   : > { %9044 = dma.vmem_to_hbm [thread:$0]  (%p9494_p5), %s12085_s18, 4096, %s12083_s22, %s12092_s28, %s9414_s20, %s9414_s20, %s9415_s21  }
 0x486 PF: > { %p9050_p1 = scmp.ge.s32.totalorder %s9410_s27, 2  ;;  %s6983_s29 = sand.u32 1, %s9398_s24  }
 0x487   : > { %s6984_s23 = scalar_lea.sflag [#allocation7], %s6983_s29 }
 0x488   : > { %p9047_p2 = pnand %p9050_p1, %p9498_p6 }
 0x48a   : > { %9393 = dma.done.wait (!%p9047_p2), %s6984_s23, 4096  }
 0x48b   : > { %9395 = vsyncadd (!%p9047_p2), %s6984_s23, 4294963200  ;;  %p17_p3 = scmp.ge.s32.totalorder %s9481_s30, 4   ;;  %s12250_s24 = smov %s9402_s25 }
 0x48c   : > { %s12251_s25 = smov %s9406_s26  ;;  %s12252_s26 = smov %s9492_s10 }
 0x48d   : > { %s12253_s27 = smov %s9481_s30  ;;  %19 = sbr.rel (!%p17_p3) target bundleno = 3 (0x3), region = 89 }
 0x494   :  { %6989 = vsyncpa [#allocation7], 1 }
 0x495   :  { %6991 = vsyncpa [#allocation7 + $0x1], 1 }

</bundles_post_ra>
